<compile_context>
chip_gen: v7x
topology: tpu7x:2x2x1
jax: 0.10.0
libtpu: 0.0.40
codegen_flags: <defaults>
</compile_context>

<pallas_src>
import functools

import jax
import jax.numpy as jnp
from jax.experimental import pallas as pl
from jax.experimental.pallas import tpu as pltpu

_VMEM_LIMIT = 32 * 1024 * 1024  # explicit scoped-VMEM budget (safe on v5e/v6e/v7x)


# ----------------------------- Pallas kernels ------------------------------

def _mm_kernel(x_ref, w_ref, b_ref, y_ref, *rest,
               activation, m_total, tm, with_stats):
    """y = x @ w + b (bf16 in, f32 acc); optional fused tanh; optional fused
    per-channel sum / sum-of-squares partials (for BatchNorm batch stats)."""
    y = jnp.dot(x_ref[...], w_ref[...], preferred_element_type=jnp.float32)
    y = y + b_ref[...]
    if activation == "tanh":
        y = jnp.tanh(y)
    y_ref[...] = y

    if with_stats:
        stats_ref = rest[0]
        if m_total % tm != 0:
            # mask rows that are only M-padding (they'd contribute `bias`)
            rows = pl.program_id(0) * tm + jax.lax.broadcasted_iota(
                jnp.int32, y.shape, 0)
            y = jnp.where(rows < m_total, y, 0.0)
        s1 = jnp.sum(y, axis=0, keepdims=True)          # (1, N)
        s2 = jnp.sum(y * y, axis=0, keepdims=True)      # (1, N)
        stats_ref[0, :, :] = jnp.concatenate([s1, s2], axis=0)


def pallas_matmul(x, w, b, *, activation="none", collect_stats=False, tm=512):
    """Tiled (M, K) @ (K, N) + b on the MXU, bf16 operands / f32 accumulation.

    Returns y (f32) and, if collect_stats, per-tile partial (sum, sumsq) of y
    per output column, shape (num_tiles, 2, N)."""
    M, K = x.shape
    N = w.shape[1]
    x = x.astype(jnp.bfloat16)
    w = w.astype(jnp.bfloat16)
    b2 = b.reshape(1, N).astype(jnp.float32)

    if M <= tm:
        tm_e, Mp = M, M                       # single full-extent block
    else:
        tm_e = tm                             # multiple of 8 (sublane)
        Mp = -(-M // tm_e) * tm_e
        if Mp != M:
            x = jnp.pad(x, ((0, Mp - M), (0, 0)))
    grid = Mp // tm_e

    out_shape = [jax.ShapeDtypeStruct((Mp, N), jnp.float32)]
    out_specs = [pl.BlockSpec((tm_e, N), lambda i: (i, 0))]
    if collect_stats:
        out_shape.append(jax.ShapeDtypeStruct((grid, 2, N), jnp.float32))
        out_specs.append(pl.BlockSpec((1, 2, N), lambda i: (i, 0, 0)))

    kernel = functools.partial(_mm_kernel, activation=activation,
                               m_total=M, tm=tm_e, with_stats=collect_stats)
    res = pl.pallas_call(
        kernel,
        grid=(grid,),
        in_specs=[pl.BlockSpec((tm_e, K), lambda i: (i, 0)),
                  pl.BlockSpec((K, N), lambda i: (0, 0)),
                  pl.BlockSpec((1, N), lambda i: (0, 0))],
        out_specs=tuple(out_specs) if collect_stats else out_specs[0],
        out_shape=tuple(out_shape) if collect_stats else out_shape[0],
        compiler_params=pltpu.CompilerParams(
            dimension_semantics=("parallel",),
            vmem_limit_bytes=_VMEM_LIMIT),
    )(x, w, b2)

    if collect_stats:
        y, stats = res
        return y[:M], stats
    return res[:M]


def _affine_relu_kernel(x_ref, st_ref, o_ref):
    o_ref[...] = jnp.maximum(x_ref[...] * st_ref[0:1, :] + st_ref[1:2, :], 0.0)


def affine_relu(x, scale, shift, *, tm=512):
    """ReLU(x * scale + shift) with per-(last-dim)-channel scale/shift.

    Folds rows into lanes so the stored last dim is 128-wide when possible
    (lane-dense stores), and tiles over rows with a parallel grid."""
    M, C = x.shape
    r = 1
    if C < 128 and 128 % C == 0 and M % (128 // C) == 0:
        r = 128 // C
    L, Mr = C * r, M // r
    xr = x.reshape(Mr, L).astype(jnp.float32)
    st = jnp.stack([jnp.tile(scale, r), jnp.tile(shift, r)],
                   axis=0).astype(jnp.float32)          # (2, L)

    if Mr <= tm:
        tm_e, Mp = Mr, Mr
    else:
        tm_e = tm
        Mp = -(-Mr // tm_e) * tm_e
        if Mp != Mr:
            xr = jnp.pad(xr, ((0, Mp - Mr), (0, 0)))
    grid = Mp // tm_e

    out = pl.pallas_call(
        _affine_relu_kernel,
        grid=(grid,),
        in_specs=[pl.BlockSpec((tm_e, L), lambda i: (i, 0)),
                  pl.BlockSpec((2, L), lambda i: (0, 0))],
        out_specs=pl.BlockSpec((tm_e, L), lambda i: (i, 0)),
        out_shape=jax.ShapeDtypeStruct((Mp, L), jnp.float32),
        compiler_params=pltpu.CompilerParams(
            dimension_semantics=("parallel",),
            vmem_limit_bytes=_VMEM_LIMIT),
    )(xr, st)
    return out[:Mr].reshape(M, C)


# --------------------------- JAX glue (layout) ------------------------------

def im2col3(x):
    """x: (N, H, W, C) -> (N*H*W, 9*C); 3x3 windows with zero-pad 1.
    K ordering is (tap_row, tap_col, channel)."""
    n, h, w, c = x.shape
    xp = jnp.pad(x, ((0, 0), (1, 1), (1, 1), (0, 0)))
    taps = []
    for di in range(3):
        for dj in range(3):
            taps.append(xp[:, di:di + h, dj:dj + w, :])
    p = jnp.stack(taps, axis=3)                 # (N, H, W, 9, C)
    return p.reshape(n * h * w, 9 * c)


def subpixel_weight(wt):
    """PyTorch ConvTranspose2d(k=4, s=2, p=1) weight (Cin, Cout, 4, 4) ->
    sub-pixel conv matrix (9*Cin, 4*Cout).  Column group s = 2*r + c is the
    output sub-pixel (r, c); row tap (di, dj) uses W[..., r+3-2di, c+3-2dj]."""
    cin, cout = wt.shape[0], wt.shape[1]
    wm = jnp.zeros((3, 3, cin, 4, cout), wt.dtype)
    for r in range(2):
        for c in range(2):
            for di in range(3):
                ky = r + 3 - 2 * di
                if not 0 <= ky <= 3:
                    continue
                for dj in range(3):
                    kx = c + 3 - 2 * dj
                    if not 0 <= kx <= 3:
                        continue
                    wm = wm.at[di, dj, :, 2 * r + c, :].set(wt[:, :, ky, kx])
    return wm.reshape(9 * cin, 4 * cout)


def conv3_weight(wt):
    """ConvTranspose2d(k=3, s=1, p=1) weight (Cin, Cout, 3, 3) -> im2col matrix
    (9*Cin, Cout) of the equivalent regular conv (flipped kernel)."""
    wf = jnp.flip(wt, axis=(2, 3))              # (Cin, Cout, 3, 3)
    wm = jnp.transpose(wf, (2, 3, 0, 1))        # (di, dj, Cin, Cout)
    return wm.reshape(-1, wt.shape[1])


def depth_to_space(y, n, h, w, cout):
    """y: (N*H*W, 4*Cout) with columns (subpixel, channel) -> NHWC (N,2H,2W,C)."""
    y = y.reshape(n, h, w, 2, 2, cout)
    y = jnp.transpose(y, (0, 1, 3, 2, 4, 5))
    return y.reshape(n, 2 * h, 2 * w, cout)


# ------------------------------ Generator -----------------------------------

def init_params(key, z_dim, dim):
    ks = jax.random.split(key, 10)
    s = 0.05
    return {
        "w_fc": s * jax.random.normal(ks[0], (z_dim, 4 * 4 * dim), jnp.float32),
        "b_fc": s * jax.random.normal(ks[1], (4 * 4 * dim,), jnp.float32),
        # ConvTranspose2d weights in PyTorch layout (Cin, Cout, kH, kW)
        "w1": s * jax.random.normal(ks[2], (dim, dim // 2, 4, 4), jnp.float32),
        "b1": s * jax.random.normal(ks[3], (dim // 2,), jnp.float32),
        "g1": jnp.ones((dim // 2,), jnp.float32),
        "be1": jnp.zeros((dim // 2,), jnp.float32),
        "w2": s * jax.random.normal(ks[4], (dim // 2, dim // 4, 4, 4), jnp.float32),
        "b2": s * jax.random.normal(ks[5], (dim // 4,), jnp.float32),
        "g2": jnp.ones((dim // 4,), jnp.float32),
        "be2": jnp.zeros((dim // 4,), jnp.float32),
        "w3": s * jax.random.normal(ks[6], (dim // 4, dim // 8, 4, 4), jnp.float32),
        "b3": s * jax.random.normal(ks[7], (dim // 8,), jnp.float32),
        "g3": jnp.ones((dim // 8,), jnp.float32),
        "be3": jnp.zeros((dim // 8,), jnp.float32),
        "w4": s * jax.random.normal(ks[8], (dim // 8, 3, 3, 3), jnp.float32),
        "b4": s * jax.random.normal(ks[9], (3,), jnp.float32),
    }


def generator_forward(z, params, *, dim):
    B = z.shape[0]
    # expand: Linear(z_dim, 4*4*dim), then view(B, dim, 4, 4) [NCHW] -> NHWC
    h = pallas_matmul(z, params["w_fc"], params["b_fc"])          # (B, 16*dim)
    x = h.reshape(B, dim, 4, 4).transpose(0, 2, 3, 1)             # (B, 4, 4, dim)

    # three ConvT(k4,s2,p1) + BN(train) + ReLU blocks via sub-pixel conv
    for i, cout in ((1, dim // 2), (2, dim // 4), (3, dim // 8)):
        n, hh, ww, _ = x.shape
        m = n * hh * ww
        patches = im2col3(x)                                      # (m, 9*Cin)
        wm = subpixel_weight(params[f"w{i}"])                     # (9*Cin, 4*Cout)
        b4 = jnp.tile(params[f"b{i}"], 4)
        y, stats_p = pallas_matmul(patches, wm, b4, collect_stats=True)

        # BatchNorm batch stats (biased var) from the fused partial sums.
        s = stats_p.sum(axis=0).reshape(2, 4, cout).sum(axis=1)   # (2, Cout)
        cnt = 4.0 * m                                             # N*H_out*W_out
        mean = s[0] / cnt
        var = s[1] / cnt - mean * mean
        scale = params[f"g{i}"] * jax.lax.rsqrt(var + 1e-5)
        shift = params[f"be{i}"] - mean * scale

        y = affine_relu(y, jnp.tile(scale, 4), jnp.tile(shift, 4))
        x = depth_to_space(y, n, hh, ww, cout)                    # (n, 2h, 2w, Cout)

    # final: ConvT(dim//8 -> 3, k3, s1, p1) + Tanh  == 3x3 conv of flipped kernel
    n, hh, ww, _ = x.shape
    patches = im2col3(x)                                          # (n*h*w, 9*Cin)
    y = pallas_matmul(patches, conv3_weight(params["w4"]), params["b4"],
                      activation="tanh")                          # (n*h*w, 3)
    # TODO(synk): final 3-channel store is lane-sparse; could emit (3, M) instead.
    return y.reshape(n, hh, ww, 3).transpose(0, 3, 1, 2)          # NCHW


if __name__ == "__main__":
    # small shapes consistent with the module: z_dim=32, dim=64, batch=2
    z_dim, dim, batch = 32, 64, 2
    key = jax.random.PRNGKey(0)
    pkey, zkey = jax.random.split(key)
    params = init_params(pkey, z_dim, dim)
    z = jax.random.normal(zkey, (batch, z_dim), jnp.float32)

    fwd = jax.jit(functools.partial(generator_forward, dim=dim))
    out = fwd(z, params)
    jax.block_until_ready(out)

    assert out.shape == (batch, 3, 32, 32), out.shape
    assert out.dtype == jnp.float32
    assert bool(jnp.all(jnp.isfinite(out)))
    print("KERNEL_OK")
</pallas_src>

<mosaic_0001>
module attributes {stable_mosaic.version = 11 : i64} {
  func.func @_mm_kernel(%arg0: i32, %arg1: memref<2x32xbf16, #tpu.memory_space<vmem>>, %arg2: memref<32x1024xbf16, #tpu.memory_space<vmem>>, %arg3: memref<1x1024xf32, #tpu.memory_space<vmem>>, %arg4: memref<2x1024xf32, #tpu.memory_space<vmem>>) attributes {dimension_semantics = [#tpu.dimension_semantics<parallel>], iteration_bounds = array<i64: 1>, scalar_prefetch = 0 : i64, scratch_operands = 0 : i64, tpu.core_type = #tpu.core_type<tc>, window_params = [{transform_indices = @transform_0, window_bounds = array<i64: 2, 32>}, {pipeline_mode = #tpu.pipeline_mode<synchronous>, transform_indices = @transform_1, window_bounds = array<i64: 32, 1024>}, {pipeline_mode = #tpu.pipeline_mode<synchronous>, transform_indices = @transform_2, window_bounds = array<i64: 1, 1024>}, {transform_indices = @transform_3, window_bounds = array<i64: 2, 1024>}]} {
    %c0 = arith.constant 0 : index
    %c0_0 = arith.constant 0 : index
    %0 = vector.load %arg1[%c0, %c0_0] : memref<2x32xbf16, #tpu.memory_space<vmem>>, vector<2x32xbf16>
    %c0_1 = arith.constant 0 : index
    %c0_2 = arith.constant 0 : index
    %1 = vector.load %arg2[%c0_1, %c0_2] : memref<32x1024xbf16, #tpu.memory_space<vmem>>, vector<32x1024xbf16>
    %cst = arith.constant dense<0.000000e+00> : vector<2x1024xf32>
    %2 = tpu.matmul %0, %1, %cst {dimension_numbers = #tpu.dot_dimension_numbers<[1], [0], [0], [1], [0, 0, 1, 1], [], []>} : vector<2x32xbf16>, vector<32x1024xbf16>, vector<2x1024xf32> -> vector<2x1024xf32>
    %c0_3 = arith.constant 0 : index
    %c0_4 = arith.constant 0 : index
    %3 = vector.load %arg3[%c0_3, %c0_4] : memref<1x1024xf32, #tpu.memory_space<vmem>>, vector<1x1024xf32>
    %4 = vector.broadcast %3 : vector<1x1024xf32> to vector<2x1024xf32>
    %5 = arith.addf %2, %4 : vector<2x1024xf32>
    %c0_5 = arith.constant 0 : index
    %c0_6 = arith.constant 0 : index
    %6 = vector.load %arg4[%c0_5, %c0_6] : memref<2x1024xf32, #tpu.memory_space<vmem>>, vector<2x1024xf32>
    tpu.vector_store %arg4[%c0_5, %c0_6], %5 {strides = array<i32>} : memref<2x1024xf32, #tpu.memory_space<vmem>>, vector<2x1024xf32>,
    return
  }
  func.func @transform_0(%arg0: i32) -> (i32, i32) {
    %c0_i32 = arith.constant 0 : i32
    %c0_i32_0 = arith.constant 0 : i32
    return %arg0, %c0_i32 : i32, i32
  }
  func.func @transform_1(%arg0: i32) -> (i32, i32) {
    %c0_i32 = arith.constant 0 : i32
    %c0_i32_0 = arith.constant 0 : i32
    %c0_i32_1 = arith.constant 0 : i32
    return %c0_i32, %c0_i32_0 : i32, i32
  }
  func.func @transform_2(%arg0: i32) -> (i32, i32) {
    %c0_i32 = arith.constant 0 : i32
    %c0_i32_0 = arith.constant 0 : i32
    %c0_i32_1 = arith.constant 0 : i32
    return %c0_i32, %c0_i32_0 : i32, i32
  }
  func.func @transform_3(%arg0: i32) -> (i32, i32) {
    %c0_i32 = arith.constant 0 : i32
    %c0_i32_0 = arith.constant 0 : i32
    return %arg0, %c0_i32 : i32, i32
  }
}

module attributes {stable_mosaic.version = 11 : i64} {
  func.func @_mm_kernel(%arg0: i32, %arg1: memref<32x576xbf16, #tpu.memory_space<vmem>>, %arg2: memref<576x128xbf16, #tpu.memory_space<vmem>>, %arg3: memref<1x128xf32, #tpu.memory_space<vmem>>, %arg4: memref<32x128xf32, #tpu.memory_space<vmem>>, %arg5: memref<1x2x128xf32, #tpu.memory_space<vmem>>) attributes {dimension_semantics = [#tpu.dimension_semantics<parallel>], iteration_bounds = array<i64: 1>, scalar_prefetch = 0 : i64, scratch_operands = 0 : i64, tpu.core_type = #tpu.core_type<tc>, window_params = [{transform_indices = @transform_0, window_bounds = array<i64: 32, 576>}, {pipeline_mode = #tpu.pipeline_mode<synchronous>, transform_indices = @transform_1, window_bounds = array<i64: 576, 128>}, {pipeline_mode = #tpu.pipeline_mode<synchronous>, transform_indices = @transform_2, window_bounds = array<i64: 1, 128>}, {transform_indices = @transform_3, window_bounds = array<i64: 32, 128>}, {transform_indices = @transform_4, window_bounds = array<i64: 1, 2, 128>}]} {
    %c0 = arith.constant 0 : index
    %c0_0 = arith.constant 0 : index
    %0 = vector.load %arg1[%c0, %c0_0] : memref<32x576xbf16, #tpu.memory_space<vmem>>, vector<32x576xbf16>
    %c0_1 = arith.constant 0 : index
    %c0_2 = arith.constant 0 : index
    %1 = vector.load %arg2[%c0_1, %c0_2] : memref<576x128xbf16, #tpu.memory_space<vmem>>, vector<576x128xbf16>
    %cst = arith.constant dense<0.000000e+00> : vector<32x128xf32>
    %2 = tpu.matmul %0, %1, %cst {dimension_numbers = #tpu.dot_dimension_numbers<[1], [0], [0], [1], [0, 0, 1, 1], [], []>} : vector<32x576xbf16>, vector<576x128xbf16>, vector<32x128xf32> -> vector<32x128xf32>
    %c0_3 = arith.constant 0 : index
    %c0_4 = arith.constant 0 : index
    %3 = vector.load %arg3[%c0_3, %c0_4] : memref<1x128xf32, #tpu.memory_space<vmem>>, vector<1x128xf32>
    %4 = vector.broadcast %3 : vector<1x128xf32> to vector<32x128xf32>
    %5 = arith.addf %2, %4 : vector<32x128xf32>
    %c0_5 = arith.constant 0 : index
    %c0_6 = arith.constant 0 : index
    %6 = vector.load %arg4[%c0_5, %c0_6] : memref<32x128xf32, #tpu.memory_space<vmem>>, vector<32x128xf32>
    tpu.vector_store %arg4[%c0_5, %c0_6], %5 {strides = array<i32>} : memref<32x128xf32, #tpu.memory_space<vmem>>, vector<32x128xf32>,
    %cst_7 = arith.constant dense<0.000000e+00> : vector<128xf32>
    %7 = vector.multi_reduction <add>, %5, %cst_7 [0] : vector<32x128xf32> to vector<128xf32>
    %8 = vector.shape_cast %7 : vector<128xf32> to vector<1x128xf32>
    %9 = arith.mulf %5, %5 : vector<32x128xf32>
    %cst_8 = arith.constant dense<0.000000e+00> : vector<128xf32>
    %10 = vector.multi_reduction <add>, %9, %cst_8 [0] : vector<32x128xf32> to vector<128xf32>
    %11 = vector.shape_cast %10 : vector<128xf32> to vector<1x128xf32>
    %12 = tpu.concatenate %8, %11 in 0 : vector<1x128xf32>, vector<1x128xf32> -> vector<2x128xf32>
    %c0_9 = arith.constant 0 : index
    %c0_10 = arith.constant 0 : index
    %c0_11 = arith.constant 0 : index
    %13 = vector.load %arg5[%c0_9, %c0_10, %c0_11] : memref<1x2x128xf32, #tpu.memory_space<vmem>>, vector<1x2x128xf32>
    %14 = vector.shape_cast %13 : vector<1x2x128xf32> to vector<2x128xf32>
    %15 = vector.shape_cast %12 : vector<2x128xf32> to vector<1x2x128xf32>
    tpu.vector_store %arg5[%c0_9, %c0_10, %c0_11], %15 {strides = array<i32>} : memref<1x2x128xf32, #tpu.memory_space<vmem>>, vector<1x2x128xf32>,
    return
  }
  func.func @transform_0(%arg0: i32) -> (i32, i32) {
    %c0_i32 = arith.constant 0 : i32
    %c0_i32_0 = arith.constant 0 : i32
    return %arg0, %c0_i32 : i32, i32
  }
  func.func @transform_1(%arg0: i32) -> (i32, i32) {
    %c0_i32 = arith.constant 0 : i32
    %c0_i32_0 = arith.constant 0 : i32
    %c0_i32_1 = arith.constant 0 : i32
    return %c0_i32, %c0_i32_0 : i32, i32
  }
  func.func @transform_2(%arg0: i32) -> (i32, i32) {
    %c0_i32 = arith.constant 0 : i32
    %c0_i32_0 = arith.constant 0 : i32
    %c0_i32_1 = arith.constant 0 : i32
    return %c0_i32, %c0_i32_0 : i32, i32
  }
  func.func @transform_3(%arg0: i32) -> (i32, i32) {
    %c0_i32 = arith.constant 0 : i32
    %c0_i32_0 = arith.constant 0 : i32
    return %arg0, %c0_i32 : i32, i32
  }
  func.func @transform_4(%arg0: i32) -> (i32, i32, i32) {
    %c0_i32 = arith.constant 0 : i32
    %c0_i32_0 = arith.constant 0 : i32
    %c0_i32_1 = arith.constant 0 : i32
    return %arg0, %c0_i32, %c0_i32_0 : i32, i32, i32
  }
}

module attributes {stable_mosaic.version = 11 : i64} {
  func.func @_affine_relu_kernel(%arg0: i32, %arg1: memref<32x128xf32, #tpu.memory_space<vmem>>, %arg2: memref<2x128xf32, #tpu.memory_space<vmem>>, %arg3: memref<32x128xf32, #tpu.memory_space<vmem>>) attributes {dimension_semantics = [#tpu.dimension_semantics<parallel>], iteration_bounds = array<i64: 1>, scalar_prefetch = 0 : i64, scratch_operands = 0 : i64, tpu.core_type = #tpu.core_type<tc>, window_params = [{transform_indices = @transform_0, window_bounds = array<i64: 32, 128>}, {pipeline_mode = #tpu.pipeline_mode<synchronous>, transform_indices = @transform_1, window_bounds = array<i64: 2, 128>}, {transform_indices = @transform_2, window_bounds = array<i64: 32, 128>}]} {
    %c0 = arith.constant 0 : index
    %c0_0 = arith.constant 0 : index
    %0 = vector.load %arg1[%c0, %c0_0] : memref<32x128xf32, #tpu.memory_space<vmem>>, vector<32x128xf32>
    %c0_1 = arith.constant 0 : index
    %c0_2 = arith.constant 0 : index
    %1 = vector.load %arg2[%c0_1, %c0_2] : memref<2x128xf32, #tpu.memory_space<vmem>>, vector<1x128xf32>
    %2 = vector.broadcast %1 : vector<1x128xf32> to vector<32x128xf32>
    %3 = arith.mulf %0, %2 : vector<32x128xf32>
    %c1 = arith.constant 1 : index
    %c0_3 = arith.constant 0 : index
    %4 = vector.load %arg2[%c1, %c0_3] : memref<2x128xf32, #tpu.memory_space<vmem>>, vector<1x128xf32>
    %5 = vector.broadcast %4 : vector<1x128xf32> to vector<32x128xf32>
    %6 = arith.addf %3, %5 : vector<32x128xf32>
    %cst = arith.constant 0.000000e+00 : f32
    %7 = vector.broadcast %cst : f32 to vector<32x128xf32>
    %8 = arith.maximumf %6, %7 : vector<32x128xf32>
    %c0_4 = arith.constant 0 : index
    %c0_5 = arith.constant 0 : index
    %9 = vector.load %arg3[%c0_4, %c0_5] : memref<32x128xf32, #tpu.memory_space<vmem>>, vector<32x128xf32>
    tpu.vector_store %arg3[%c0_4, %c0_5], %8 {strides = array<i32>} : memref<32x128xf32, #tpu.memory_space<vmem>>, vector<32x128xf32>,
    return
  }
  func.func @transform_0(%arg0: i32) -> (i32, i32) {
    %c0_i32 = arith.constant 0 : i32
    %c0_i32_0 = arith.constant 0 : i32
    return %arg0, %c0_i32 : i32, i32
  }
  func.func @transform_1(%arg0: i32) -> (i32, i32) {
    %c0_i32 = arith.constant 0 : i32
    %c0_i32_0 = arith.constant 0 : i32
    %c0_i32_1 = arith.constant 0 : i32
    return %c0_i32, %c0_i32_0 : i32, i32
  }
  func.func @transform_2(%arg0: i32) -> (i32, i32) {
    %c0_i32 = arith.constant 0 : i32
    %c0_i32_0 = arith.constant 0 : i32
    return %arg0, %c0_i32 : i32, i32
  }
}

module attributes {stable_mosaic.version = 11 : i64} {
  func.func @_mm_kernel(%arg0: i32, %arg1: memref<128x288xbf16, #tpu.memory_space<vmem>>, %arg2: memref<288x64xbf16, #tpu.memory_space<vmem>>, %arg3: memref<1x64xf32, #tpu.memory_space<vmem>>, %arg4: memref<128x64xf32, #tpu.memory_space<vmem>>, %arg5: memref<1x2x64xf32, #tpu.memory_space<vmem>>) attributes {dimension_semantics = [#tpu.dimension_semantics<parallel>], iteration_bounds = array<i64: 1>, scalar_prefetch = 0 : i64, scratch_operands = 0 : i64, tpu.core_type = #tpu.core_type<tc>, window_params = [{transform_indices = @transform_0, window_bounds = array<i64: 128, 288>}, {pipeline_mode = #tpu.pipeline_mode<synchronous>, transform_indices = @transform_1, window_bounds = array<i64: 288, 64>}, {pipeline_mode = #tpu.pipeline_mode<synchronous>, transform_indices = @transform_2, window_bounds = array<i64: 1, 64>}, {transform_indices = @transform_3, window_bounds = array<i64: 128, 64>}, {transform_indices = @transform_4, window_bounds = array<i64: 1, 2, 64>}]} {
    %c0 = arith.constant 0 : index
    %c0_0 = arith.constant 0 : index
    %0 = vector.load %arg1[%c0, %c0_0] : memref<128x288xbf16, #tpu.memory_space<vmem>>, vector<128x288xbf16>
    %c0_1 = arith.constant 0 : index
    %c0_2 = arith.constant 0 : index
    %1 = vector.load %arg2[%c0_1, %c0_2] : memref<288x64xbf16, #tpu.memory_space<vmem>>, vector<288x64xbf16>
    %cst = arith.constant dense<0.000000e+00> : vector<128x64xf32>
    %2 = tpu.matmul %0, %1, %cst {dimension_numbers = #tpu.dot_dimension_numbers<[1], [0], [0], [1], [0, 0, 1, 1], [], []>} : vector<128x288xbf16>, vector<288x64xbf16>, vector<128x64xf32> -> vector<128x64xf32>
    %c0_3 = arith.constant 0 : index
    %c0_4 = arith.constant 0 : index
    %3 = vector.load %arg3[%c0_3, %c0_4] : memref<1x64xf32, #tpu.memory_space<vmem>>, vector<1x64xf32>
    %4 = vector.broadcast %3 : vector<1x64xf32> to vector<128x64xf32>
    %5 = arith.addf %2, %4 : vector<128x64xf32>
    %c0_5 = arith.constant 0 : index
    %c0_6 = arith.constant 0 : index
    %6 = vector.load %arg4[%c0_5, %c0_6] : memref<128x64xf32, #tpu.memory_space<vmem>>, vector<128x64xf32>
    tpu.vector_store %arg4[%c0_5, %c0_6], %5 {strides = array<i32>} : memref<128x64xf32, #tpu.memory_space<vmem>>, vector<128x64xf32>,
    %cst_7 = arith.constant dense<0.000000e+00> : vector<64xf32>
    %7 = vector.multi_reduction <add>, %5, %cst_7 [0] : vector<128x64xf32> to vector<64xf32>
    %8 = vector.shape_cast %7 : vector<64xf32> to vector<1x64xf32>
    %9 = arith.mulf %5, %5 : vector<128x64xf32>
    %cst_8 = arith.constant dense<0.000000e+00> : vector<64xf32>
    %10 = vector.multi_reduction <add>, %9, %cst_8 [0] : vector<128x64xf32> to vector<64xf32>
    %11 = vector.shape_cast %10 : vector<64xf32> to vector<1x64xf32>
    %12 = tpu.concatenate %8, %11 in 0 : vector<1x64xf32>, vector<1x64xf32> -> vector<2x64xf32>
    %c0_9 = arith.constant 0 : index
    %c0_10 = arith.constant 0 : index
    %c0_11 = arith.constant 0 : index
    %13 = vector.load %arg5[%c0_9, %c0_10, %c0_11] : memref<1x2x64xf32, #tpu.memory_space<vmem>>, vector<1x2x64xf32>
    %14 = vector.shape_cast %13 : vector<1x2x64xf32> to vector<2x64xf32>
    %15 = vector.shape_cast %12 : vector<2x64xf32> to vector<1x2x64xf32>
    tpu.vector_store %arg5[%c0_9, %c0_10, %c0_11], %15 {strides = array<i32>} : memref<1x2x64xf32, #tpu.memory_space<vmem>>, vector<1x2x64xf32>,
    return
  }
  func.func @transform_0(%arg0: i32) -> (i32, i32) {
    %c0_i32 = arith.constant 0 : i32
    %c0_i32_0 = arith.constant 0 : i32
    return %arg0, %c0_i32 : i32, i32
  }
  func.func @transform_1(%arg0: i32) -> (i32, i32) {
    %c0_i32 = arith.constant 0 : i32
    %c0_i32_0 = arith.constant 0 : i32
    %c0_i32_1 = arith.constant 0 : i32
    return %c0_i32, %c0_i32_0 : i32, i32
  }
  func.func @transform_2(%arg0: i32) -> (i32, i32) {
    %c0_i32 = arith.constant 0 : i32
    %c0_i32_0 = arith.constant 0 : i32
    %c0_i32_1 = arith.constant 0 : i32
    return %c0_i32, %c0_i32_0 : i32, i32
  }
  func.func @transform_3(%arg0: i32) -> (i32, i32) {
    %c0_i32 = arith.constant 0 : i32
    %c0_i32_0 = arith.constant 0 : i32
    return %arg0, %c0_i32 : i32, i32
  }
  func.func @transform_4(%arg0: i32) -> (i32, i32, i32) {
    %c0_i32 = arith.constant 0 : i32
    %c0_i32_0 = arith.constant 0 : i32
    %c0_i32_1 = arith.constant 0 : i32
    return %arg0, %c0_i32, %c0_i32_0 : i32, i32, i32
  }
}

module attributes {stable_mosaic.version = 11 : i64} {
  func.func @_affine_relu_kernel(%arg0: i32, %arg1: memref<64x128xf32, #tpu.memory_space<vmem>>, %arg2: memref<2x128xf32, #tpu.memory_space<vmem>>, %arg3: memref<64x128xf32, #tpu.memory_space<vmem>>) attributes {dimension_semantics = [#tpu.dimension_semantics<parallel>], iteration_bounds = array<i64: 1>, scalar_prefetch = 0 : i64, scratch_operands = 0 : i64, tpu.core_type = #tpu.core_type<tc>, window_params = [{transform_indices = @transform_0, window_bounds = array<i64: 64, 128>}, {pipeline_mode = #tpu.pipeline_mode<synchronous>, transform_indices = @transform_1, window_bounds = array<i64: 2, 128>}, {transform_indices = @transform_2, window_bounds = array<i64: 64, 128>}]} {
    %c0 = arith.constant 0 : index
    %c0_0 = arith.constant 0 : index
    %0 = vector.load %arg1[%c0, %c0_0] : memref<64x128xf32, #tpu.memory_space<vmem>>, vector<64x128xf32>
    %c0_1 = arith.constant 0 : index
    %c0_2 = arith.constant 0 : index
    %1 = vector.load %arg2[%c0_1, %c0_2] : memref<2x128xf32, #tpu.memory_space<vmem>>, vector<1x128xf32>
    %2 = vector.broadcast %1 : vector<1x128xf32> to vector<64x128xf32>
    %3 = arith.mulf %0, %2 : vector<64x128xf32>
    %c1 = arith.constant 1 : index
    %c0_3 = arith.constant 0 : index
    %4 = vector.load %arg2[%c1, %c0_3] : memref<2x128xf32, #tpu.memory_space<vmem>>, vector<1x128xf32>
    %5 = vector.broadcast %4 : vector<1x128xf32> to vector<64x128xf32>
    %6 = arith.addf %3, %5 : vector<64x128xf32>
    %cst = arith.constant 0.000000e+00 : f32
    %7 = vector.broadcast %cst : f32 to vector<64x128xf32>
    %8 = arith.maximumf %6, %7 : vector<64x128xf32>
    %c0_4 = arith.constant 0 : index
    %c0_5 = arith.constant 0 : index
    %9 = vector.load %arg3[%c0_4, %c0_5] : memref<64x128xf32, #tpu.memory_space<vmem>>, vector<64x128xf32>
    tpu.vector_store %arg3[%c0_4, %c0_5], %8 {strides = array<i32>} : memref<64x128xf32, #tpu.memory_space<vmem>>, vector<64x128xf32>,
    return
  }
  func.func @transform_0(%arg0: i32) -> (i32, i32) {
    %c0_i32 = arith.constant 0 : i32
    %c0_i32_0 = arith.constant 0 : i32
    return %arg0, %c0_i32 : i32, i32
  }
  func.func @transform_1(%arg0: i32) -> (i32, i32) {
    %c0_i32 = arith.constant 0 : i32
    %c0_i32_0 = arith.constant 0 : i32
    %c0_i32_1 = arith.constant 0 : i32
    return %c0_i32, %c0_i32_0 : i32, i32
  }
  func.func @transform_2(%arg0: i32) -> (i32, i32) {
    %c0_i32 = arith.constant 0 : i32
    %c0_i32_0 = arith.constant 0 : i32
    return %arg0, %c0_i32 : i32, i32
  }
}

module attributes {stable_mosaic.version = 11 : i64} {
  func.func @_mm_kernel(%arg0: i32, %arg1: memref<512x144xbf16, #tpu.memory_space<vmem>>, %arg2: memref<144x32xbf16, #tpu.memory_space<vmem>>, %arg3: memref<1x32xf32, #tpu.memory_space<vmem>>, %arg4: memref<512x32xf32, #tpu.memory_space<vmem>>, %arg5: memref<1x2x32xf32, #tpu.memory_space<vmem>>) attributes {dimension_semantics = [#tpu.dimension_semantics<parallel>], iteration_bounds = array<i64: 1>, scalar_prefetch = 0 : i64, scratch_operands = 0 : i64, tpu.core_type = #tpu.core_type<tc>, window_params = [{transform_indices = @transform_0, window_bounds = array<i64: 512, 144>}, {pipeline_mode = #tpu.pipeline_mode<synchronous>, transform_indices = @transform_1, window_bounds = array<i64: 144, 32>}, {pipeline_mode = #tpu.pipeline_mode<synchronous>, transform_indices = @transform_2, window_bounds = array<i64: 1, 32>}, {transform_indices = @transform_3, window_bounds = array<i64: 512, 32>}, {transform_indices = @transform_4, window_bounds = array<i64: 1, 2, 32>}]} {
    %c0 = arith.constant 0 : index
    %c0_0 = arith.constant 0 : index
    %0 = vector.load %arg1[%c0, %c0_0] : memref<512x144xbf16, #tpu.memory_space<vmem>>, vector<512x144xbf16>
    %c0_1 = arith.constant 0 : index
    %c0_2 = arith.constant 0 : index
    %1 = vector.load %arg2[%c0_1, %c0_2] : memref<144x32xbf16, #tpu.memory_space<vmem>>, vector<144x32xbf16>
    %cst = arith.constant dense<0.000000e+00> : vector<512x32xf32>
    %2 = tpu.matmul %0, %1, %cst {dimension_numbers = #tpu.dot_dimension_numbers<[1], [0], [0], [1], [0, 0, 1, 1], [], []>} : vector<512x144xbf16>, vector<144x32xbf16>, vector<512x32xf32> -> vector<512x32xf32>
    %c0_3 = arith.constant 0 : index
    %c0_4 = arith.constant 0 : index
    %3 = vector.load %arg3[%c0_3, %c0_4] : memref<1x32xf32, #tpu.memory_space<vmem>>, vector<1x32xf32>
    %4 = vector.broadcast %3 : vector<1x32xf32> to vector<512x32xf32>
    %5 = arith.addf %2, %4 : vector<512x32xf32>
    %c0_5 = arith.constant 0 : index
    %c0_6 = arith.constant 0 : index
    %6 = vector.load %arg4[%c0_5, %c0_6] : memref<512x32xf32, #tpu.memory_space<vmem>>, vector<512x32xf32>
    tpu.vector_store %arg4[%c0_5, %c0_6], %5 {strides = array<i32>} : memref<512x32xf32, #tpu.memory_space<vmem>>, vector<512x32xf32>,
    %cst_7 = arith.constant dense<0.000000e+00> : vector<32xf32>
    %7 = vector.multi_reduction <add>, %5, %cst_7 [0] : vector<512x32xf32> to vector<32xf32>
    %8 = vector.shape_cast %7 : vector<32xf32> to vector<1x32xf32>
    %9 = arith.mulf %5, %5 : vector<512x32xf32>
    %cst_8 = arith.constant dense<0.000000e+00> : vector<32xf32>
    %10 = vector.multi_reduction <add>, %9, %cst_8 [0] : vector<512x32xf32> to vector<32xf32>
    %11 = vector.shape_cast %10 : vector<32xf32> to vector<1x32xf32>
    %12 = tpu.concatenate %8, %11 in 0 : vector<1x32xf32>, vector<1x32xf32> -> vector<2x32xf32>
    %c0_9 = arith.constant 0 : index
    %c0_10 = arith.constant 0 : index
    %c0_11 = arith.constant 0 : index
    %13 = vector.load %arg5[%c0_9, %c0_10, %c0_11] : memref<1x2x32xf32, #tpu.memory_space<vmem>>, vector<1x2x32xf32>
    %14 = vector.shape_cast %13 : vector<1x2x32xf32> to vector<2x32xf32>
    %15 = vector.shape_cast %12 : vector<2x32xf32> to vector<1x2x32xf32>
    tpu.vector_store %arg5[%c0_9, %c0_10, %c0_11], %15 {strides = array<i32>} : memref<1x2x32xf32, #tpu.memory_space<vmem>>, vector<1x2x32xf32>,
    return
  }
  func.func @transform_0(%arg0: i32) -> (i32, i32) {
    %c0_i32 = arith.constant 0 : i32
    %c0_i32_0 = arith.constant 0 : i32
    return %arg0, %c0_i32 : i32, i32
  }
  func.func @transform_1(%arg0: i32) -> (i32, i32) {
    %c0_i32 = arith.constant 0 : i32
    %c0_i32_0 = arith.constant 0 : i32
    %c0_i32_1 = arith.constant 0 : i32
    return %c0_i32, %c0_i32_0 : i32, i32
  }
  func.func @transform_2(%arg0: i32) -> (i32, i32) {
    %c0_i32 = arith.constant 0 : i32
    %c0_i32_0 = arith.constant 0 : i32
    %c0_i32_1 = arith.constant 0 : i32
    return %c0_i32, %c0_i32_0 : i32, i32
  }
  func.func @transform_3(%arg0: i32) -> (i32, i32) {
    %c0_i32 = arith.constant 0 : i32
    %c0_i32_0 = arith.constant 0 : i32
    return %arg0, %c0_i32 : i32, i32
  }
  func.func @transform_4(%arg0: i32) -> (i32, i32, i32) {
    %c0_i32 = arith.constant 0 : i32
    %c0_i32_0 = arith.constant 0 : i32
    %c0_i32_1 = arith.constant 0 : i32
    return %arg0, %c0_i32, %c0_i32_0 : i32, i32, i32
  }
}

module attributes {stable_mosaic.version = 11 : i64} {
  func.func @_affine_relu_kernel(%arg0: i32, %arg1: memref<128x128xf32, #tpu.memory_space<vmem>>, %arg2: memref<2x128xf32, #tpu.memory_space<vmem>>, %arg3: memref<128x128xf32, #tpu.memory_space<vmem>>) attributes {dimension_semantics = [#tpu.dimension_semantics<parallel>], iteration_bounds = array<i64: 1>, scalar_prefetch = 0 : i64, scratch_operands = 0 : i64, tpu.core_type = #tpu.core_type<tc>, window_params = [{transform_indices = @transform_0, window_bounds = array<i64: 128, 128>}, {pipeline_mode = #tpu.pipeline_mode<synchronous>, transform_indices = @transform_1, window_bounds = array<i64: 2, 128>}, {transform_indices = @transform_2, window_bounds = array<i64: 128, 128>}]} {
    %c0 = arith.constant 0 : index
    %c0_0 = arith.constant 0 : index
    %0 = vector.load %arg1[%c0, %c0_0] : memref<128x128xf32, #tpu.memory_space<vmem>>, vector<128x128xf32>
    %c0_1 = arith.constant 0 : index
    %c0_2 = arith.constant 0 : index
    %1 = vector.load %arg2[%c0_1, %c0_2] : memref<2x128xf32, #tpu.memory_space<vmem>>, vector<1x128xf32>
    %2 = vector.broadcast %1 : vector<1x128xf32> to vector<128x128xf32>
    %3 = arith.mulf %0, %2 : vector<128x128xf32>
    %c1 = arith.constant 1 : index
    %c0_3 = arith.constant 0 : index
    %4 = vector.load %arg2[%c1, %c0_3] : memref<2x128xf32, #tpu.memory_space<vmem>>, vector<1x128xf32>
    %5 = vector.broadcast %4 : vector<1x128xf32> to vector<128x128xf32>
    %6 = arith.addf %3, %5 : vector<128x128xf32>
    %cst = arith.constant 0.000000e+00 : f32
    %7 = vector.broadcast %cst : f32 to vector<128x128xf32>
    %8 = arith.maximumf %6, %7 : vector<128x128xf32>
    %c0_4 = arith.constant 0 : index
    %c0_5 = arith.constant 0 : index
    %9 = vector.load %arg3[%c0_4, %c0_5] : memref<128x128xf32, #tpu.memory_space<vmem>>, vector<128x128xf32>
    tpu.vector_store %arg3[%c0_4, %c0_5], %8 {strides = array<i32>} : memref<128x128xf32, #tpu.memory_space<vmem>>, vector<128x128xf32>,
    return
  }
  func.func @transform_0(%arg0: i32) -> (i32, i32) {
    %c0_i32 = arith.constant 0 : i32
    %c0_i32_0 = arith.constant 0 : i32
    return %arg0, %c0_i32 : i32, i32
  }
  func.func @transform_1(%arg0: i32) -> (i32, i32) {
    %c0_i32 = arith.constant 0 : i32
    %c0_i32_0 = arith.constant 0 : i32
    %c0_i32_1 = arith.constant 0 : i32
    return %c0_i32, %c0_i32_0 : i32, i32
  }
  func.func @transform_2(%arg0: i32) -> (i32, i32) {
    %c0_i32 = arith.constant 0 : i32
    %c0_i32_0 = arith.constant 0 : i32
    return %arg0, %c0_i32 : i32, i32
  }
}

module attributes {stable_mosaic.version = 11 : i64} {
  func.func @_mm_kernel(%arg0: i32, %arg1: memref<512x72xbf16, #tpu.memory_space<vmem>>, %arg2: memref<72x3xbf16, #tpu.memory_space<vmem>>, %arg3: memref<1x3xf32, #tpu.memory_space<vmem>>, %arg4: memref<512x3xf32, #tpu.memory_space<vmem>>) attributes {dimension_semantics = [#tpu.dimension_semantics<parallel>], iteration_bounds = array<i64: 4>, scalar_prefetch = 0 : i64, scratch_operands = 0 : i64, tpu.core_type = #tpu.core_type<tc>, window_params = [{transform_indices = @transform_0, window_bounds = array<i64: 512, 72>}, {pipeline_mode = #tpu.pipeline_mode<synchronous>, transform_indices = @transform_1, window_bounds = array<i64: 72, 3>}, {pipeline_mode = #tpu.pipeline_mode<synchronous>, transform_indices = @transform_2, window_bounds = array<i64: 1, 3>}, {transform_indices = @transform_3, window_bounds = array<i64: 512, 3>}]} {
    %c0 = arith.constant 0 : index
    %c0_0 = arith.constant 0 : index
    %0 = vector.load %arg1[%c0, %c0_0] : memref<512x72xbf16, #tpu.memory_space<vmem>>, vector<512x72xbf16>
    %c0_1 = arith.constant 0 : index
    %c0_2 = arith.constant 0 : index
    %1 = vector.load %arg2[%c0_1, %c0_2] : memref<72x3xbf16, #tpu.memory_space<vmem>>, vector<72x3xbf16>
    %cst = arith.constant dense<0.000000e+00> : vector<512x3xf32>
    %2 = tpu.matmul %0, %1, %cst {dimension_numbers = #tpu.dot_dimension_numbers<[1], [0], [0], [1], [0, 0, 1, 1], [], []>} : vector<512x72xbf16>, vector<72x3xbf16>, vector<512x3xf32> -> vector<512x3xf32>
    %c0_3 = arith.constant 0 : index
    %c0_4 = arith.constant 0 : index
    %3 = vector.load %arg3[%c0_3, %c0_4] : memref<1x3xf32, #tpu.memory_space<vmem>>, vector<1x3xf32>
    %4 = vector.broadcast %3 : vector<1x3xf32> to vector<512x3xf32>
    %5 = arith.addf %2, %4 : vector<512x3xf32>
    %6 = math.tanh %5 : vector<512x3xf32>
    %c0_5 = arith.constant 0 : index
    %c0_6 = arith.constant 0 : index
    %7 = vector.load %arg4[%c0_5, %c0_6] : memref<512x3xf32, #tpu.memory_space<vmem>>, vector<512x3xf32>
    tpu.vector_store %arg4[%c0_5, %c0_6], %6 {strides = array<i32>} : memref<512x3xf32, #tpu.memory_space<vmem>>, vector<512x3xf32>,
    return
  }
  func.func @transform_0(%arg0: i32) -> (i32, i32) {
    %c0_i32 = arith.constant 0 : i32
    %c0_i32_0 = arith.constant 0 : i32
    return %arg0, %c0_i32 : i32, i32
  }
  func.func @transform_1(%arg0: i32) -> (i32, i32) {
    %c0_i32 = arith.constant 0 : i32
    %c0_i32_0 = arith.constant 0 : i32
    %c0_i32_1 = arith.constant 0 : i32
    return %c0_i32, %c0_i32_0 : i32, i32
  }
  func.func @transform_2(%arg0: i32) -> (i32, i32) {
    %c0_i32 = arith.constant 0 : i32
    %c0_i32_0 = arith.constant 0 : i32
    %c0_i32_1 = arith.constant 0 : i32
    return %c0_i32, %c0_i32_0 : i32, i32
  }
  func.func @transform_3(%arg0: i32) -> (i32, i32) {
    %c0_i32 = arith.constant 0 : i32
    %c0_i32_0 = arith.constant 0 : i32
    return %arg0, %c0_i32 : i32, i32
  }
}

</mosaic_0001>

<bundles_post_ra>
// kernel: generator_forward.8
= control target key start
LH: loop header
LB: loop body
LE: loop exit
PB: predicated region body
PF: predicated region fallthrough
CT: control target
= control target key end

     0   :  { %v394_v3 = vmov 0   ;;  %vm154_vm0 = vcmask 261120   ;;  %v34_v34 = vlaneseq  ;;  %v395_v37 = vmov 1983009808   ;;  %s480_s1 = inlined_call_operand.vmem [shape: bf16[32,1024], index: 1, kind: input, shape index: {}]   ;;  %s481_s0 = inlined_call_operand.vmem [shape: bf16[2,32], index: 0, kind: input, shape index: {}]   ;;  %s482_s2 = inlined_call_operand.vmem [shape: f32[1,1024], index: 2, kind: input, shape index: {}]   ;;  %s483_s3 = inlined_call_operand.vmem [shape: f32[2,1024], index: 3, kind: output, shape index: {}]  }
   0x1   :  { %v16_v0 = vld [vmem:[%s480_s1] sm:$0xff]  ;;  %v17_v2 = vld [vmem:[%s480_s1 + $0x8] sm:$0xff]  ;;  %190 = vmatprep.mubr.bf16.mxu0 %v394_v3  ;;  %231 = vmatprep.mubr.bf16.mxu1 %v394_v3  ;;  %v18_v15 = vld [vmem:[%s480_s1 + $0x10] sm:$0xff]  ;;  %v333_v38 = vunpack.c.l.s4 %v395_v37 }
   0x2   :  { %v20_v1 = vld [vmem:[%s480_s1 + $0x20] sm:$0xff]  ;;  %v21_v5 = vld [vmem:[%s480_s1 + $0x28] sm:$0xff]  ;;  %v22_v16 = vld [vmem:[%s480_s1 + $0x30] sm:$0xff]  ;;  %v35_v35 = vshrl.u32 %v34_v34, 7 }
   0x3   :  { %v373_v4 = vcombine.high %v16_v0, %v20_v1  ;;  %v372_v6 = vcombine.low %v16_v0, %v20_v1  ;;  %v24_v7 = vld [vmem:[%s480_s1 + $0x40] sm:$0xff]  ;;  %v375_v9 = vcombine.high %v17_v2, %v21_v5  ;;  %v374_v10 = vcombine.low %v17_v2, %v21_v5  ;;  %v25_v12 = vld [vmem:[%s480_s1 + $0x48] sm:$0xff]  ;;  %v19_v17 = vld [vmem:[%s480_s1 + $0x18] sm:$0xff] }
   0x4   :  { %v28_v8 = vld [vmem:[%s480_s1 + $0x60] sm:$0xff]  ;;  %v29_v13 = vld [vmem:[%s480_s1 + $0x68] sm:$0xff]  ;;  %v23_v19 = vld [vmem:[%s480_s1 + $0x38] sm:$0xff]  ;;  %v377_v21 = vcombine.high %v18_v15, %v22_v16  ;;  %v376_v28 = vcombine.low %v18_v15, %v22_v16  ;;  %v36_v36 = vsub.s32 0, %v35_v35  ;;  %v44_v40 = vsub.s32 2, %v35_v35 }
   0x5   :  { %v381_v11 = vcombine.high %v24_v7, %v28_v8  ;;  %158 = vmatprep.subr.bf16.mxu0 %v373_v4  ;;  %v383_v14 = vcombine.high %v25_v12, %v29_v13  ;;  %199 = vmatprep.subr.bf16.mxu1 %v375_v9  ;;  %v380_v18 = vcombine.low %v24_v7, %v28_v8  ;;  %v26_v23 = vld [vmem:[%s480_s1 + $0x50] sm:$0xff]  ;;  %v27_v25 = vld [vmem:[%s480_s1 + $0x58] sm:$0xff]  ;;  %v15_v27 = vld [vmem:[%s481_s0] sm:$0x1]  ;;  %v40_v41 = vsub.s32 1, %v35_v35 }
   0x6   :  { %159 = vmatpush1.bf16.msra.mxu0 %v372_v6  ;;  %200 = vmatpush1.bf16.msra.mxu1 %v374_v10  ;;  %v382_v20 = vcombine.low %v25_v12, %v29_v13  ;;  %v379_v22 = vcombine.high %v19_v17, %v23_v19  ;;  %v30_v24 = vld [vmem:[%s480_s1 + $0x70] sm:$0xff]  ;;  %v31_v26 = vld [vmem:[%s480_s1 + $0x78] sm:$0xff]  ;;  %v378_v29 = vcombine.low %v19_v17, %v23_v19  ;;  %v32_v39 = vld [vmem:[%s482_s2] sm:$0xff]  ;;  %v48_v42 = vsub.s32 3, %v35_v35 }
   0x7   :  { %160 = vmatprep.subr.bf16.mxu0 %v381_v11  ;;  %201 = vmatprep.subr.bf16.mxu1 %v383_v14  ;;  %v385_v30 = vcombine.high %v26_v23, %v30_v24  ;;  %v387_v31 = vcombine.high %v27_v25, %v31_v26  ;;  %v384_v32 = vcombine.low %v26_v23, %v30_v24  ;;  %v334_v44 = vunpack.c.0.s8 %v333_v38 }
   0x8   :  { %v386_v33 = vcombine.low %v27_v25, %v31_v26  ;;  %v37_v43 = vrot.slane %v32_v39, %v36_v36  ;;  %v45_v45 = vrot.slane %v32_v39, %v44_v40  ;;  %v41_v46 = vrot.slane %v32_v39, %v40_v41 }
   0x9   :  { %v49_v47 = vrot.slane %v32_v39, %v48_v42  ;;  %v337_v52 = vsub.s32 %v334_v44, %v35_v35  ;;  %v52_v53 = vsub.s32 4, %v35_v35  ;;  %v60_v58 = vsub.s32 6, %v35_v35 }
   0xa   :  { %161 = vmatpush1.bf16.msra.mxu0 %v380_v18  ;;  %202 = vmatpush1.bf16.msra.mxu1 %v382_v20  ;;  %v56_v59 = vsub.s32 5, %v35_v35  ;;  %v64_v63 = vsub.s32 7, %v35_v35 }
   0xb   :  { %240 = vmatprep.subr.bf16.mxu0 %v377_v21  ;;  %281 = vmatprep.subr.bf16.mxu1 %v379_v22  ;;  %v61_v5 = vrot.slane %v32_v39, %v60_v58 }
   0xc   :  { %v57_v6 = vrot.slane %v32_v39, %v56_v59  ;;  %v65_v8 = vrot.slane %v32_v39, %v64_v63 }
   0xd   :  { %388 = vmatmul.mubr.msk.bf16.vlgmr.msra.gmra.mrb[0].mxu0 %vm154_vm0, %v15_v27  ;;  %389 = vmatmul.mubr.msk.bf16.vlgmr.msra.gmra.mrb[0].mxu1 %vm154_vm0, %v15_v27 }
   0xe   :  { %241 = vmatpush1.bf16.msra.mxu0 %v376_v28  ;;  %282 = vmatpush1.bf16.msra.mxu1 %v378_v29 }
   0xf   :  { %242 = vmatprep.subr.bf16.mxu0 %v385_v30  ;;  %283 = vmatprep.subr.bf16.mxu1 %v387_v31 }
  0x10   :  { %272 = vmatprep.mubr.bf16.mxu0 %v394_v3  ;;  %313 = vmatprep.mubr.bf16.mxu1 %v394_v3  ;;  %v53_v3 = vrot.slane %v32_v39, %v52_v53 }
  0x12   :  { %243 = vmatpush1.bf16.msra.mxu0 %v384_v32  ;;  %284 = vmatpush1.bf16.msra.mxu1 %v386_v33 }
  0x15   :  { %390 = vmatmul.mubr.msk.bf16.vlgmr.msra.gmra.mrb[4].mxu0 %vm154_vm0, %v15_v27  ;;  %391 = vmatmul.mubr.msk.bf16.vlgmr.msra.gmra.mrb[4].mxu1 %vm154_vm0, %v15_v27 }
  0xe0   :  { %v192_v48 = vpop.f32.mrb[0].mxu0  ;;  %v233_v50 = vpop.f32.mrb[0].mxu1 }
  0xe1   :  { %v193_v49 = vadd.f32 %v192_v48, %v37_v43  ;;  %v194_v51 = vpop.f32.mrb[1].mxu0  ;;  %v234_v54 = vadd.f32 %v233_v50, %v45_v45  ;;  %v235_v56 = vpop.f32.mrb[1].mxu1 }
  0xe2   :  { %v195_v55 = vadd.f32 %v194_v51, %v41_v46  ;;  %v196_v57 = vpop.f32.mrb[2].mxu0  ;;  %v236_v60 = vadd.f32 %v235_v56, %v49_v47  ;;  %v237_v61 = vpop.f32.mrb[2].mxu1 }
  0xe3   :  { %v197_v62 = vpop.f32.mrb[3].mxu0  ;;  %v238_v1 = vpop.f32.mrb[3].mxu1 }
  0xe4   :  { %v330_v0 = vcombine.low %v193_v49, %v195_v55  ;;  %v331_v2 = vcombine.low %v234_v54, %v236_v60 }
  0xe6   :  { %v338_v4 = vrot.slane %v330_v0, %v337_v52  ;;  %v345_v7 = vrot.slane %v331_v2, %v337_v52 }
  0xe8   :  { %v274_v9 = vpop.f32.mrb[4].mxu0  ;;  %v346_v10 = vcombine.low %v338_v4, %v345_v7  ;;  %v315_v12 = vpop.f32.mrb[4].mxu1 }
  0xe9   :  { %v275_v11 = vadd.f32 %v274_v9, %v53_v3  ;;  %v276_v13 = vpop.f32.mrb[5].mxu0  ;;  %v316_v14 = vadd.f32 %v315_v12, %v61_v5  ;;  %v317_v16 = vpop.f32.mrb[5].mxu1 }
  0xea   :  { %v277_v15 = vadd.f32 %v276_v13, %v57_v6  ;;  %v278_v17 = vpop.f32.mrb[6].mxu0  ;;  %366 = vst [vmem:[%s483_s3] sm:$0xff] %v346_v10  ;;  %v318_v18 = vadd.f32 %v317_v16, %v65_v8  ;;  %v319_v19 = vpop.f32.mrb[6].mxu1 }
  0xeb   :  { %v279_v20 = vpop.f32.mrb[7].mxu0  ;;  %v320_v22 = vpop.f32.mrb[7].mxu1 }
  0xec   :  { %v347_v21 = vcombine.low %v275_v11, %v277_v15  ;;  %v348_v23 = vcombine.low %v316_v14, %v318_v18 }
  0xee   :  { %v355_v24 = vrot.slane %v347_v21, %v337_v52  ;;  %v362_v25 = vrot.slane %v348_v23, %v337_v52 }
  0xf0   :  { %v363_v26 = vcombine.low %v355_v24, %v362_v25 }
  0xf2   :  { %367 = vst [vmem:[%s483_s3 + $0x8] sm:$0xff] %v363_v26 }

// kernel: tile.64
= control target key start
LH: loop header
LB: loop body
LE: loop exit
PB: predicated region body
PF: predicated region fallthrough
CT: control target
= control target key end

     0   :  { %s22_s0 = inlined_call_operand.vmem [shape: f32[32], index: 0, kind: input, shape index: {}]   ;;  %s23_s1 = inlined_call_operand.vmem [shape: f32[4,32], index: 1, kind: output, shape index: {}]  }
   0x1   :  { %v4_v0 = vld [vmem:[%s22_s0] ss:$0 sm:$0xff] }
   0x2   :  { %5 = vst [vmem:[%s23_s1] sm:$0xf] %v4_v0 }

// kernel: tile.65
= control target key start
LH: loop header
LB: loop body
LE: loop exit
PB: predicated region body
PF: predicated region fallthrough
CT: control target
= control target key end

     0   :  { %vm7_vm0 = vcmask 261120   ;;  %s37_s8 = smov 32   ;;  %s38_s9 = smov 64   ;;  %vm13_vm1 = vcmask 1048320   ;;  %vm19_vm2 = vcmask 785920   ;;  %vm25_vm3 = vcmask 523520   ;;  %s55_s0 = inlined_call_operand.vmem [shape: f32[4,32], index: 0, kind: input, shape index: {}]   ;;  %s56_s1 = inlined_call_operand.vmem [shape: f32[1,128], index: 1, kind: output, shape index: {}]  }
   0x1   :  { %v4_v0 = vld [vmem:[%s55_s0] sm:$0xf]  ;;  %s36_s0 = smov 96  }
   0x2   :  { %5 = vst [vmem:[#allocation1] sm:$0xf] %v4_v0 }
   0x9   :  { %v10_v1 = vld [vmem:[#allocation1 + $0x3] sm:$0x1]   ;;  %v22_v2 = vld [vmem:[#allocation1 + $0x1] sm:$0x1]   ;;  %v6_v3 = vld [vmem:[#allocation1] sm:$0x1]  }
   0xa   :  { %11 = vrot.lane.b32.xlu0 %v10_v1, %s36_s0  ;;  %23 = vrot.lane.b32.xlu1 %v22_v2, %s37_s8  ;;  %v16_v4 = vld [vmem:[#allocation1 + $0x2] sm:$0x1]   ;;  %8 = vst.msk [vmem:[#allocation0] sm:$0x1] %vm7_vm0, %v6_v3  }
   0xe   :  { %17 = vrot.lane.b32.xlu0 %v16_v4, %s38_s9 }
  0x7c   :  { %v12_v5 = vpop.permute.xlu0 %11   ;;  %v24_v6 = vpop.permute.xlu1 %23  }
  0x7d   :  { %14 = vst.msk [vmem:[#allocation0] sm:$0x1] %vm13_vm1, %v12_v5  }
  0x80   :  { %v18_v7 = vpop.permute.xlu0 %17  }
  0x81   :  { %20 = vst.msk [vmem:[#allocation0] sm:$0x1] %vm19_vm2, %v18_v7  }
  0x82   :  { %26 = vst.msk [vmem:[#allocation0] sm:$0x1] %vm25_vm3, %v24_v6  }
  0x89   :  { %v30_v8 = vld [vmem:[#allocation0] sm:$0x1] }
  0x8a   :  { %32 = vst [vmem:[%s56_s1] sm:$0x1] %v30_v8 }

// kernel: generator_forward.10
= control target key start
LH: loop header
LB: loop body
LE: loop exit
PB: predicated region body
PF: predicated region fallthrough
CT: control target
= control target key end

     0   :  { %s92_s0 = inlined_call_operand.vmem [shape: f32[32,128], index: 0, kind: input, shape index: {}]   ;;  %s93_s1 = inlined_call_operand.vmem [shape: f32[2,128], index: 1, kind: input, shape index: {}]   ;;  %s94_s2 = inlined_call_operand.vmem [shape: f32[32,128], index: 2, kind: output, shape index: {}]  }
   0x1   :  { %v11_v0 = vld [vmem:[%s92_s0] sm:$0xff]  ;;  %v12_v4 = vld [vmem:[%s92_s0 + $0x8] sm:$0xff]  ;;  %v13_v5 = vld [vmem:[%s92_s0 + $0x10] sm:$0xff] }
   0x2   :  { %v45_v1 = vld [vmem:[%s93_s1] ss:$0 sm:$0xff]  ;;  %v46_v2 = vld [vmem:[%s93_s1 + $0x1] ss:$0 sm:$0xff]  ;;  %v14_v6 = vld [vmem:[%s92_s0 + $0x18] sm:$0xff] }
   0x3   :  { %v20_v3 = vmul.f32 %v45_v1, %v11_v0  ;;  %v21_v7 = vmul.f32 %v45_v1, %v12_v4  ;;  %v22_v8 = vmul.f32 %v45_v1, %v13_v5  ;;  %v23_v9 = vmul.f32 %v45_v1, %v14_v6 }
   0x5   :  { %v29_v10 = vadd.f32 %v46_v2, %v20_v3  ;;  %v30_v11 = vadd.f32 %v46_v2, %v21_v7  ;;  %v31_v12 = vadd.f32 %v46_v2, %v22_v8  ;;  %v32_v13 = vadd.f32 %v46_v2, %v23_v9 }
   0x7   :  { %v33_v14 = vmax.f32 %v29_v10, 0.0  ;;  %v34_v15 = vmax.f32 %v30_v11, 0.0  ;;  %v35_v16 = vmax.f32 %v31_v12, 0.0  ;;  %v36_v17 = vmax.f32 %v32_v13, 0.0 }
   0x9   :  { %37 = vst [vmem:[%s94_s2] sm:$0xff] %v33_v14  ;;  %38 = vst [vmem:[%s94_s2 + $0x8] sm:$0xff] %v34_v15 }
   0xa   :  { %39 = vst [vmem:[%s94_s2 + $0x10] sm:$0xff] %v35_v16  ;;  %40 = vst [vmem:[%s94_s2 + $0x18] sm:$0xff] %v36_v17 }

// kernel: generator_forward.9
= control target key start
LH: loop header
LB: loop body
LE: loop exit
PB: predicated region body
PF: predicated region fallthrough
CT: control target
= control target key end

     0   :  { %vm374_vm0 = vcmask 523264   ;;  %vm554_vm1 = vcmask 1040384   ;;  %s919_s1 = inlined_call_operand.vmem [shape: bf16[576,128], index: 1, kind: input, shape index: {}]   ;;  %s920_s0 = inlined_call_operand.vmem [shape: bf16[32,576], index: 0, kind: input, shape index: {}]   ;;  %s921_s2 = inlined_call_operand.vmem [shape: f32[1,128], index: 2, kind: input, shape index: {}]   ;;  %s922_s3 = inlined_call_operand.vmem [shape: f32[32,128], index: 3, kind: output, shape index: {0}]   ;;  %s923_s4 = inlined_call_operand.vmem [shape: f32[1,2,128], index: 4, kind: output, shape index: {1}]  }
   0x1   :  { %v688_v0 = vld [vmem:[%s919_s1 + $0x40] sm:$0xff]   ;;  %v692_v4 = vld [vmem:[%s919_s1 + $0x48] sm:$0xff]   ;;  %v696_v8 = vld [vmem:[%s919_s1 + $0x50] sm:$0xff]  }
   0x2   :  { %v689_v1 = vld [vmem:[%s919_s1] sm:$0xff]   ;;  %614 = vmatprep.subr.bf16.mxu0 %v688_v0  ;;  %v693_v5 = vld [vmem:[%s919_s1 + $0x8] sm:$0xff]   ;;  %v697_v9 = vld [vmem:[%s919_s1 + $0x10] sm:$0xff]  }
   0x3   :  { %v690_v2 = vld [vmem:[%s919_s1 + $0xc0] sm:$0xff]   ;;  %615 = vmatpush3.bf16.msra.mxu0 %v689_v1  ;;  %v694_v6 = vld [vmem:[%s919_s1 + $0xc8] sm:$0xff]   ;;  %v698_v10 = vld [vmem:[%s919_s1 + $0xd0] sm:$0xff]  }
   0x4   :  { %v691_v3 = vld [vmem:[%s919_s1 + $0x80] sm:$0xff]   ;;  %642 = vmatprep.subr.bf16.mxu1 %v690_v2  ;;  %616 = vmatprep.subr.bf16.mxu0 %v692_v4  ;;  %v695_v7 = vld [vmem:[%s919_s1 + $0x88] sm:$0xff]   ;;  %v699_v11 = vld [vmem:[%s919_s1 + $0x90] sm:$0xff]  }
   0x5   :  { %643 = vmatpush3.bf16.msra.mxu1 %v691_v3  ;;  %v700_v12 = vld [vmem:[%s919_s1 + $0x58] sm:$0xff]   ;;  %v704_v16 = vld [vmem:[%s919_s1 + $0x60] sm:$0xff]   ;;  %v708_v20 = vld [vmem:[%s919_s1 + $0x68] sm:$0xff]  }
   0x6   :  { %644 = vmatprep.subr.bf16.mxu1 %v694_v6  ;;  %v701_v13 = vld [vmem:[%s919_s1 + $0x18] sm:$0xff]   ;;  %v705_v17 = vld [vmem:[%s919_s1 + $0x20] sm:$0xff]   ;;  %v709_v21 = vld [vmem:[%s919_s1 + $0x28] sm:$0xff]  }
   0x7   :  { %617 = vmatpush3.bf16.msra.mxu0 %v693_v5  ;;  %v702_v14 = vld [vmem:[%s919_s1 + $0xd8] sm:$0xff]   ;;  %v706_v18 = vld [vmem:[%s919_s1 + $0xe0] sm:$0xff]   ;;  %v710_v22 = vld [vmem:[%s919_s1 + $0xe8] sm:$0xff]  }
   0x8   :  { %618 = vmatprep.subr.bf16.mxu0 %v696_v8  ;;  %v703_v15 = vld [vmem:[%s919_s1 + $0x98] sm:$0xff]   ;;  %v707_v19 = vld [vmem:[%s919_s1 + $0xa0] sm:$0xff]   ;;  %v711_v23 = vld [vmem:[%s919_s1 + $0xa8] sm:$0xff]  }
   0x9   :  { %645 = vmatpush3.bf16.msra.mxu1 %v695_v7  ;;  %v712_v24 = vld [vmem:[%s919_s1 + $0x70] sm:$0xff]   ;;  %v716_v28 = vld [vmem:[%s919_s1 + $0x78] sm:$0xff]   ;;  %v723_v34 = vld [vmem:[%s919_s1 + $0x100] sm:$0xff]  }
   0xa   :  { %646 = vmatprep.subr.bf16.mxu1 %v698_v10  ;;  %v713_v25 = vld [vmem:[%s919_s1 + $0x30] sm:$0xff]   ;;  %v717_v29 = vld [vmem:[%s919_s1 + $0x38] sm:$0xff]   ;;  %v726_v36 = vld [vmem:[%s920_s0 + $0xc] ss:$20 sps:$4 sm:$0xff]  }
   0xb   :  { %619 = vmatpush3.bf16.msra.mxu0 %v697_v9  ;;  %v714_v26 = vld [vmem:[%s919_s1 + $0xf0] sm:$0xff]   ;;  %v718_v30 = vld [vmem:[%s919_s1 + $0xf8] sm:$0xff]   ;;  %v727_v37 = vld [vmem:[%s919_s1 + $0x108] sm:$0xff]   ;;  %462 = vmatprep.mubr.bf16.mxu1 %v726_v36 }
   0xc   :  { %620 = vmatprep.subr.bf16.mxu0 %v700_v12  ;;  %v715_v27 = vld [vmem:[%s919_s1 + $0xb0] sm:$0xff]   ;;  %v721_v32 = vld [vmem:[%s920_s0 + $0x4] ss:$20 sps:$4 sm:$0xff]   ;;  %v724_v35 = vld [vmem:[%s920_s0 + $0x8] ss:$20 sps:$4 sm:$0xff]  }
   0xd   :  { %647 = vmatpush3.bf16.msra.mxu1 %v699_v11  ;;  %v719_v31 = vld [vmem:[%s920_s0] ss:$20 sps:$4 sm:$0xff]   ;;  %v722_v33 = vld [vmem:[%s919_s1 + $0xb8] sm:$0xff]   ;;  %413 = vmatprep.mubr.bf16.mxu0 %v721_v32  ;;  %v734_v42 = vld [vmem:[%s920_s0 + $0x30] ss:$20 sps:$4 sm:$0xff]  }
   0xe   :  { %648 = vmatprep.subr.bf16.mxu1 %v702_v14  ;;  %v728_v38 = vld [vmem:[%s920_s0 + $0x2c] ss:$20 sps:$4 sm:$0xff]   ;;  %v730_v39 = vld [vmem:[%s920_s0 + $0x28] ss:$20 sps:$4 sm:$0xff]   ;;  %v731_v40 = vld [vmem:[%s919_s1 + $0x110] sm:$0xff]  }
   0xf   :  { %621 = vmatpush3.bf16.msra.mxu0 %v701_v13  ;;  %v732_v41 = vld [vmem:[%s920_s0 + $0x34] ss:$20 sps:$4 sm:$0xff]   ;;  %v735_v43 = vld [vmem:[%s919_s1 + $0x118] sm:$0xff]   ;;  %v736_v44 = vld [vmem:[%s920_s0 + $0x10] ss:$20 sps:$4 sm:$0xff]  }
  0x10   :  { %622 = vmatprep.subr.bf16.mxu0 %v704_v16  ;;  %v737_v45 = vld [vmem:[%s920_s0 + $0x38] ss:$20 sps:$4 sm:$0xff]   ;;  %v565_v47 = vld [vmem:[%s921_s2] ss:$0 sm:$0xff] }
  0x11   :  { %649 = vmatpush3.bf16.msra.mxu1 %v703_v15 }
  0x12   :  { %650 = vmatprep.subr.bf16.mxu1 %v706_v18 }
  0x13   :  { %623 = vmatpush3.bf16.msra.mxu0 %v705_v17 }
  0x14   :  { %624 = vmatprep.subr.bf16.mxu0 %v708_v20 }
  0x15   :  { %651 = vmatpush3.bf16.msra.mxu1 %v707_v19 }
  0x16   :  { %652 = vmatprep.subr.bf16.mxu1 %v710_v22 }
  0x17   :  { %625 = vmatpush3.bf16.msra.mxu0 %v709_v21 }
  0x18   :  { %626 = vmatprep.subr.bf16.mxu0 %v712_v24 }
  0x19   :  { %653 = vmatpush3.bf16.msra.mxu1 %v711_v23 }
  0x1a   :  { %654 = vmatprep.subr.bf16.mxu1 %v714_v26 }
  0x1b   :  { %627 = vmatpush3.bf16.msra.mxu0 %v713_v25 }
  0x1c   :  { %628 = vmatprep.subr.bf16.mxu0 %v716_v28 }
  0x1d   :  { %655 = vmatpush3.bf16.msra.mxu1 %v715_v27 }
  0x1e   :  { %656 = vmatprep.subr.bf16.mxu1 %v718_v30 }
  0x1f   :  { %629 = vmatpush3.bf16.msra.mxu0 %v717_v29 }
  0x20   :  { %676 = vmatprep.subr.bf16.mxu0 %v723_v34 }
  0x21   :  { %657 = vmatpush3.bf16.msra.mxu1 %v722_v33 }
  0x22   :  { %414 = vmatmul.mubr.bf16.vlgmr.msra.gmra.mrb[0].mxu0 %v719_v31 }
  0x23   :  { %677 = vmatpush3.bf16.msra.mxu0 %v723_v34  ;;  %421 = vmatprep.mubr.bf16.mxu0 %v728_v38 }
  0x24   :  { %463 = vmatmul.mubr.bf16.vlgmr.msra.gmra.mrb[0].mxu1 %v724_v35  ;;  %678 = vmatprep.subr.bf16.mxu0 %v727_v37 }
  0x25   :  { %470 = vmatprep.mubr.bf16.mxu1 %v732_v41 }
  0x27   :  { %679 = vmatpush3.bf16.msra.mxu0 %v727_v37 }
  0x28   :  { %680 = vmatprep.subr.bf16.mxu0 %v731_v40 }
  0x2a   :  { %422 = vmatmul.mubr.bf16.gmra.mrb[4].mxu0 %v730_v39 }
  0x2b   :  { %684 = vmatprep.mubr.msk.bf16.mxu0 %vm374_vm0, %v736_v44  ;;  %681 = vmatpush3.bf16.msra.mxu0 %v731_v40 }
  0x2c   :  { %471 = vmatmul.mubr.bf16.gmra.mrb[4].mxu1 %v734_v42  ;;  %682 = vmatprep.subr.bf16.mxu0 %v735_v43 }
  0x2f   :  { %683 = vmatpush3.bf16.msra.mxu0 %v735_v43 }
  0x32   :  { %685 = vmatmul.mubr.msk.bf16.vlgmr.msra.gmra.mrb[8].mxu0 %vm374_vm0, %v737_v45 }
  0xf5   :  { %v630_v46 = vpop.f32.mrb[0].mxu0 }
  0xf6   :  { %v631_v48 = vpop.f32.mrb[1].mxu0 }
  0xf7   :  { %v632_v49 = vadd.f32 %v631_v48, %v630_v46  ;;  %v633_v50 = vpop.f32.mrb[2].mxu0  ;;  %v658_v51 = vpop.f32.mrb[0].mxu1 }
  0xf8   :  { %v634_v52 = vpop.f32.mrb[3].mxu0  ;;  %v659_v55 = vpop.f32.mrb[1].mxu1 }
  0xf9   :  { %v416_v53 = vadd.f32 %v632_v49, %v565_v47  ;;  %v635_v54 = vadd.f32 %v634_v52, %v633_v50  ;;  %v660_v56 = vadd.f32 %v659_v55, %v658_v51  ;;  %v661_v57 = vpop.f32.mrb[2].mxu1 }
  0xfa   :  { %v662_v59 = vpop.f32.mrb[3].mxu1 }
  0xfb   :  { %v419_v58 = vadd.f32 %v635_v54, %v565_v47  ;;  %v663_v60 = vadd.f32 %v662_v59, %v661_v57  ;;  %v465_v61 = vadd.f32 %v660_v56, %v416_v53 }
  0xfd   :  { %v636_v62 = vpop.f32.mrb[4].mxu0  ;;  %v468_v0 = vadd.f32 %v663_v60, %v419_v58 }
  0xfe   :  { %v637_v63 = vpop.f32.mrb[5].mxu0 }
  0xff   :  { %v638_v1 = vadd.f32 %v637_v63, %v636_v62  ;;  %v639_v2 = vpop.f32.mrb[6].mxu0  ;;  %v664_v3 = vpop.f32.mrb[4].mxu1 }
 0x100   :  { %v640_v4 = vpop.f32.mrb[7].mxu0  ;;  %v665_v7 = vpop.f32.mrb[5].mxu1 }
 0x101   :  { %v424_v5 = vadd.f32 %v638_v1, %v565_v47  ;;  %v641_v6 = vadd.f32 %v640_v4, %v639_v2  ;;  %v666_v8 = vadd.f32 %v665_v7, %v664_v3  ;;  %v667_v9 = vpop.f32.mrb[6].mxu1 }
 0x102   :  { %v668_v11 = vpop.f32.mrb[7].mxu1 }
 0x103   :  { %v427_v10 = vadd.f32 %v641_v6, %v565_v47  ;;  %v669_v12 = vadd.f32 %v668_v11, %v667_v9  ;;  %v473_v13 = vadd.f32 %v666_v8, %v424_v5 }
 0x105   :  { %v686_v14 = vpop.f32.mrb[8].mxu0  ;;  %v476_v15 = vadd.f32 %v669_v12, %v427_v10 }
 0x106   :  { %v522_v16 = vadd.f32 %v686_v14, %v473_v13  ;;  %v513_v17 = vpop.f32.mrb[9].mxu0 }
 0x107   :  { %v514_v18 = vadd.f32 %v513_v17, %v465_v61  ;;  %v687_v19 = vpop.f32.mrb[10].mxu0 }
 0x108   :  { %530 = vst [vmem:[%s922_s3 + $0x10] sm:$0xff] %v522_v16  ;;  %v525_v20 = vadd.f32 %v687_v19, %v476_v15  ;;  %v516_v21 = vpop.f32.mrb[11].mxu0  ;;  %v543_v26 = vmul.f32 %v522_v16, %v522_v16 }
 0x109   :  { %528 = vst [vmem:[%s922_s3] sm:$0xff] %v514_v18  ;;  %v517_v22 = vadd.f32 %v516_v21, %v468_v0  ;;  %v541_v23 = vmul.f32 %v514_v18, %v514_v18 }
 0x10a   :  { %531 = vst [vmem:[%s922_s3 + $0x18] sm:$0xff] %v525_v20  ;;  %v544_v29 = vmul.f32 %v525_v20, %v525_v20 }
 0x10b   :  { %529 = vst [vmem:[%s922_s3 + $0x8] sm:$0xff] %v517_v22  ;;  %v532_v24 = vadd.f32 %v517_v22, %v514_v18  ;;  %v542_v25 = vmul.f32 %v517_v22, %v517_v22 }
 0x10d   :  { %v533_v27 = vadd.f32 %v532_v24, %v522_v16  ;;  %v545_v28 = vadd.f32 %v542_v25, %v541_v23 }
 0x10f   :  { %v534_v30 = vadd.f32 %v533_v27, %v525_v20  ;;  %v546_v31 = vadd.f32 %v545_v28, %v543_v26 }
 0x111   :  { %v535_v32 = vrot.slane %v534_v30, 4  ;;  %v547_v33 = vadd.f32 %v546_v31, %v544_v29 }
 0x113   :  { %v536_v34 = vadd.f32 %v535_v32, %v534_v30  ;;  %v548_v35 = vrot.slane %v547_v33, 4 }
 0x115   :  { %v537_v36 = vrot.slane %v536_v34, 2  ;;  %v549_v37 = vadd.f32 %v548_v35, %v547_v33 }
 0x117   :  { %v538_v38 = vadd.f32 %v537_v36, %v536_v34  ;;  %v550_v39 = vrot.slane %v549_v37, 2 }
 0x119   :  { %v539_v40 = vrot.slane %v538_v38, 1  ;;  %v551_v41 = vadd.f32 %v550_v39, %v549_v37 }
 0x11b   :  { %v552_v42 = vrot.slane %v551_v41, 1  ;;  %v540_v43 = vadd.f32 %v539_v40, %v538_v38 }
 0x11d   :  { %v553_v44 = vadd.f32 %v552_v42, %v551_v41 }
 0x11f   :  { %v555_v45 = vsel %vm554_vm1, %v540_v43, %v553_v44 }
 0x120   :  { %556 = vst [vmem:[%s923_s4] sm:$0x3] %v555_v45 }

// kernel: tile.79
= control target key start
LH: loop header
LB: loop body
LE: loop exit
PB: predicated region body
PF: predicated region fallthrough
CT: control target
= control target key end

     0   :  { %s22_s0 = inlined_call_operand.vmem [shape: f32[16], index: 0, kind: input, shape index: {}]   ;;  %s23_s1 = inlined_call_operand.vmem [shape: f32[4,16], index: 1, kind: output, shape index: {}]  }
   0x1   :  { %v4_v0 = vld [vmem:[%s22_s0] ss:$0 sm:$0xff] }
   0x2   :  { %5 = vst [vmem:[%s23_s1] sm:$0xf] %v4_v0 }

// kernel: tile.80
= control target key start
LH: loop header
LB: loop body
LE: loop exit
PB: predicated region body
PF: predicated region fallthrough
CT: control target
= control target key end

     0   :  { %vm7_vm0 = vcmask 130048   ;;  %s37_s8 = smov 16   ;;  %s38_s9 = smov 32   ;;  %vm13_vm1 = vcmask 523648   ;;  %vm19_vm2 = vcmask 392448   ;;  %vm25_vm3 = vcmask 261248   ;;  %s55_s0 = inlined_call_operand.vmem [shape: f32[4,16], index: 0, kind: input, shape index: {}]   ;;  %s56_s1 = inlined_call_operand.vmem [shape: f32[1,64], index: 1, kind: output, shape index: {}]  }
   0x1   :  { %v4_v0 = vld [vmem:[%s55_s0] sm:$0xf]  ;;  %s36_s0 = smov 48  }
   0x2   :  { %5 = vst [vmem:[#allocation1] sm:$0xf] %v4_v0 }
   0x9   :  { %v10_v1 = vld [vmem:[#allocation1 + $0x3] sm:$0x1]   ;;  %v22_v2 = vld [vmem:[#allocation1 + $0x1] sm:$0x1]   ;;  %v6_v3 = vld [vmem:[#allocation1] sm:$0x1]  }
   0xa   :  { %11 = vrot.lane.b32.xlu0 %v10_v1, %s36_s0  ;;  %23 = vrot.lane.b32.xlu1 %v22_v2, %s37_s8  ;;  %v16_v4 = vld [vmem:[#allocation1 + $0x2] sm:$0x1]   ;;  %8 = vst.msk [vmem:[#allocation0] sm:$0x1] %vm7_vm0, %v6_v3  }
   0xe   :  { %17 = vrot.lane.b32.xlu0 %v16_v4, %s38_s9 }
  0x7c   :  { %v12_v5 = vpop.permute.xlu0 %11   ;;  %v24_v6 = vpop.permute.xlu1 %23  }
  0x7d   :  { %14 = vst.msk [vmem:[#allocation0] sm:$0x1] %vm13_vm1, %v12_v5  }
  0x80   :  { %v18_v7 = vpop.permute.xlu0 %17  }
  0x81   :  { %20 = vst.msk [vmem:[#allocation0] sm:$0x1] %vm19_vm2, %v18_v7  }
  0x82   :  { %26 = vst.msk [vmem:[#allocation0] sm:$0x1] %vm25_vm3, %v24_v6  }
  0x89   :  { %v30_v8 = vld [vmem:[#allocation0] sm:$0x1] }
  0x8a   :  { %32 = vst [vmem:[%s56_s1] sm:$0x1] %v30_v8 }

// kernel: tile.91
= control target key start
LH: loop header
LB: loop body
LE: loop exit
PB: predicated region body
PF: predicated region fallthrough
CT: control target
= control target key end

     0   :  { %vm7_vm0 = vcmask 130048   ;;  %s37_s8 = smov 16   ;;  %s38_s9 = smov 32   ;;  %vm13_vm1 = vcmask 523648   ;;  %vm19_vm2 = vcmask 392448   ;;  %vm25_vm3 = vcmask 261248   ;;  %s55_s0 = inlined_call_operand.vmem [shape: f32[4,16], index: 0, kind: input, shape index: {}]   ;;  %s56_s1 = inlined_call_operand.vmem [shape: f32[64], index: 1, kind: output, shape index: {}]  }
   0x1   :  { %v4_v0 = vld [vmem:[%s55_s0] sm:$0xf]  ;;  %s36_s0 = smov 48  }
   0x2   :  { %5 = vst [vmem:[#allocation1] sm:$0xf] %v4_v0 }
   0x9   :  { %v10_v1 = vld [vmem:[#allocation1 + $0x3] sm:$0x1]   ;;  %v22_v2 = vld [vmem:[#allocation1 + $0x1] sm:$0x1]   ;;  %v6_v3 = vld [vmem:[#allocation1] sm:$0x1]  }
   0xa   :  { %11 = vrot.lane.b32.xlu0 %v10_v1, %s36_s0  ;;  %23 = vrot.lane.b32.xlu1 %v22_v2, %s37_s8  ;;  %v16_v4 = vld [vmem:[#allocation1 + $0x2] sm:$0x1]   ;;  %8 = vst.msk [vmem:[#allocation0] sm:$0x1] %vm7_vm0, %v6_v3  }
   0xe   :  { %17 = vrot.lane.b32.xlu0 %v16_v4, %s38_s9 }
  0x7c   :  { %v12_v5 = vpop.permute.xlu0 %11   ;;  %v24_v6 = vpop.permute.xlu1 %23  }
  0x7d   :  { %14 = vst.msk [vmem:[#allocation0] sm:$0x1] %vm13_vm1, %v12_v5  }
  0x80   :  { %v18_v7 = vpop.permute.xlu0 %17  }
  0x81   :  { %20 = vst.msk [vmem:[#allocation0] sm:$0x1] %vm19_vm2, %v18_v7  }
  0x82   :  { %26 = vst.msk [vmem:[#allocation0] sm:$0x1] %vm25_vm3, %v24_v6  }
  0x89   :  { %v30_v8 = vld [vmem:[#allocation0] sm:$0x1] }
  0x8a   :  { %32 = vst [vmem:[%s56_s1] sm:$0x1] %v30_v8 }

// kernel: tile.92
= control target key start
LH: loop header
LB: loop body
LE: loop exit
PB: predicated region body
PF: predicated region fallthrough
CT: control target
= control target key end

     0   :  { %s22_s0 = inlined_call_operand.vmem [shape: f32[64], index: 0, kind: input, shape index: {}]   ;;  %s23_s1 = inlined_call_operand.vmem [shape: f32[2,64], index: 1, kind: output, shape index: {}]  }
   0x1   :  { %v4_v0 = vld [vmem:[%s22_s0] ss:$0 sm:$0xff] }
   0x2   :  { %5 = vst [vmem:[%s23_s1] sm:$0x3] %v4_v0 }

// kernel: tile.97
= control target key start
LH: loop header
LB: loop body
LE: loop exit
PB: predicated region body
PF: predicated region fallthrough
CT: control target
= control target key end

     0   :  { %vm7_vm0 = vcmask 523264   ;;  %vm13_vm1 = vcmask 1048064   ;;  %s39_s0 = inlined_call_operand.vmem [shape: f32[2,64], index: 0, kind: input, shape index: {}]   ;;  %s40_s1 = inlined_call_operand.vmem [shape: f32[1,128], index: 1, kind: output, shape index: {}]  }
   0x1   :  { %v4_v0 = vld [vmem:[%s39_s0] sm:$0x3]  ;;  %s22_s0 = smov 64  }
   0x2   :  { %5 = vst [vmem:[#allocation1] sm:$0x3] %v4_v0 }
   0x9   :  { %v10_v1 = vld [vmem:[#allocation1 + $0x1] sm:$0x1]   ;;  %v6_v2 = vld [vmem:[#allocation1] sm:$0x1]  }
   0xa   :  { %11 = vrot.lane.b32.xlu0 %v10_v1, %s22_s0  ;;  %8 = vst.msk [vmem:[#allocation0] sm:$0x1] %vm7_vm0, %v6_v2  }
  0x7c   :  { %v12_v3 = vpop.permute.xlu0 %11  }
  0x7d   :  { %14 = vst.msk [vmem:[#allocation0] sm:$0x1] %vm13_vm1, %v12_v3  }
  0x84   :  { %v18_v4 = vld [vmem:[#allocation0] sm:$0x1] }
  0x85   :  { %20 = vst [vmem:[%s40_s1] sm:$0x1] %v18_v4 }

// kernel: generator_forward.11
= control target key start
LH: loop header
LB: loop body
LE: loop exit
PB: predicated region body
PF: predicated region fallthrough
CT: control target
= control target key end

     0   :  { %vm320_vm0 = vcmask 261120   ;;  %vm539_vm1 = vcmask 523264   ;;  %vm646_vm2 = vcmask 1040384   ;;  %vm648_vm3 = vcmask 517120   ;;  %s1160_s1 = inlined_call_operand.vmem [shape: bf16[288,64], index: 1, kind: input, shape index: {}]   ;;  %s1161_s0 = inlined_call_operand.vmem [shape: bf16[128,288], index: 0, kind: input, shape index: {}]   ;;  %s1162_s2 = inlined_call_operand.vmem [shape: f32[1,64], index: 2, kind: input, shape index: {}]   ;;  %s1163_s3 = inlined_call_operand.vmem [shape: f32[128,64], index: 3, kind: output, shape index: {0}]   ;;  %s1164_s4 = inlined_call_operand.vmem [shape: f32[1,2,64], index: 4, kind: output, shape index: {1}]  }
   0x1   :  { %v819_v0 = vld [vmem:[%s1160_s1 + $0x40] sm:$0xff]   ;;  %v821_v2 = vld [vmem:[%s1160_s1 + $0x48] sm:$0xff]   ;;  %v823_v4 = vld [vmem:[%s1160_s1 + $0x50] sm:$0xff]  }
   0x2   :  { %v820_v1 = vld [vmem:[%s1160_s1] sm:$0xff]   ;;  %709 = vmatprep.subr.bf16.mxu0 %v819_v0  ;;  %803 = vmatprep.subr.bf16.mxu1 %v819_v0  ;;  %v822_v3 = vld [vmem:[%s1160_s1 + $0x8] sm:$0xff]   ;;  %v824_v5 = vld [vmem:[%s1160_s1 + $0x10] sm:$0xff]  }
   0x3   :  { %710 = vmatpush3.bf16.msra.mxu0 %v820_v1  ;;  %811 = vmatpush3.bf16.msra.mxu1 %v820_v1  ;;  %v825_v6 = vld [vmem:[%s1160_s1 + $0x58] sm:$0xff]   ;;  %v827_v8 = vld [vmem:[%s1160_s1 + $0x60] sm:$0xff]   ;;  %v829_v10 = vld [vmem:[%s1160_s1 + $0x68] sm:$0xff]  }
   0x4   :  { %711 = vmatprep.subr.bf16.mxu0 %v821_v2  ;;  %804 = vmatprep.subr.bf16.mxu1 %v821_v2  ;;  %v826_v7 = vld [vmem:[%s1160_s1 + $0x18] sm:$0xff]   ;;  %v828_v9 = vld [vmem:[%s1160_s1 + $0x20] sm:$0xff]   ;;  %v830_v13 = vld [vmem:[%s1160_s1 + $0x28] sm:$0xff]  }
   0x5   :  { %v837_v11 = vld [vmem:[%s1161_s0 + $0x4] ss:$12 sps:$4 sm:$0xff]   ;;  %v840_v12 = vld [vmem:[%s1161_s0 + $0x94] ss:$12 sps:$4 sm:$0xff]   ;;  %v833_v16 = vld [vmem:[%s1160_s1 + $0x78] sm:$0xff]  }
   0x6   :  { %v831_v14 = vld [vmem:[%s1160_s1 + $0x70] sm:$0xff]   ;;  %377 = vmatprep.mubr.bf16.mxu0 %v837_v11  ;;  %425 = vmatprep.mubr.bf16.mxu1 %v840_v12  ;;  %v834_v17 = vld [vmem:[%s1160_s1 + $0x38] sm:$0xff]   ;;  %v835_v18 = vld [vmem:[%s1161_s0] ss:$12 sps:$4 sm:$0xff]  }
   0x7   :  { %712 = vmatpush3.bf16.msra.mxu0 %v822_v3  ;;  %812 = vmatpush3.bf16.msra.mxu1 %v822_v3  ;;  %v832_v15 = vld [vmem:[%s1160_s1 + $0x30] sm:$0xff]   ;;  %v845_v19 = vld [vmem:[%s1160_s1 + $0x80] sm:$0xff]   ;;  %v841_v21 = vld [vmem:[%s1161_s0 + $0x1c] ss:$12 sps:$4 sm:$0xff]  }
   0x8   :  { %713 = vmatprep.subr.bf16.mxu0 %v823_v4  ;;  %805 = vmatprep.subr.bf16.mxu1 %v823_v4  ;;  %v838_v20 = vld [vmem:[%s1161_s0 + $0x90] ss:$12 sps:$4 sm:$0xff]   ;;  %v843_v22 = vld [vmem:[%s1161_s0 + $0xac] ss:$12 sps:$4 sm:$0xff]   ;;  %v847_v25 = vld [vmem:[%s1161_s0 + $0xa8] ss:$12 sps:$4 sm:$0xff]  }
   0x9   :  { %v848_v23 = vld [vmem:[%s1160_s1 + $0x88] sm:$0xff]   ;;  %v846_v24 = vld [vmem:[%s1161_s0 + $0x18] ss:$12 sps:$4 sm:$0xff]   ;;  %v849_v26 = vld [vmem:[%s1161_s0 + $0x34] ss:$12 sps:$4 sm:$0xff]  }
   0xa   :  { %v851_v27 = vld [vmem:[%s1161_s0 + $0x8] ss:$12 sps:$4 sm:$0xff]   ;;  %v852_v28 = vld [vmem:[%s1161_s0 + $0x30] ss:$12 sps:$4 sm:$0xff]   ;;  %v853_v29 = vld [vmem:[%s1161_s0 + $0x20] ss:$12 sps:$4 sm:$0xff]  }
   0xb   :  { %714 = vmatpush3.bf16.msra.mxu0 %v824_v5  ;;  %813 = vmatpush3.bf16.msra.mxu1 %v824_v5  ;;  %v854_v30 = vld [vmem:[%s1161_s0 + $0x4c] ss:$12 sps:$4 sm:$0xff]   ;;  %v857_v32 = vld [vmem:[%s1161_s0 + $0x48] ss:$12 sps:$4 sm:$0xff]   ;;  %v858_v33 = vld [vmem:[%s1161_s0 + $0x50] ss:$12 sps:$4 sm:$0xff]  }
   0xc   :  { %715 = vmatprep.subr.bf16.mxu0 %v825_v6  ;;  %806 = vmatprep.subr.bf16.mxu1 %v825_v6  ;;  %v856_v31 = vld [vmem:[%s1161_s0 + $0x38] ss:$12 sps:$4 sm:$0xff]   ;;  %v861_v35 = vld [vmem:[%s1161_s0 + $0x68] ss:$12 sps:$4 sm:$0xff]   ;;  %v862_v36 = vld [vmem:[%s1161_s0 + $0x60] ss:$12 sps:$4 sm:$0xff]  }
   0xd   :  { %v859_v34 = vld [vmem:[%s1161_s0 + $0x64] ss:$12 sps:$4 sm:$0xff]   ;;  %v863_v37 = vld [vmem:[%s1161_s0 + $0x80] ss:$12 sps:$4 sm:$0xff]   ;;  %v864_v38 = vld [vmem:[%s1161_s0 + $0x7c] ss:$12 sps:$4 sm:$0xff]  }
   0xe   :  { %v866_v39 = vld [vmem:[%s1161_s0 + $0x98] ss:$12 sps:$4 sm:$0xff]   ;;  %v868_v41 = vld [vmem:[%s1161_s0 + $0xb0] ss:$12 sps:$4 sm:$0xff]   ;;  %v1039_v2 = vld [vmem:[%s1162_s2] ss:$0 sm:$0xff] }
   0xf   :  { %716 = vmatpush3.bf16.msra.mxu0 %v826_v7  ;;  %814 = vmatpush3.bf16.msra.mxu1 %v826_v7  ;;  %v867_v40 = vld [vmem:[%s1161_s0 + $0x78] ss:$12 sps:$4 sm:$0xff]  }
  0x10   :  { %717 = vmatprep.subr.bf16.mxu0 %v827_v8  ;;  %807 = vmatprep.subr.bf16.mxu1 %v827_v8 }
  0x13   :  { %718 = vmatpush3.bf16.msra.mxu0 %v828_v9  ;;  %815 = vmatpush3.bf16.msra.mxu1 %v828_v9 }
  0x14   :  { %719 = vmatprep.subr.bf16.mxu0 %v829_v10  ;;  %808 = vmatprep.subr.bf16.mxu1 %v829_v10 }
  0x17   :  { %720 = vmatpush3.bf16.msra.mxu0 %v830_v13  ;;  %816 = vmatpush3.bf16.msra.mxu1 %v830_v13 }
  0x18   :  { %721 = vmatprep.subr.bf16.mxu0 %v831_v14  ;;  %809 = vmatprep.subr.bf16.mxu1 %v831_v14 }
  0x1b   :  { %722 = vmatpush3.bf16.msra.mxu0 %v832_v15  ;;  %817 = vmatpush3.bf16.msra.mxu1 %v832_v15 }
  0x1c   :  { %723 = vmatprep.subr.bf16.mxu0 %v833_v16  ;;  %810 = vmatprep.subr.bf16.mxu1 %v833_v16 }
  0x1f   :  { %724 = vmatpush3.bf16.msra.mxu0 %v834_v17  ;;  %818 = vmatpush3.bf16.msra.mxu1 %v834_v17 }
  0x20   :  { %783 = vmatprep.subr.bf16.mxu1 %v845_v19 }
  0x22   :  { %378 = vmatmul.mubr.bf16.vlgmr.msra.gmra.mrb[0].mxu0 %v835_v18  ;;  %426 = vmatmul.mubr.bf16.vlgmr.msra.gmra.mrb[0].mxu1 %v838_v20 }
  0x23   :  { %385 = vmatprep.mubr.bf16.mxu0 %v841_v21  ;;  %433 = vmatprep.mubr.bf16.mxu1 %v843_v22 }
  0x24   :  { %784 = vmatpush3.bf16.msra.mxu1 %v845_v19 }
  0x25   :  { %785 = vmatprep.subr.bf16.mxu1 %v848_v23 }
  0x28   :  { %786 = vmatpush3.bf16.msra.mxu1 %v848_v23 }
  0x2a   :  { %386 = vmatmul.mubr.bf16.gmra.mrb[4].mxu0 %v846_v24  ;;  %434 = vmatmul.mubr.bf16.gmra.mrb[4].mxu1 %v847_v25 }
  0x2b   :  { %393 = vmatprep.mubr.bf16.mxu0 %v849_v26  ;;  %787 = vmatprep.mubr.msk.bf16.mxu1 %vm320_vm0, %v851_v27 }
  0x32   :  { %394 = vmatmul.mubr.bf16.gmra.mrb[8].mxu0 %v852_v28  ;;  %788 = vmatmul.mubr.msk.bf16.vlgmr.msra.gmra.mrb[8].mxu1 %vm320_vm0, %v853_v29 }
  0x33   :  { %401 = vmatprep.mubr.bf16.mxu0 %v854_v30  ;;  %791 = vmatprep.mubr.msk.bf16.mxu1 %vm320_vm0, %v856_v31 }
  0x3a   :  { %402 = vmatmul.mubr.bf16.gmra.mrb[12].mxu0 %v857_v32  ;;  %792 = vmatmul.mubr.msk.bf16.gmra.mrb[12].mxu1 %vm320_vm0, %v858_v33 }
  0x3b   :  { %409 = vmatprep.mubr.bf16.mxu0 %v859_v34  ;;  %795 = vmatprep.mubr.msk.bf16.mxu1 %vm320_vm0, %v861_v35 }
  0x42   :  { %410 = vmatmul.mubr.bf16.gmra.mrb[16].mxu0 %v862_v36  ;;  %796 = vmatmul.mubr.msk.bf16.gmra.mrb[16].mxu1 %vm320_vm0, %v863_v37 }
  0x43   :  { %417 = vmatprep.mubr.bf16.mxu0 %v864_v38  ;;  %799 = vmatprep.mubr.msk.bf16.mxu1 %vm320_vm0, %v866_v39 }
  0x4a   :  { %418 = vmatmul.mubr.bf16.gmra.mrb[20].mxu0 %v867_v40  ;;  %800 = vmatmul.mubr.msk.bf16.gmra.mrb[20].mxu1 %vm320_vm0, %v868_v41 }
  0xf5   :  { %v725_v42 = vpop.f32.mrb[0].mxu0  ;;  %v761_v43 = vpop.f32.mrb[0].mxu1 }
  0xf6   :  { %v726_v44 = vpop.f32.mrb[1].mxu0  ;;  %v762_v45 = vpop.f32.mrb[1].mxu1 }
  0xf7   :  { %v727_v46 = vadd.f32 %v726_v44, %v725_v42  ;;  %v728_v47 = vpop.f32.mrb[2].mxu0  ;;  %v1028_v48 = vadd.f32 %v762_v45, %v761_v43  ;;  %v764_v49 = vpop.f32.mrb[2].mxu1 }
  0xf8   :  { %v729_v50 = vpop.f32.mrb[3].mxu0  ;;  %v765_v51 = vpop.f32.mrb[3].mxu1 }
  0xf9   :  { %v730_v52 = vadd.f32 %v729_v50, %v728_v47  ;;  %v1030_v53 = vadd.f32 %v765_v51, %v764_v49  ;;  %v380_v6 = vadd.f32 %v727_v46, %v1039_v2 }
  0xfb   :  { %v383_v15 = vadd.f32 %v730_v52, %v1039_v2 }
  0xfd   :  { %v731_v54 = vpop.f32.mrb[4].mxu0  ;;  %v767_v55 = vpop.f32.mrb[4].mxu1 }
  0xfe   :  { %v732_v56 = vpop.f32.mrb[5].mxu0  ;;  %v768_v57 = vpop.f32.mrb[5].mxu1 }
  0xff   :  { %v733_v58 = vadd.f32 %v732_v56, %v731_v54  ;;  %v734_v59 = vpop.f32.mrb[6].mxu0  ;;  %v1032_v60 = vadd.f32 %v768_v57, %v767_v55  ;;  %v770_v61 = vpop.f32.mrb[6].mxu1 }
 0x100   :  { %v735_v62 = vpop.f32.mrb[7].mxu0  ;;  %v771_v63 = vpop.f32.mrb[7].mxu1 }
 0x101   :  { %v736_v0 = vadd.f32 %v735_v62, %v734_v59  ;;  %v1034_v1 = vadd.f32 %v771_v63, %v770_v61  ;;  %v388_v3 = vadd.f32 %v733_v58, %v1039_v2 }
 0x103   :  { %v391_v10 = vadd.f32 %v736_v0, %v1039_v2 }
 0x105   :  { %v737_v4 = vpop.f32.mrb[8].mxu0  ;;  %v789_v5 = vpop.f32.mrb[8].mxu1 }
 0x106   :  { %v485_v7 = vadd.f32 %v789_v5, %v388_v3  ;;  %v738_v8 = vpop.f32.mrb[9].mxu0  ;;  %v476_v9 = vpop.f32.mrb[9].mxu1 }
 0x107   :  { %v739_v11 = vadd.f32 %v738_v8, %v737_v4  ;;  %v477_v12 = vadd.f32 %v476_v9, %v380_v6  ;;  %v740_v13 = vpop.f32.mrb[10].mxu0  ;;  %v790_v14 = vpop.f32.mrb[10].mxu1 }
 0x108   :  { %542 = vst.msk [vmem:[%s1163_s3 + $0x10] sm:$0xff] %vm539_vm1, %v485_v7  ;;  %v488_v16 = vadd.f32 %v790_v14, %v391_v10  ;;  %v741_v17 = vpop.f32.mrb[11].mxu0  ;;  %v479_v18 = vpop.f32.mrb[11].mxu1  ;;  %v595_v22 = vmul.f32 %v485_v7, %v485_v7  ;;  %v559_v28 = vsel %vm539_vm1, %v485_v7, 0.0 }
 0x109   :  { %540 = vst.msk [vmem:[%s1163_s3] sm:$0xff] %vm539_vm1, %v477_v12  ;;  %v593_v19 = vmul.f32 %v477_v12, %v477_v12  ;;  %v742_v20 = vadd.f32 %v741_v17, %v740_v13  ;;  %v480_v21 = vadd.f32 %v479_v18, %v383_v15  ;;  %v556_v23 = vsel %vm539_vm1, %v477_v12, 0.0 }
 0x10a   :  { %543 = vst.msk [vmem:[%s1163_s3 + $0x18] sm:$0xff] %vm539_vm1, %v488_v16  ;;  %v596_v26 = vmul.f32 %v488_v16, %v488_v16  ;;  %v396_v33 = vadd.f32 %v739_v11, %v1039_v2  ;;  %v612_v38 = vsel %vm539_vm1, %v595_v22, 0.0  ;;  %v561_v39 = vsel %vm539_vm1, %v488_v16, 0.0 }
 0x10b   :  { %541 = vst.msk [vmem:[%s1163_s3 + $0x8] sm:$0xff] %vm539_vm1, %v480_v21  ;;  %v557_v24 = vsel %vm539_vm1, %v480_v21, 0.0  ;;  %v594_v25 = vmul.f32 %v480_v21, %v480_v21  ;;  %v609_v29 = vsel %vm539_vm1, %v593_v19, 0.0  ;;  %v399_v49 = vadd.f32 %v742_v20, %v1039_v2 }
 0x10c   :  { %v558_v27 = vadd.f32 %v557_v24, %v556_v23  ;;  %v614_v44 = vsel %vm539_vm1, %v596_v26, 0.0 }
 0x10d   :  { %v610_v30 = vsel %vm539_vm1, %v594_v25, 0.0  ;;  %v743_v31 = vpop.f32.mrb[12].mxu0  ;;  %v793_v32 = vpop.f32.mrb[12].mxu1 }
 0x10e   :  { %v560_v34 = vadd.f32 %v559_v28, %v558_v27  ;;  %v611_v35 = vadd.f32 %v610_v30, %v609_v29  ;;  %v744_v36 = vpop.f32.mrb[13].mxu0  ;;  %v492_v37 = vpop.f32.mrb[13].mxu1 }
 0x10f   :  { %v745_v40 = vadd.f32 %v744_v36, %v743_v31  ;;  %v493_v41 = vadd.f32 %v492_v37, %v396_v33  ;;  %v746_v42 = vpop.f32.mrb[14].mxu0  ;;  %v794_v43 = vpop.f32.mrb[14].mxu1  ;;  %v436_v31 = vadd.f32 %v1032_v60, %v1039_v2 }
 0x110   :  { %v613_v45 = vadd.f32 %v612_v38, %v611_v35  ;;  %v562_v46 = vadd.f32 %v561_v39, %v560_v34  ;;  %v747_v47 = vpop.f32.mrb[15].mxu0  ;;  %v495_v50 = vpop.f32.mrb[15].mxu1  ;;  %v428_v39 = vadd.f32 %v1028_v48, %v1039_v2 }
 0x111   :  { %v404_v51 = vadd.f32 %v745_v40, %v1039_v2  ;;  %544 = vst.msk [vmem:[%s1163_s3 + $0x20] sm:$0xff] %vm539_vm1, %v493_v41  ;;  %v563_v52 = vsel %vm539_vm1, %v493_v41, 0.0  ;;  %v597_v54 = vmul.f32 %v493_v41, %v493_v41  ;;  %v748_v55 = vadd.f32 %v747_v47, %v746_v42 }
 0x112   :  { %v564_v56 = vadd.f32 %v563_v52, %v562_v46  ;;  %v615_v57 = vadd.f32 %v614_v44, %v613_v45  ;;  %v496_v58 = vadd.f32 %v495_v50, %v399_v49  ;;  %v439_v47 = vadd.f32 %v1034_v1, %v1039_v2 }
 0x113   :  { %v501_v59 = vadd.f32 %v793_v32, %v404_v51  ;;  %v616_v61 = vsel %vm539_vm1, %v597_v54, 0.0  ;;  %v407_v62 = vadd.f32 %v748_v55, %v1039_v2  ;;  %v431_v50 = vadd.f32 %v1030_v53, %v1039_v2 }
 0x114   :  { %v617_v63 = vadd.f32 %v616_v61, %v615_v57  ;;  %545 = vst.msk [vmem:[%s1163_s3 + $0x28] sm:$0xff] %vm539_vm1, %v496_v58  ;;  %v565_v0 = vsel %vm539_vm1, %v496_v58, 0.0  ;;  %v598_v3 = vmul.f32 %v496_v58, %v496_v58 }
 0x115   :  { %546 = vst.msk [vmem:[%s1163_s3 + $0x30] sm:$0xff] %vm539_vm1, %v501_v59  ;;  %v599_v4 = vmul.f32 %v501_v59, %v501_v59  ;;  %v504_v5 = vadd.f32 %v794_v43, %v407_v62  ;;  %v566_v6 = vadd.f32 %v565_v0, %v564_v56  ;;  %v567_v7 = vsel %vm539_vm1, %v501_v59, 0.0  ;;  %v749_v8 = vpop.f32.mrb[16].mxu0  ;;  %v797_v9 = vpop.f32.mrb[16].mxu1 }
 0x116   :  { %v618_v10 = vsel %vm539_vm1, %v598_v3, 0.0  ;;  %v750_v11 = vpop.f32.mrb[17].mxu0  ;;  %v508_v12 = vpop.f32.mrb[17].mxu1 }
 0x117   :  { %547 = vst.msk [vmem:[%s1163_s3 + $0x38] sm:$0xff] %vm539_vm1, %v504_v5  ;;  %v600_v13 = vmul.f32 %v504_v5, %v504_v5  ;;  %v568_v14 = vadd.f32 %v567_v7, %v566_v6  ;;  %v619_v15 = vadd.f32 %v618_v10, %v617_v63  ;;  %v620_v16 = vsel %vm539_vm1, %v599_v4, 0.0  ;;  %v752_v17 = vpop.f32.mrb[18].mxu0  ;;  %v798_v18 = vpop.f32.mrb[18].mxu1 }
 0x118   :  { %v751_v19 = vadd.f32 %v750_v11, %v749_v8  ;;  %v753_v20 = vpop.f32.mrb[19].mxu0  ;;  %v569_v21 = vsel %vm539_vm1, %v504_v5, 0.0  ;;  %v511_v22 = vpop.f32.mrb[19].mxu1 }
 0x119   :  { %v621_v23 = vadd.f32 %v620_v16, %v619_v15  ;;  %v754_v24 = vadd.f32 %v753_v20, %v752_v17  ;;  %v570_v25 = vadd.f32 %v569_v21, %v568_v14  ;;  %v622_v26 = vsel %vm539_vm1, %v600_v13, 0.0 }
 0x11a   :  { %v412_v27 = vadd.f32 %v751_v19, %v1039_v2 }
 0x11b   :  { %v623_v28 = vadd.f32 %v622_v26, %v621_v23  ;;  %v415_v29 = vadd.f32 %v754_v24, %v1039_v2 }
 0x11c   :  { %v509_v30 = vadd.f32 %v508_v12, %v412_v27 }
 0x11d   :  { %v512_v32 = vadd.f32 %v511_v22, %v415_v29  ;;  %v755_v33 = vpop.f32.mrb[20].mxu0  ;;  %v801_v34 = vpop.f32.mrb[20].mxu1 }
 0x11e   :  { %548 = vst.msk [vmem:[%s1163_s3 + $0x40] sm:$0xff] %vm539_vm1, %v509_v30  ;;  %v571_v35 = vsel %vm539_vm1, %v509_v30, 0.0  ;;  %v601_v36 = vmul.f32 %v509_v30, %v509_v30  ;;  %v533_v37 = vadd.f32 %v801_v34, %v436_v31  ;;  %v756_v38 = vpop.f32.mrb[21].mxu0  ;;  %v524_v40 = vpop.f32.mrb[21].mxu1 }
 0x11f   :  { %v572_v41 = vadd.f32 %v571_v35, %v570_v25  ;;  %549 = vst.msk [vmem:[%s1163_s3 + $0x48] sm:$0xff] %vm539_vm1, %v512_v32  ;;  %v573_v60 = vsel %vm539_vm1, %v512_v32, 0.0  ;;  %v602_v42 = vmul.f32 %v512_v32, %v512_v32  ;;  %v757_v43 = vadd.f32 %v756_v38, %v755_v33  ;;  %v758_v44 = vpop.f32.mrb[22].mxu0  ;;  %v802_v45 = vpop.f32.mrb[22].mxu1 }
 0x120   :  { %v624_v46 = vsel %vm539_vm1, %v601_v36, 0.0  ;;  %554 = vst.msk [vmem:[%s1163_s3 + $0x70] sm:$0xff] %vm539_vm1, %v533_v37  ;;  %v525_v48 = vadd.f32 %v524_v40, %v428_v39  ;;  %v759_v49 = vpop.f32.mrb[23].mxu0  ;;  %v527_v51 = vpop.f32.mrb[23].mxu1  ;;  %v536_v57 = vadd.f32 %v802_v45, %v439_v47  ;;  %v607_v14 = vmul.f32 %v533_v37, %v533_v37 }
 0x121   :  { %v625_v52 = vadd.f32 %v624_v46, %v623_v28  ;;  %v574_v54 = vadd.f32 %v573_v60, %v572_v41  ;;  %v626_v55 = vsel %vm539_vm1, %v602_v42, 0.0  ;;  %v420_v56 = vadd.f32 %v757_v43, %v1039_v2 }
 0x122   :  { %552 = vst.msk [vmem:[%s1163_s3 + $0x60] sm:$0xff] %vm539_vm1, %v525_v48  ;;  %v760_v1 = vadd.f32 %v759_v49, %v758_v44  ;;  %v528_v61 = vadd.f32 %v527_v51, %v431_v50  ;;  %555 = vst.msk [vmem:[%s1163_s3 + $0x78] sm:$0xff] %vm539_vm1, %v536_v57  ;;  %v605_v6 = vmul.f32 %v525_v48, %v525_v48  ;;  %v583_v19 = vsel %vm539_vm1, %v533_v37, 0.0 }
 0x123   :  { %v627_v58 = vadd.f32 %v626_v55, %v625_v52  ;;  %v517_v59 = vadd.f32 %v797_v9, %v420_v56  ;;  %v579_v9 = vsel %vm539_vm1, %v525_v48, 0.0  ;;  %v608_v20 = vmul.f32 %v536_v57, %v536_v57 }
 0x124   :  { %v423_v63 = vadd.f32 %v760_v1, %v1039_v2  ;;  %553 = vst.msk [vmem:[%s1163_s3 + $0x68] sm:$0xff] %vm539_vm1, %v528_v61  ;;  %v606_v11 = vmul.f32 %v528_v61, %v528_v61  ;;  %v632_v15 = vsel %vm539_vm1, %v605_v6, 0.0  ;;  %v581_v16 = vsel %vm539_vm1, %v528_v61, 0.0 }
 0x125   :  { %550 = vst.msk [vmem:[%s1163_s3 + $0x50] sm:$0xff] %vm539_vm1, %v517_v59  ;;  %v575_v53 = vsel %vm539_vm1, %v517_v59, 0.0  ;;  %v603_v62 = vmul.f32 %v517_v59, %v517_v59  ;;  %v636_v24 = vsel %vm539_vm1, %v607_v14, 0.0  ;;  %v585_v25 = vsel %vm539_vm1, %v536_v57, 0.0 }
 0x126   :  { %v576_v0 = vadd.f32 %v575_v53, %v574_v54  ;;  %v520_v4 = vadd.f32 %v798_v18, %v423_v63  ;;  %v634_v21 = vsel %vm539_vm1, %v606_v11, 0.0  ;;  %v638_v28 = vsel %vm539_vm1, %v608_v20, 0.0 }
 0x127   :  { %v628_v3 = vsel %vm539_vm1, %v603_v62, 0.0 }
 0x128   :  { %v629_v5 = vadd.f32 %v628_v3, %v627_v58  ;;  %551 = vst.msk [vmem:[%s1163_s3 + $0x58] sm:$0xff] %vm539_vm1, %v520_v4  ;;  %v577_v7 = vsel %vm539_vm1, %v520_v4, 0.0  ;;  %v604_v8 = vmul.f32 %v520_v4, %v520_v4 }
 0x129   :  { %v578_v2 = vadd.f32 %v577_v7, %v576_v0 }
 0x12a   :  { %v630_v10 = vsel %vm539_vm1, %v604_v8, 0.0 }
 0x12b   :  { %v580_v12 = vadd.f32 %v579_v9, %v578_v2  ;;  %v631_v13 = vadd.f32 %v630_v10, %v629_v5 }
 0x12d   :  { %v582_v17 = vadd.f32 %v581_v16, %v580_v12  ;;  %v633_v18 = vadd.f32 %v632_v15, %v631_v13 }
 0x12f   :  { %v584_v22 = vadd.f32 %v583_v19, %v582_v17  ;;  %v635_v23 = vadd.f32 %v634_v21, %v633_v18 }
 0x131   :  { %v586_v26 = vadd.f32 %v585_v25, %v584_v22  ;;  %v637_v27 = vadd.f32 %v636_v24, %v635_v23 }
 0x133   :  { %v587_v29 = vrot.slane %v586_v26, 4  ;;  %v639_v30 = vadd.f32 %v638_v28, %v637_v27 }
 0x135   :  { %v588_v31 = vadd.f32 %v587_v29, %v586_v26  ;;  %v640_v32 = vrot.slane %v639_v30, 4 }
 0x137   :  { %v589_v33 = vrot.slane %v588_v31, 2  ;;  %v641_v34 = vadd.f32 %v640_v32, %v639_v30 }
 0x139   :  { %v590_v35 = vadd.f32 %v589_v33, %v588_v31  ;;  %v642_v36 = vrot.slane %v641_v34, 2 }
 0x13b   :  { %v591_v37 = vrot.slane %v590_v35, 1  ;;  %v643_v38 = vadd.f32 %v642_v36, %v641_v34 }
 0x13d   :  { %v644_v39 = vrot.slane %v643_v38, 1  ;;  %v592_v40 = vadd.f32 %v591_v37, %v590_v35 }
 0x13f   :  { %v645_v41 = vadd.f32 %v644_v39, %v643_v38 }
 0x141   :  { %v647_v60 = vsel %vm646_vm2, %v592_v40, %v645_v41 }
 0x142   :  { %649 = vst.msk [vmem:[%s1164_s4] sm:$0x3] %vm648_vm3, %v647_v60 }

// kernel: generator_forward.12
= control target key start
LH: loop header
LB: loop body
LE: loop exit
PB: predicated region body
PF: predicated region fallthrough
CT: control target
= control target key end

     0   :  { %s136_s0 = inlined_call_operand.vmem [shape: f32[64,128], index: 0, kind: input, shape index: {}]   ;;  %s137_s1 = inlined_call_operand.vmem [shape: f32[2,128], index: 1, kind: input, shape index: {}]   ;;  %s138_s2 = inlined_call_operand.vmem [shape: f32[64,128], index: 2, kind: output, shape index: {}]  }
   0x1   :  { %v11_v0 = vld [vmem:[%s136_s0] sm:$0xff]  ;;  %v12_v4 = vld [vmem:[%s136_s0 + $0x8] sm:$0xff]  ;;  %v13_v5 = vld [vmem:[%s136_s0 + $0x10] sm:$0xff] }
   0x2   :  { %v65_v1 = vld [vmem:[%s137_s1] ss:$0 sm:$0xff]  ;;  %v66_v2 = vld [vmem:[%s137_s1 + $0x1] ss:$0 sm:$0xff]  ;;  %v14_v6 = vld [vmem:[%s136_s0 + $0x18] sm:$0xff] }
   0x3   :  { %v24_v3 = vmul.f32 %v65_v1, %v11_v0  ;;  %v25_v7 = vmul.f32 %v65_v1, %v12_v4  ;;  %v26_v8 = vmul.f32 %v65_v1, %v13_v5  ;;  %v27_v9 = vmul.f32 %v65_v1, %v14_v6  ;;  %v15_v10 = vld [vmem:[%s136_s0 + $0x20] sm:$0xff]  ;;  %v16_v11 = vld [vmem:[%s136_s0 + $0x28] sm:$0xff]  ;;  %v17_v12 = vld [vmem:[%s136_s0 + $0x30] sm:$0xff] }
   0x4   :  { %v28_v14 = vmul.f32 %v65_v1, %v15_v10  ;;  %v29_v15 = vmul.f32 %v65_v1, %v16_v11  ;;  %v30_v16 = vmul.f32 %v65_v1, %v17_v12  ;;  %v18_v17 = vld [vmem:[%s136_s0 + $0x38] sm:$0xff] }
   0x5   :  { %v37_v13 = vadd.f32 %v66_v2, %v24_v3  ;;  %v38_v18 = vadd.f32 %v66_v2, %v25_v7  ;;  %v39_v19 = vadd.f32 %v66_v2, %v26_v8  ;;  %v40_v20 = vadd.f32 %v66_v2, %v27_v9 }
   0x6   :  { %v31_v21 = vmul.f32 %v65_v1, %v18_v17  ;;  %v41_v23 = vadd.f32 %v66_v2, %v28_v14  ;;  %v42_v24 = vadd.f32 %v66_v2, %v29_v15  ;;  %v43_v25 = vadd.f32 %v66_v2, %v30_v16 }
   0x7   :  { %v45_v22 = vmax.f32 %v37_v13, 0.0  ;;  %v46_v26 = vmax.f32 %v38_v18, 0.0  ;;  %v47_v27 = vmax.f32 %v39_v19, 0.0  ;;  %v48_v28 = vmax.f32 %v40_v20, 0.0 }
   0x8   :  { %v44_v29 = vadd.f32 %v66_v2, %v31_v21  ;;  %v49_v30 = vmax.f32 %v41_v23, 0.0  ;;  %v50_v31 = vmax.f32 %v42_v24, 0.0  ;;  %v51_v32 = vmax.f32 %v43_v25, 0.0 }
   0x9   :  { %53 = vst [vmem:[%s138_s2] sm:$0xff] %v45_v22  ;;  %54 = vst [vmem:[%s138_s2 + $0x8] sm:$0xff] %v46_v26 }
   0xa   :  { %55 = vst [vmem:[%s138_s2 + $0x10] sm:$0xff] %v47_v27  ;;  %56 = vst [vmem:[%s138_s2 + $0x18] sm:$0xff] %v48_v28  ;;  %v52_v33 = vmax.f32 %v44_v29, 0.0 }
   0xb   :  { %57 = vst [vmem:[%s138_s2 + $0x20] sm:$0xff] %v49_v30  ;;  %58 = vst [vmem:[%s138_s2 + $0x28] sm:$0xff] %v50_v31 }
   0xc   :  { %59 = vst [vmem:[%s138_s2 + $0x30] sm:$0xff] %v51_v32  ;;  %60 = vst [vmem:[%s138_s2 + $0x38] sm:$0xff] %v52_v33 }

// kernel: tile.102
= control target key start
LH: loop header
LB: loop body
LE: loop exit
PB: predicated region body
PF: predicated region fallthrough
CT: control target
= control target key end

     0   :  { %s22_s0 = inlined_call_operand.vmem [shape: f32[8], index: 0, kind: input, shape index: {}]   ;;  %s23_s1 = inlined_call_operand.vmem [shape: f32[4,8], index: 1, kind: output, shape index: {}]  }
   0x1   :  { %v4_v0 = vld [vmem:[%s22_s0] ss:$0 sm:$0xff] }
   0x2   :  { %5 = vst [vmem:[%s23_s1] sm:$0xf] %v4_v0 }

// kernel: tile.103
= control target key start
LH: loop header
LB: loop body
LE: loop exit
PB: predicated region body
PF: predicated region fallthrough
CT: control target
= control target key end

     0   :  { %vm7_vm0 = vcmask 64512   ;;  %s37_s8 = smov 8   ;;  %s38_s9 = smov 16   ;;  %vm13_vm1 = vcmask 261312   ;;  %vm19_vm2 = vcmask 195712   ;;  %vm25_vm3 = vcmask 130112   ;;  %s55_s0 = inlined_call_operand.vmem [shape: f32[4,8], index: 0, kind: input, shape index: {}]   ;;  %s56_s1 = inlined_call_operand.vmem [shape: f32[1,32], index: 1, kind: output, shape index: {}]  }
   0x1   :  { %v4_v0 = vld [vmem:[%s55_s0] sm:$0xf]  ;;  %s36_s0 = smov 24  }
   0x2   :  { %5 = vst [vmem:[#allocation1] sm:$0xf] %v4_v0 }
   0x9   :  { %v10_v1 = vld [vmem:[#allocation1 + $0x3] sm:$0x1]   ;;  %v22_v2 = vld [vmem:[#allocation1 + $0x1] sm:$0x1]   ;;  %v6_v3 = vld [vmem:[#allocation1] sm:$0x1]  }
   0xa   :  { %11 = vrot.lane.b32.xlu0 %v10_v1, %s36_s0  ;;  %23 = vrot.lane.b32.xlu1 %v22_v2, %s37_s8  ;;  %v16_v4 = vld [vmem:[#allocation1 + $0x2] sm:$0x1]   ;;  %8 = vst.msk [vmem:[#allocation0] sm:$0x1] %vm7_vm0, %v6_v3  }
   0xe   :  { %17 = vrot.lane.b32.xlu0 %v16_v4, %s38_s9 }
  0x7c   :  { %v12_v5 = vpop.permute.xlu0 %11   ;;  %v24_v6 = vpop.permute.xlu1 %23  }
  0x7d   :  { %14 = vst.msk [vmem:[#allocation0] sm:$0x1] %vm13_vm1, %v12_v5  }
  0x80   :  { %v18_v7 = vpop.permute.xlu0 %17  }
  0x81   :  { %20 = vst.msk [vmem:[#allocation0] sm:$0x1] %vm19_vm2, %v18_v7  }
  0x82   :  { %26 = vst.msk [vmem:[#allocation0] sm:$0x1] %vm25_vm3, %v24_v6  }
  0x89   :  { %v30_v8 = vld [vmem:[#allocation0] sm:$0x1] }
  0x8a   :  { %32 = vst [vmem:[%s56_s1] sm:$0x1] %v30_v8 }

// kernel: tile.114
= control target key start
LH: loop header
LB: loop body
LE: loop exit
PB: predicated region body
PF: predicated region fallthrough
CT: control target
= control target key end

     0   :  { %vm7_vm0 = vcmask 64512   ;;  %s37_s8 = smov 8   ;;  %s38_s9 = smov 16   ;;  %vm13_vm1 = vcmask 261312   ;;  %vm19_vm2 = vcmask 195712   ;;  %vm25_vm3 = vcmask 130112   ;;  %s55_s0 = inlined_call_operand.vmem [shape: f32[4,8], index: 0, kind: input, shape index: {}]   ;;  %s56_s1 = inlined_call_operand.vmem [shape: f32[32], index: 1, kind: output, shape index: {}]  }
   0x1   :  { %v4_v0 = vld [vmem:[%s55_s0] sm:$0xf]  ;;  %s36_s0 = smov 24  }
   0x2   :  { %5 = vst [vmem:[#allocation1] sm:$0xf] %v4_v0 }
   0x9   :  { %v10_v1 = vld [vmem:[#allocation1 + $0x3] sm:$0x1]   ;;  %v22_v2 = vld [vmem:[#allocation1 + $0x1] sm:$0x1]   ;;  %v6_v3 = vld [vmem:[#allocation1] sm:$0x1]  }
   0xa   :  { %11 = vrot.lane.b32.xlu0 %v10_v1, %s36_s0  ;;  %23 = vrot.lane.b32.xlu1 %v22_v2, %s37_s8  ;;  %v16_v4 = vld [vmem:[#allocation1 + $0x2] sm:$0x1]   ;;  %8 = vst.msk [vmem:[#allocation0] sm:$0x1] %vm7_vm0, %v6_v3  }
   0xe   :  { %17 = vrot.lane.b32.xlu0 %v16_v4, %s38_s9 }
  0x7c   :  { %v12_v5 = vpop.permute.xlu0 %11   ;;  %v24_v6 = vpop.permute.xlu1 %23  }
  0x7d   :  { %14 = vst.msk [vmem:[#allocation0] sm:$0x1] %vm13_vm1, %v12_v5  }
  0x80   :  { %v18_v7 = vpop.permute.xlu0 %17  }
  0x81   :  { %20 = vst.msk [vmem:[#allocation0] sm:$0x1] %vm19_vm2, %v18_v7  }
  0x82   :  { %26 = vst.msk [vmem:[#allocation0] sm:$0x1] %vm25_vm3, %v24_v6  }
  0x89   :  { %v30_v8 = vld [vmem:[#allocation0] sm:$0x1] }
  0x8a   :  { %32 = vst [vmem:[%s56_s1] sm:$0x1] %v30_v8 }

// kernel: generator_forward.13
= control target key start
LH: loop header
LB: loop body
LE: loop exit
PB: predicated region body
PF: predicated region fallthrough
CT: control target
= control target key end

     0   :  { %v1471_v0 = vmov 0   ;;  %vm448_vm0 = vcmask 130048   ;;  %vm834_vm1 = vcmask 261120   ;;  %vm1229_vm2 = vcmask 1040384   ;;  %s2396_s1 = inlined_call_operand.vmem [shape: bf16[144,32], index: 1, kind: input, shape index: {}]   ;;  %s2397_s0 = inlined_call_operand.vmem [shape: bf16[512,144], index: 0, kind: input, shape index: {}]   ;;  %s2398_s2 = inlined_call_operand.vmem [shape: f32[1,32], index: 2, kind: input, shape index: {}]   ;;  %s2399_s3 = inlined_call_operand.vmem [shape: f32[512,32], index: 3, kind: output, shape index: {0}]   ;;  %s2400_s4 = inlined_call_operand.vmem [shape: f32[1,2,32], index: 4, kind: output, shape index: {1}]  }
   0x1   :  { %545 = vmatprep.subr.bf16.mxu0 %v1471_v0  ;;  %v1366_v1 = vld [vmem:[%s2396_s1] sm:$0xff]   ;;  %1347 = vmatprep.subr.bf16.mxu1 %v1471_v0  ;;  %v1367_v2 = vld [vmem:[%s2396_s1 + $0x8] sm:$0xff]   ;;  %v1368_v3 = vld [vmem:[%s2396_s1 + $0x10] sm:$0xff]   ;;  %vm1231_vm3 = vcmask 254976  }
   0x2   :  { %546 = vmatpush1.bf16.msra.mxu0 %v1366_v1  ;;  %1356 = vmatpush1.bf16.msra.mxu1 %v1366_v1  ;;  %v1369_v4 = vld [vmem:[%s2396_s1 + $0x18] sm:$0xff]   ;;  %v1377_v5 = vld [vmem:[%s2397_s0 + $0x4] ss:$8 sps:$4 sm:$0xff]   ;;  %v1372_v9 = vld [vmem:[%s2396_s1 + $0x30] sm:$0xff]  }
   0x3   :  { %547 = vmatprep.subr.bf16.mxu0 %v1471_v0  ;;  %1348 = vmatprep.subr.bf16.mxu1 %v1471_v0  ;;  %v1370_v6 = vld [vmem:[%s2396_s1 + $0x20] sm:$0xff]   ;;  %v1371_v7 = vld [vmem:[%s2396_s1 + $0x28] sm:$0xff]   ;;  %v1373_v10 = vld [vmem:[%s2396_s1 + $0x38] sm:$0xff]  }
   0x4   :  { %1315 = vmatprep.mubr.msk.bf16.mxu0 %vm448_vm0, %v1377_v5  ;;  %v1401_v8 = vld [vmem:[%s2397_s0 + $0x104] ss:$8 sps:$4 sm:$0xff]   ;;  %v1375_v12 = vld [vmem:[%s2397_s0] ss:$8 sps:$4 sm:$0xff]   ;;  %v1378_v13 = vld [vmem:[%s2397_s0 + $0x14] ss:$8 sps:$4 sm:$0xff]  }
   0x5   :  { %1331 = vmatprep.mubr.msk.bf16.mxu1 %vm448_vm0, %v1401_v8  ;;  %v1374_v11 = vld [vmem:[%s2396_s1 + $0x40] sm:$0xff]   ;;  %v1405_v15 = vld [vmem:[%s2397_s0 + $0x114] ss:$8 sps:$4 sm:$0xff]   ;;  %v1380_v16 = vld [vmem:[%s2397_s0 + $0x10] ss:$8 sps:$4 sm:$0xff]  }
   0x6   :  { %548 = vmatpush1.bf16.msra.mxu0 %v1367_v2  ;;  %1357 = vmatpush1.bf16.msra.mxu1 %v1367_v2  ;;  %v1399_v14 = vld [vmem:[%s2397_s0 + $0x100] ss:$8 sps:$4 sm:$0xff]   ;;  %v1381_v17 = vld [vmem:[%s2397_s0 + $0x24] ss:$8 sps:$4 sm:$0xff]   ;;  %v1407_v18 = vld [vmem:[%s2397_s0 + $0x110] ss:$8 sps:$4 sm:$0xff]  }
   0x7   :  { %549 = vmatprep.subr.bf16.mxu0 %v1471_v0  ;;  %1349 = vmatprep.subr.bf16.mxu1 %v1471_v0  ;;  %v1411_v19 = vld [vmem:[%s2397_s0 + $0x124] ss:$8 sps:$4 sm:$0xff]   ;;  %v1383_v20 = vld [vmem:[%s2397_s0 + $0x20] ss:$8 sps:$4 sm:$0xff]   ;;  %v1384_v21 = vld [vmem:[%s2397_s0 + $0x34] ss:$8 sps:$4 sm:$0xff]  }
   0x8   :  { %v1413_v22 = vld [vmem:[%s2397_s0 + $0x120] ss:$8 sps:$4 sm:$0xff]   ;;  %v1417_v23 = vld [vmem:[%s2397_s0 + $0x134] ss:$8 sps:$4 sm:$0xff]   ;;  %v1386_v24 = vld [vmem:[%s2397_s0 + $0x30] ss:$8 sps:$4 sm:$0xff]  }
   0x9   :  { %v1419_v25 = vld [vmem:[%s2397_s0 + $0x130] ss:$8 sps:$4 sm:$0xff]   ;;  %v1387_v26 = vld [vmem:[%s2397_s0 + $0x44] ss:$8 sps:$4 sm:$0xff]   ;;  %v1389_v28 = vld [vmem:[%s2397_s0 + $0x40] ss:$8 sps:$4 sm:$0xff]  }
   0xa   :  { %550 = vmatpush1.bf16.msra.mxu0 %v1368_v3  ;;  %1358 = vmatpush1.bf16.msra.mxu1 %v1368_v3  ;;  %v1423_v27 = vld [vmem:[%s2397_s0 + $0x144] ss:$8 sps:$4 sm:$0xff]   ;;  %v1425_v29 = vld [vmem:[%s2397_s0 + $0x140] ss:$8 sps:$4 sm:$0xff]   ;;  %v1390_v30 = vld [vmem:[%s2397_s0 + $0x54] ss:$8 sps:$4 sm:$0xff]  }
   0xb   :  { %551 = vmatprep.subr.bf16.mxu0 %v1471_v0  ;;  %1350 = vmatprep.subr.bf16.mxu1 %v1471_v0  ;;  %v1429_v31 = vld [vmem:[%s2397_s0 + $0x154] ss:$8 sps:$4 sm:$0xff]   ;;  %v1392_v32 = vld [vmem:[%s2397_s0 + $0x50] ss:$8 sps:$4 sm:$0xff]   ;;  %v1393_v34 = vld [vmem:[%s2397_s0 + $0x64] ss:$8 sps:$4 sm:$0xff]  }
   0xc   :  { %v1431_v33 = vld [vmem:[%s2397_s0 + $0x150] ss:$8 sps:$4 sm:$0xff]   ;;  %v1435_v35 = vld [vmem:[%s2397_s0 + $0x164] ss:$8 sps:$4 sm:$0xff]   ;;  %v1395_v36 = vld [vmem:[%s2397_s0 + $0x60] ss:$8 sps:$4 sm:$0xff]  }
   0xd   :  { %v1437_v37 = vld [vmem:[%s2397_s0 + $0x160] ss:$8 sps:$4 sm:$0xff]   ;;  %v1396_v38 = vld [vmem:[%s2397_s0 + $0x74] ss:$8 sps:$4 sm:$0xff]   ;;  %v1398_v40 = vld [vmem:[%s2397_s0 + $0x70] ss:$8 sps:$4 sm:$0xff]  }
   0xe   :  { %552 = vmatpush1.bf16.msra.mxu0 %v1369_v4  ;;  %1359 = vmatpush1.bf16.msra.mxu1 %v1369_v4  ;;  %v1441_v39 = vld [vmem:[%s2397_s0 + $0x174] ss:$8 sps:$4 sm:$0xff]   ;;  %v1443_v41 = vld [vmem:[%s2397_s0 + $0x170] ss:$8 sps:$4 sm:$0xff]   ;;  %v1402_v42 = vld [vmem:[%s2397_s0 + $0x84] ss:$8 sps:$4 sm:$0xff]  }
   0xf   :  { %553 = vmatprep.subr.bf16.mxu0 %v1471_v0  ;;  %1351 = vmatprep.subr.bf16.mxu1 %v1471_v0  ;;  %v1447_v43 = vld [vmem:[%s2397_s0 + $0x184] ss:$8 sps:$4 sm:$0xff]   ;;  %v1404_v44 = vld [vmem:[%s2397_s0 + $0x80] ss:$8 sps:$4 sm:$0xff]   ;;  %v1408_v46 = vld [vmem:[%s2397_s0 + $0x94] ss:$8 sps:$4 sm:$0xff]  }
  0x10   :  { %v1449_v45 = vld [vmem:[%s2397_s0 + $0x180] ss:$8 sps:$4 sm:$0xff]   ;;  %v1450_v47 = vld [vmem:[%s2397_s0 + $0x194] ss:$8 sps:$4 sm:$0xff]   ;;  %v1410_v48 = vld [vmem:[%s2397_s0 + $0x90] ss:$8 sps:$4 sm:$0xff]  }
  0x11   :  { %v1452_v49 = vld [vmem:[%s2397_s0 + $0x190] ss:$8 sps:$4 sm:$0xff]   ;;  %v1414_v50 = vld [vmem:[%s2397_s0 + $0xa4] ss:$8 sps:$4 sm:$0xff]   ;;  %v1416_v52 = vld [vmem:[%s2397_s0 + $0xa0] ss:$8 sps:$4 sm:$0xff]  }
  0x12   :  { %554 = vmatpush1.bf16.msra.mxu0 %v1370_v6  ;;  %1360 = vmatpush1.bf16.msra.mxu1 %v1370_v6  ;;  %v1453_v51 = vld [vmem:[%s2397_s0 + $0x1a4] ss:$8 sps:$4 sm:$0xff]   ;;  %v1455_v53 = vld [vmem:[%s2397_s0 + $0x1a0] ss:$8 sps:$4 sm:$0xff]   ;;  %v1420_v54 = vld [vmem:[%s2397_s0 + $0xb4] ss:$8 sps:$4 sm:$0xff]  }
  0x13   :  { %555 = vmatprep.subr.bf16.mxu0 %v1471_v0  ;;  %1352 = vmatprep.subr.bf16.mxu1 %v1471_v0  ;;  %v1456_v55 = vld [vmem:[%s2397_s0 + $0x1b4] ss:$8 sps:$4 sm:$0xff]   ;;  %v1422_v56 = vld [vmem:[%s2397_s0 + $0xb0] ss:$8 sps:$4 sm:$0xff]   ;;  %v1426_v58 = vld [vmem:[%s2397_s0 + $0xc4] ss:$8 sps:$4 sm:$0xff]  }
  0x14   :  { %v1458_v57 = vld [vmem:[%s2397_s0 + $0x1b0] ss:$8 sps:$4 sm:$0xff]   ;;  %v1459_v59 = vld [vmem:[%s2397_s0 + $0x1c4] ss:$8 sps:$4 sm:$0xff]   ;;  %v1428_v60 = vld [vmem:[%s2397_s0 + $0xc0] ss:$8 sps:$4 sm:$0xff]  }
  0x15   :  { %v1461_v61 = vld [vmem:[%s2397_s0 + $0x1c0] ss:$8 sps:$4 sm:$0xff]   ;;  %v1432_v62 = vld [vmem:[%s2397_s0 + $0xd4] ss:$8 sps:$4 sm:$0xff]   ;;  %v1464_v1 = vld [vmem:[%s2397_s0 + $0x1d0] ss:$8 sps:$4 sm:$0xff]  }
  0x16   :  { %556 = vmatpush1.bf16.msra.mxu0 %v1371_v7  ;;  %1361 = vmatpush1.bf16.msra.mxu1 %v1371_v7  ;;  %v1462_v63 = vld [vmem:[%s2397_s0 + $0x1d4] ss:$8 sps:$4 sm:$0xff]   ;;  %v1438_v2 = vld [vmem:[%s2397_s0 + $0xe4] ss:$8 sps:$4 sm:$0xff]   ;;  %v1440_v4 = vld [vmem:[%s2397_s0 + $0xe0] ss:$8 sps:$4 sm:$0xff]  }
  0x17   :  { %557 = vmatprep.subr.bf16.mxu0 %v1471_v0  ;;  %1353 = vmatprep.subr.bf16.mxu1 %v1471_v0  ;;  %v1465_v3 = vld [vmem:[%s2397_s0 + $0x1e4] ss:$8 sps:$4 sm:$0xff]   ;;  %v1467_v5 = vld [vmem:[%s2397_s0 + $0x1e0] ss:$8 sps:$4 sm:$0xff]   ;;  %v1444_v6 = vld [vmem:[%s2397_s0 + $0xf4] ss:$8 sps:$4 sm:$0xff]  }
  0x18   :  { %v1468_v7 = vld [vmem:[%s2397_s0 + $0x1f4] ss:$8 sps:$4 sm:$0xff]   ;;  %v1446_v8 = vld [vmem:[%s2397_s0 + $0xf0] ss:$8 sps:$4 sm:$0xff]  }
  0x1a   :  { %558 = vmatpush1.bf16.msra.mxu0 %v1372_v9  ;;  %1362 = vmatpush1.bf16.msra.mxu1 %v1372_v9  ;;  %v1470_v9 = vld [vmem:[%s2397_s0 + $0x1f0] ss:$8 sps:$4 sm:$0xff]  }
  0x1b   :  { %559 = vmatprep.subr.bf16.mxu0 %v1471_v0  ;;  %1354 = vmatprep.subr.bf16.mxu1 %v1471_v0 }
  0x1e   :  { %560 = vmatpush1.bf16.msra.mxu0 %v1373_v10  ;;  %1363 = vmatpush1.bf16.msra.mxu1 %v1373_v10  ;;  %v1751_v10 = vld [vmem:[%s2398_s2] ss:$0 sm:$0xff] }
  0x1f   :  { %561 = vmatprep.subr.bf16.mxu0 %v1471_v0  ;;  %1355 = vmatprep.subr.bf16.mxu1 %v1471_v0  ;;  %v1434_v0 = vld [vmem:[%s2397_s0 + $0xd0] ss:$8 sps:$4 sm:$0xff]  }
  0x22   :  { %562 = vmatpush1.bf16.msra.mxu0 %v1374_v11  ;;  %1364 = vmatpush1.bf16.msra.mxu1 %v1374_v11 }
  0x25   :  { %578 = vmatmul.mubr.bf16.vlgmr.msra.gmra.mrb[0].mxu0 %v1375_v12  ;;  %706 = vmatmul.mubr.bf16.vlgmr.msra.gmra.mrb[0].mxu1 %v1399_v14 }
  0x26   :  { %1316 = vmatprep.mubr.msk.bf16.mxu0 %vm448_vm0, %v1378_v13  ;;  %1332 = vmatprep.mubr.msk.bf16.mxu1 %vm448_vm0, %v1405_v15 }
  0x2d   :  { %586 = vmatmul.mubr.bf16.gmra.mrb[4].mxu0 %v1380_v16  ;;  %714 = vmatmul.mubr.bf16.gmra.mrb[4].mxu1 %v1407_v18 }
  0x2e   :  { %1317 = vmatprep.mubr.msk.bf16.mxu0 %vm448_vm0, %v1381_v17  ;;  %1333 = vmatprep.mubr.msk.bf16.mxu1 %vm448_vm0, %v1411_v19 }
  0x35   :  { %594 = vmatmul.mubr.bf16.gmra.mrb[8].mxu0 %v1383_v20  ;;  %722 = vmatmul.mubr.bf16.gmra.mrb[8].mxu1 %v1413_v22 }
  0x36   :  { %1318 = vmatprep.mubr.msk.bf16.mxu0 %vm448_vm0, %v1384_v21  ;;  %1334 = vmatprep.mubr.msk.bf16.mxu1 %vm448_vm0, %v1417_v23 }
  0x3d   :  { %602 = vmatmul.mubr.bf16.gmra.mrb[12].mxu0 %v1386_v24  ;;  %730 = vmatmul.mubr.bf16.gmra.mrb[12].mxu1 %v1419_v25 }
  0x3e   :  { %1319 = vmatprep.mubr.msk.bf16.mxu0 %vm448_vm0, %v1387_v26  ;;  %1335 = vmatprep.mubr.msk.bf16.mxu1 %vm448_vm0, %v1423_v27 }
  0x45   :  { %610 = vmatmul.mubr.bf16.gmra.mrb[16].mxu0 %v1389_v28  ;;  %738 = vmatmul.mubr.bf16.gmra.mrb[16].mxu1 %v1425_v29 }
  0x46   :  { %1320 = vmatprep.mubr.msk.bf16.mxu0 %vm448_vm0, %v1390_v30  ;;  %1336 = vmatprep.mubr.msk.bf16.mxu1 %vm448_vm0, %v1429_v31 }
  0x4d   :  { %618 = vmatmul.mubr.bf16.gmra.mrb[20].mxu0 %v1392_v32  ;;  %746 = vmatmul.mubr.bf16.gmra.mrb[20].mxu1 %v1431_v33 }
  0x4e   :  { %1321 = vmatprep.mubr.msk.bf16.mxu0 %vm448_vm0, %v1393_v34  ;;  %1337 = vmatprep.mubr.msk.bf16.mxu1 %vm448_vm0, %v1435_v35 }
  0x55   :  { %626 = vmatmul.mubr.bf16.gmra.mrb[24].mxu0 %v1395_v36  ;;  %754 = vmatmul.mubr.bf16.gmra.mrb[24].mxu1 %v1437_v37 }
  0x56   :  { %1322 = vmatprep.mubr.msk.bf16.mxu0 %vm448_vm0, %v1396_v38  ;;  %1338 = vmatprep.mubr.msk.bf16.mxu1 %vm448_vm0, %v1441_v39 }
  0x5d   :  { %634 = vmatmul.mubr.bf16.gmra.mrb[28].mxu0 %v1398_v40  ;;  %762 = vmatmul.mubr.bf16.gmra.mrb[28].mxu1 %v1443_v41 }
  0x5e   :  { %1323 = vmatprep.mubr.msk.bf16.mxu0 %vm448_vm0, %v1402_v42  ;;  %1339 = vmatprep.mubr.msk.bf16.mxu1 %vm448_vm0, %v1447_v43 }
  0x65   :  { %642 = vmatmul.mubr.bf16.gmra.mrb[32].mxu0 %v1404_v44  ;;  %770 = vmatmul.mubr.bf16.gmra.mrb[32].mxu1 %v1449_v45 }
  0x66   :  { %1324 = vmatprep.mubr.msk.bf16.mxu0 %vm448_vm0, %v1408_v46  ;;  %1340 = vmatprep.mubr.msk.bf16.mxu1 %vm448_vm0, %v1450_v47 }
  0x6d   :  { %650 = vmatmul.mubr.bf16.gmra.mrb[36].mxu0 %v1410_v48  ;;  %778 = vmatmul.mubr.bf16.gmra.mrb[36].mxu1 %v1452_v49 }
  0x6e   :  { %1325 = vmatprep.mubr.msk.bf16.mxu0 %vm448_vm0, %v1414_v50  ;;  %1341 = vmatprep.mubr.msk.bf16.mxu1 %vm448_vm0, %v1453_v51 }
  0x75   :  { %658 = vmatmul.mubr.bf16.gmra.mrb[40].mxu0 %v1416_v52  ;;  %786 = vmatmul.mubr.bf16.gmra.mrb[40].mxu1 %v1455_v53 }
  0x76   :  { %1326 = vmatprep.mubr.msk.bf16.mxu0 %vm448_vm0, %v1420_v54  ;;  %1342 = vmatprep.mubr.msk.bf16.mxu1 %vm448_vm0, %v1456_v55 }
  0x7d   :  { %666 = vmatmul.mubr.bf16.gmra.mrb[44].mxu0 %v1422_v56  ;;  %794 = vmatmul.mubr.bf16.gmra.mrb[44].mxu1 %v1458_v57 }
  0x7e   :  { %1327 = vmatprep.mubr.msk.bf16.mxu0 %vm448_vm0, %v1426_v58  ;;  %1343 = vmatprep.mubr.msk.bf16.mxu1 %vm448_vm0, %v1459_v59 }
  0x85   :  { %674 = vmatmul.mubr.bf16.gmra.mrb[48].mxu0 %v1428_v60  ;;  %802 = vmatmul.mubr.bf16.gmra.mrb[48].mxu1 %v1461_v61 }
  0x86   :  { %1328 = vmatprep.mubr.msk.bf16.mxu0 %vm448_vm0, %v1432_v62  ;;  %1344 = vmatprep.mubr.msk.bf16.mxu1 %vm448_vm0, %v1462_v63 }
  0x8d   :  { %682 = vmatmul.mubr.bf16.gmra.mrb[52].mxu0 %v1434_v0  ;;  %810 = vmatmul.mubr.bf16.gmra.mrb[52].mxu1 %v1464_v1 }
  0x8e   :  { %1329 = vmatprep.mubr.msk.bf16.mxu0 %vm448_vm0, %v1438_v2  ;;  %1345 = vmatprep.mubr.msk.bf16.mxu1 %vm448_vm0, %v1465_v3 }
  0x95   :  { %690 = vmatmul.mubr.bf16.gmra.mrb[56].mxu0 %v1440_v4  ;;  %818 = vmatmul.mubr.bf16.gmra.mrb[56].mxu1 %v1467_v5 }
  0x96   :  { %1330 = vmatprep.mubr.msk.bf16.mxu0 %vm448_vm0, %v1444_v6  ;;  %1346 = vmatprep.mubr.msk.bf16.mxu1 %vm448_vm0, %v1468_v7 }
  0x9d   :  { %698 = vmatmul.mubr.bf16.gmra.mrb[60].mxu0 %v1446_v8  ;;  %826 = vmatmul.mubr.bf16.gmra.mrb[60].mxu1 %v1470_v9 }
  0xf8   :  { %v579_v11 = vpop.f32.mrb[0].mxu0  ;;  %v707_v12 = vpop.f32.mrb[0].mxu1 }
  0xf9   :  { %v580_v13 = vadd.f32 %v1751_v10, %v579_v11  ;;  %v581_v14 = vpop.f32.mrb[1].mxu0  ;;  %v1755_v15 = vadd.f32 %v1751_v10, %v707_v12  ;;  %v709_v16 = vpop.f32.mrb[1].mxu1 }
  0xfa   :  { %v582_v17 = vpop.f32.mrb[2].mxu0  ;;  %v710_v18 = vpop.f32.mrb[2].mxu1 }
  0xfb   :  { %835 = vst.msk [vmem:[%s2399_s3] sm:$0xff] %vm834_vm1, %v580_v13  ;;  %v1032_v19 = vmul.f32 %v580_v13, %v580_v13  ;;  %v583_v20 = vadd.f32 %v1751_v10, %v582_v17  ;;  %v584_v21 = vpop.f32.mrb[3].mxu0  ;;  %867 = vst.msk [vmem:[%s2399_s3 + $0x100] sm:$0xff] %vm834_vm1, %v1755_v15  ;;  %v712_v22 = vpop.f32.mrb[3].mxu1  ;;  %v1768_v23 = vadd.f32 %v1751_v10, %v710_v18  ;;  %v899_v24 = vsel %vm834_vm1, %v580_v13, 0.0 }
  0xfd   :  { %836 = vst.msk [vmem:[%s2399_s3 + $0x8] sm:$0xff] %vm834_vm1, %v583_v20  ;;  %v900_v25 = vsel %vm834_vm1, %v583_v20, 0.0  ;;  %v1033_v26 = vmul.f32 %v583_v20, %v583_v20  ;;  %868 = vst.msk [vmem:[%s2399_s3 + $0x108] sm:$0xff] %vm834_vm1, %v1768_v23  ;;  %v1096_v28 = vsel %vm834_vm1, %v1032_v19, 0.0 }
  0xfe   :  { %v901_v27 = vadd.f32 %v900_v25, %v899_v24 }
  0xff   :  { %v1097_v29 = vsel %vm834_vm1, %v1033_v26, 0.0 }
 0x100   :  { %v1098_v30 = vadd.f32 %v1097_v29, %v1096_v28  ;;  %v587_v31 = vpop.f32.mrb[4].mxu0  ;;  %v715_v32 = vpop.f32.mrb[4].mxu1 }
 0x101   :  { %v588_v33 = vadd.f32 %v1751_v10, %v587_v31  ;;  %v589_v34 = vpop.f32.mrb[5].mxu0  ;;  %v1785_v35 = vadd.f32 %v1751_v10, %v715_v32  ;;  %v717_v36 = vpop.f32.mrb[5].mxu1 }
 0x102   :  { %v590_v37 = vpop.f32.mrb[6].mxu0  ;;  %v718_v38 = vpop.f32.mrb[6].mxu1 }
 0x103   :  { %837 = vst.msk [vmem:[%s2399_s3 + $0x10] sm:$0xff] %vm834_vm1, %v588_v33  ;;  %v902_v39 = vsel %vm834_vm1, %v588_v33, 0.0  ;;  %v1034_v40 = vmul.f32 %v588_v33, %v588_v33  ;;  %v591_v41 = vadd.f32 %v1751_v10, %v590_v37  ;;  %v592_v42 = vpop.f32.mrb[7].mxu0  ;;  %869 = vst.msk [vmem:[%s2399_s3 + $0x110] sm:$0xff] %vm834_vm1, %v1785_v35  ;;  %v720_v43 = vpop.f32.mrb[7].mxu1  ;;  %v1799_v45 = vadd.f32 %v1751_v10, %v718_v38 }
 0x104   :  { %v903_v44 = vadd.f32 %v902_v39, %v901_v27 }
 0x105   :  { %v1099_v46 = vsel %vm834_vm1, %v1034_v40, 0.0  ;;  %838 = vst.msk [vmem:[%s2399_s3 + $0x18] sm:$0xff] %vm834_vm1, %v591_v41  ;;  %v904_v47 = vsel %vm834_vm1, %v591_v41, 0.0  ;;  %v1035_v48 = vmul.f32 %v591_v41, %v591_v41  ;;  %870 = vst.msk [vmem:[%s2399_s3 + $0x118] sm:$0xff] %vm834_vm1, %v1799_v45 }
 0x106   :  { %v1100_v49 = vadd.f32 %v1099_v46, %v1098_v30  ;;  %v905_v50 = vadd.f32 %v904_v47, %v903_v44 }
 0x107   :  { %v1101_v51 = vsel %vm834_vm1, %v1035_v48, 0.0 }
 0x108   :  { %v1102_v52 = vadd.f32 %v1101_v51, %v1100_v49  ;;  %v595_v53 = vpop.f32.mrb[8].mxu0  ;;  %v723_v54 = vpop.f32.mrb[8].mxu1 }
 0x109   :  { %v596_v55 = vadd.f32 %v1751_v10, %v595_v53  ;;  %v597_v56 = vpop.f32.mrb[9].mxu0  ;;  %v1815_v57 = vadd.f32 %v1751_v10, %v723_v54  ;;  %v725_v58 = vpop.f32.mrb[9].mxu1 }
 0x10a   :  { %v598_v59 = vpop.f32.mrb[10].mxu0  ;;  %v726_v60 = vpop.f32.mrb[10].mxu1 }
 0x10b   :  { %839 = vst.msk [vmem:[%s2399_s3 + $0x20] sm:$0xff] %vm834_vm1, %v596_v55  ;;  %v906_v61 = vsel %vm834_vm1, %v596_v55, 0.0  ;;  %v1036_v62 = vmul.f32 %v596_v55, %v596_v55  ;;  %v599_v63 = vadd.f32 %v1751_v10, %v598_v59  ;;  %v600_v0 = vpop.f32.mrb[11].mxu0  ;;  %871 = vst.msk [vmem:[%s2399_s3 + $0x120] sm:$0xff] %vm834_vm1, %v1815_v57  ;;  %v728_v1 = vpop.f32.mrb[11].mxu1  ;;  %v1829_v3 = vadd.f32 %v1751_v10, %v726_v60 }
 0x10c   :  { %v907_v2 = vadd.f32 %v906_v61, %v905_v50 }
 0x10d   :  { %v1103_v4 = vsel %vm834_vm1, %v1036_v62, 0.0  ;;  %840 = vst.msk [vmem:[%s2399_s3 + $0x28] sm:$0xff] %vm834_vm1, %v599_v63  ;;  %v908_v5 = vsel %vm834_vm1, %v599_v63, 0.0  ;;  %v1037_v6 = vmul.f32 %v599_v63, %v599_v63  ;;  %872 = vst.msk [vmem:[%s2399_s3 + $0x128] sm:$0xff] %vm834_vm1, %v1829_v3 }
 0x10e   :  { %v1104_v7 = vadd.f32 %v1103_v4, %v1102_v52  ;;  %v909_v8 = vadd.f32 %v908_v5, %v907_v2 }
 0x10f   :  { %v1105_v9 = vsel %vm834_vm1, %v1037_v6, 0.0 }
 0x110   :  { %v1106_v11 = vadd.f32 %v1105_v9, %v1104_v7  ;;  %v603_v12 = vpop.f32.mrb[12].mxu0  ;;  %v731_v13 = vpop.f32.mrb[12].mxu1 }
 0x111   :  { %v604_v14 = vadd.f32 %v1751_v10, %v603_v12  ;;  %v605_v16 = vpop.f32.mrb[13].mxu0  ;;  %v1845_v17 = vadd.f32 %v1751_v10, %v731_v13  ;;  %v733_v18 = vpop.f32.mrb[13].mxu1 }
 0x112   :  { %v606_v19 = vpop.f32.mrb[14].mxu0  ;;  %v734_v20 = vpop.f32.mrb[14].mxu1 }
 0x113   :  { %841 = vst.msk [vmem:[%s2399_s3 + $0x30] sm:$0xff] %vm834_vm1, %v604_v14  ;;  %v910_v21 = vsel %vm834_vm1, %v604_v14, 0.0  ;;  %v1038_v22 = vmul.f32 %v604_v14, %v604_v14  ;;  %v607_v24 = vadd.f32 %v1751_v10, %v606_v19  ;;  %v608_v25 = vpop.f32.mrb[15].mxu0  ;;  %873 = vst.msk [vmem:[%s2399_s3 + $0x130] sm:$0xff] %vm834_vm1, %v1845_v17  ;;  %v736_v26 = vpop.f32.mrb[15].mxu1  ;;  %v1859_v28 = vadd.f32 %v1751_v10, %v734_v20 }
 0x114   :  { %v911_v27 = vadd.f32 %v910_v21, %v909_v8 }
 0x115   :  { %v1107_v29 = vsel %vm834_vm1, %v1038_v22, 0.0  ;;  %842 = vst.msk [vmem:[%s2399_s3 + $0x38] sm:$0xff] %vm834_vm1, %v607_v24  ;;  %v912_v30 = vsel %vm834_vm1, %v607_v24, 0.0  ;;  %v1039_v31 = vmul.f32 %v607_v24, %v607_v24  ;;  %874 = vst.msk [vmem:[%s2399_s3 + $0x138] sm:$0xff] %vm834_vm1, %v1859_v28 }
 0x116   :  { %v1108_v32 = vadd.f32 %v1107_v29, %v1106_v11  ;;  %v913_v33 = vadd.f32 %v912_v30, %v911_v27 }
 0x117   :  { %v1109_v34 = vsel %vm834_vm1, %v1039_v31, 0.0 }
 0x118   :  { %v1110_v36 = vadd.f32 %v1109_v34, %v1108_v32  ;;  %v611_v37 = vpop.f32.mrb[16].mxu0  ;;  %v739_v38 = vpop.f32.mrb[16].mxu1 }
 0x119   :  { %v612_v39 = vadd.f32 %v1751_v10, %v611_v37  ;;  %v613_v40 = vpop.f32.mrb[17].mxu0  ;;  %v1875_v41 = vadd.f32 %v1751_v10, %v739_v38  ;;  %v741_v42 = vpop.f32.mrb[17].mxu1 }
 0x11a   :  { %v614_v43 = vpop.f32.mrb[18].mxu0  ;;  %v742_v44 = vpop.f32.mrb[18].mxu1 }
 0x11b   :  { %843 = vst.msk [vmem:[%s2399_s3 + $0x40] sm:$0xff] %vm834_vm1, %v612_v39  ;;  %v914_v46 = vsel %vm834_vm1, %v612_v39, 0.0  ;;  %v1040_v47 = vmul.f32 %v612_v39, %v612_v39  ;;  %v615_v48 = vadd.f32 %v1751_v10, %v614_v43  ;;  %v616_v49 = vpop.f32.mrb[19].mxu0  ;;  %875 = vst.msk [vmem:[%s2399_s3 + $0x140] sm:$0xff] %vm834_vm1, %v1875_v41  ;;  %v744_v50 = vpop.f32.mrb[19].mxu1  ;;  %v1889_v52 = vadd.f32 %v1751_v10, %v742_v44 }
 0x11c   :  { %v915_v51 = vadd.f32 %v914_v46, %v913_v33 }
 0x11d   :  { %v1111_v53 = vsel %vm834_vm1, %v1040_v47, 0.0  ;;  %844 = vst.msk [vmem:[%s2399_s3 + $0x48] sm:$0xff] %vm834_vm1, %v615_v48  ;;  %v916_v54 = vsel %vm834_vm1, %v615_v48, 0.0  ;;  %v1041_v55 = vmul.f32 %v615_v48, %v615_v48  ;;  %876 = vst.msk [vmem:[%s2399_s3 + $0x148] sm:$0xff] %vm834_vm1, %v1889_v52 }
 0x11e   :  { %v1112_v56 = vadd.f32 %v1111_v53, %v1110_v36  ;;  %v917_v58 = vadd.f32 %v916_v54, %v915_v51 }
 0x11f   :  { %v1113_v59 = vsel %vm834_vm1, %v1041_v55, 0.0 }
 0x120   :  { %v1114_v60 = vadd.f32 %v1113_v59, %v1112_v56  ;;  %v619_v61 = vpop.f32.mrb[20].mxu0  ;;  %v747_v62 = vpop.f32.mrb[20].mxu1 }
 0x121   :  { %v620_v63 = vadd.f32 %v1751_v10, %v619_v61  ;;  %v621_v0 = vpop.f32.mrb[21].mxu0  ;;  %v1905_v1 = vadd.f32 %v1751_v10, %v747_v62  ;;  %v749_v2 = vpop.f32.mrb[21].mxu1 }
 0x122   :  { %v622_v4 = vpop.f32.mrb[22].mxu0  ;;  %v750_v5 = vpop.f32.mrb[22].mxu1 }
 0x123   :  { %845 = vst.msk [vmem:[%s2399_s3 + $0x50] sm:$0xff] %vm834_vm1, %v620_v63  ;;  %v918_v6 = vsel %vm834_vm1, %v620_v63, 0.0  ;;  %v1042_v7 = vmul.f32 %v620_v63, %v620_v63  ;;  %v623_v8 = vadd.f32 %v1751_v10, %v622_v4  ;;  %v624_v9 = vpop.f32.mrb[23].mxu0  ;;  %877 = vst.msk [vmem:[%s2399_s3 + $0x150] sm:$0xff] %vm834_vm1, %v1905_v1  ;;  %v752_v11 = vpop.f32.mrb[23].mxu1  ;;  %v1919_v13 = vadd.f32 %v1751_v10, %v750_v5 }
 0x124   :  { %v919_v12 = vadd.f32 %v918_v6, %v917_v58 }
 0x125   :  { %v1115_v14 = vsel %vm834_vm1, %v1042_v7, 0.0  ;;  %846 = vst.msk [vmem:[%s2399_s3 + $0x58] sm:$0xff] %vm834_vm1, %v623_v8  ;;  %v920_v16 = vsel %vm834_vm1, %v623_v8, 0.0  ;;  %v1043_v18 = vmul.f32 %v623_v8, %v623_v8  ;;  %878 = vst.msk [vmem:[%s2399_s3 + $0x158] sm:$0xff] %vm834_vm1, %v1919_v13 }
 0x126   :  { %v1116_v19 = vadd.f32 %v1115_v14, %v1114_v60  ;;  %v921_v20 = vadd.f32 %v920_v16, %v919_v12 }
 0x127   :  { %v1117_v21 = vsel %vm834_vm1, %v1043_v18, 0.0 }
 0x128   :  { %v1118_v22 = vadd.f32 %v1117_v21, %v1116_v19  ;;  %v627_v24 = vpop.f32.mrb[24].mxu0  ;;  %v755_v25 = vpop.f32.mrb[24].mxu1 }
 0x129   :  { %v628_v26 = vadd.f32 %v1751_v10, %v627_v24  ;;  %v629_v27 = vpop.f32.mrb[25].mxu0  ;;  %v1935_v29 = vadd.f32 %v1751_v10, %v755_v25  ;;  %v757_v30 = vpop.f32.mrb[25].mxu1 }
 0x12a   :  { %v630_v31 = vpop.f32.mrb[26].mxu0  ;;  %v758_v32 = vpop.f32.mrb[26].mxu1 }
 0x12b   :  { %847 = vst.msk [vmem:[%s2399_s3 + $0x60] sm:$0xff] %vm834_vm1, %v628_v26  ;;  %v922_v33 = vsel %vm834_vm1, %v628_v26, 0.0  ;;  %v1044_v34 = vmul.f32 %v628_v26, %v628_v26  ;;  %v631_v36 = vadd.f32 %v1751_v10, %v630_v31  ;;  %v632_v37 = vpop.f32.mrb[27].mxu0  ;;  %879 = vst.msk [vmem:[%s2399_s3 + $0x160] sm:$0xff] %vm834_vm1, %v1935_v29  ;;  %v760_v38 = vpop.f32.mrb[27].mxu1  ;;  %v1949_v40 = vadd.f32 %v1751_v10, %v758_v32 }
 0x12c   :  { %v923_v39 = vadd.f32 %v922_v33, %v921_v20 }
 0x12d   :  { %v1119_v42 = vsel %vm834_vm1, %v1044_v34, 0.0  ;;  %848 = vst.msk [vmem:[%s2399_s3 + $0x68] sm:$0xff] %vm834_vm1, %v631_v36  ;;  %v924_v43 = vsel %vm834_vm1, %v631_v36, 0.0  ;;  %v1045_v44 = vmul.f32 %v631_v36, %v631_v36  ;;  %880 = vst.msk [vmem:[%s2399_s3 + $0x168] sm:$0xff] %vm834_vm1, %v1949_v40 }
 0x12e   :  { %v1120_v46 = vadd.f32 %v1119_v42, %v1118_v22  ;;  %v925_v47 = vadd.f32 %v924_v43, %v923_v39 }
 0x12f   :  { %v1121_v48 = vsel %vm834_vm1, %v1045_v44, 0.0 }
 0x130   :  { %v1122_v49 = vadd.f32 %v1121_v48, %v1120_v46  ;;  %v635_v50 = vpop.f32.mrb[28].mxu0  ;;  %v763_v51 = vpop.f32.mrb[28].mxu1 }
 0x131   :  { %v636_v53 = vadd.f32 %v1751_v10, %v635_v50  ;;  %v637_v54 = vpop.f32.mrb[29].mxu0  ;;  %v1965_v55 = vadd.f32 %v1751_v10, %v763_v51  ;;  %v765_v56 = vpop.f32.mrb[29].mxu1 }
 0x132   :  { %v638_v58 = vpop.f32.mrb[30].mxu0  ;;  %v766_v59 = vpop.f32.mrb[30].mxu1 }
 0x133   :  { %849 = vst.msk [vmem:[%s2399_s3 + $0x70] sm:$0xff] %vm834_vm1, %v636_v53  ;;  %v926_v60 = vsel %vm834_vm1, %v636_v53, 0.0  ;;  %v1046_v61 = vmul.f32 %v636_v53, %v636_v53  ;;  %v639_v62 = vadd.f32 %v1751_v10, %v638_v58  ;;  %v640_v63 = vpop.f32.mrb[31].mxu0  ;;  %881 = vst.msk [vmem:[%s2399_s3 + $0x170] sm:$0xff] %vm834_vm1, %v1965_v55  ;;  %v768_v0 = vpop.f32.mrb[31].mxu1  ;;  %v1979_v4 = vadd.f32 %v1751_v10, %v766_v59 }
 0x134   :  { %v927_v2 = vadd.f32 %v926_v60, %v925_v47 }
 0x135   :  { %v1123_v5 = vsel %vm834_vm1, %v1046_v61, 0.0  ;;  %850 = vst.msk [vmem:[%s2399_s3 + $0x78] sm:$0xff] %vm834_vm1, %v639_v62  ;;  %v928_v6 = vsel %vm834_vm1, %v639_v62, 0.0  ;;  %v1047_v7 = vmul.f32 %v639_v62, %v639_v62  ;;  %882 = vst.msk [vmem:[%s2399_s3 + $0x178] sm:$0xff] %vm834_vm1, %v1979_v4 }
 0x136   :  { %v1124_v8 = vadd.f32 %v1123_v5, %v1122_v49  ;;  %v929_v9 = vadd.f32 %v928_v6, %v927_v2 }
 0x137   :  { %v1125_v11 = vsel %vm834_vm1, %v1047_v7, 0.0 }
 0x138   :  { %v1126_v12 = vadd.f32 %v1125_v11, %v1124_v8  ;;  %v643_v14 = vpop.f32.mrb[32].mxu0  ;;  %v771_v16 = vpop.f32.mrb[32].mxu1 }
 0x139   :  { %v644_v18 = vadd.f32 %v1751_v10, %v643_v14  ;;  %v645_v19 = vpop.f32.mrb[33].mxu0  ;;  %v1995_v20 = vadd.f32 %v1751_v10, %v771_v16  ;;  %v773_v21 = vpop.f32.mrb[33].mxu1 }
 0x13a   :  { %v646_v22 = vpop.f32.mrb[34].mxu0  ;;  %v774_v24 = vpop.f32.mrb[34].mxu1 }
 0x13b   :  { %851 = vst.msk [vmem:[%s2399_s3 + $0x80] sm:$0xff] %vm834_vm1, %v644_v18  ;;  %v930_v25 = vsel %vm834_vm1, %v644_v18, 0.0  ;;  %v1048_v26 = vmul.f32 %v644_v18, %v644_v18  ;;  %v647_v27 = vadd.f32 %v1751_v10, %v646_v22  ;;  %v648_v30 = vpop.f32.mrb[35].mxu0  ;;  %883 = vst.msk [vmem:[%s2399_s3 + $0x180] sm:$0xff] %vm834_vm1, %v1995_v20  ;;  %v776_v31 = vpop.f32.mrb[35].mxu1  ;;  %v2009_v33 = vadd.f32 %v1751_v10, %v774_v24 }
 0x13c   :  { %v931_v32 = vadd.f32 %v930_v25, %v929_v9 }
 0x13d   :  { %v1127_v34 = vsel %vm834_vm1, %v1048_v26, 0.0  ;;  %852 = vst.msk [vmem:[%s2399_s3 + $0x88] sm:$0xff] %vm834_vm1, %v647_v27  ;;  %v932_v36 = vsel %vm834_vm1, %v647_v27, 0.0  ;;  %v1049_v37 = vmul.f32 %v647_v27, %v647_v27  ;;  %884 = vst.msk [vmem:[%s2399_s3 + $0x188] sm:$0xff] %vm834_vm1, %v2009_v33 }
 0x13e   :  { %v1128_v38 = vadd.f32 %v1127_v34, %v1126_v12  ;;  %v933_v39 = vadd.f32 %v932_v36, %v931_v32 }
 0x13f   :  { %v1129_v42 = vsel %vm834_vm1, %v1049_v37, 0.0 }
 0x140   :  { %v1130_v43 = vadd.f32 %v1129_v42, %v1128_v38  ;;  %v651_v44 = vpop.f32.mrb[36].mxu0  ;;  %v779_v46 = vpop.f32.mrb[36].mxu1 }
 0x141   :  { %v652_v47 = vadd.f32 %v1751_v10, %v651_v44  ;;  %v653_v48 = vpop.f32.mrb[37].mxu0  ;;  %v2025_v49 = vadd.f32 %v1751_v10, %v779_v46  ;;  %v781_v50 = vpop.f32.mrb[37].mxu1 }
 0x142   :  { %v654_v51 = vpop.f32.mrb[38].mxu0  ;;  %v782_v53 = vpop.f32.mrb[38].mxu1 }
 0x143   :  { %853 = vst.msk [vmem:[%s2399_s3 + $0x90] sm:$0xff] %vm834_vm1, %v652_v47  ;;  %v934_v54 = vsel %vm834_vm1, %v652_v47, 0.0  ;;  %v1050_v56 = vmul.f32 %v652_v47, %v652_v47  ;;  %v655_v58 = vadd.f32 %v1751_v10, %v654_v51  ;;  %v656_v59 = vpop.f32.mrb[39].mxu0  ;;  %885 = vst.msk [vmem:[%s2399_s3 + $0x190] sm:$0xff] %vm834_vm1, %v2025_v49  ;;  %v784_v60 = vpop.f32.mrb[39].mxu1  ;;  %v2039_v62 = vadd.f32 %v1751_v10, %v782_v53 }
 0x144   :  { %v935_v61 = vadd.f32 %v934_v54, %v933_v39 }
 0x145   :  { %v1131_v63 = vsel %vm834_vm1, %v1050_v56, 0.0  ;;  %854 = vst.msk [vmem:[%s2399_s3 + $0x98] sm:$0xff] %vm834_vm1, %v655_v58  ;;  %v936_v0 = vsel %vm834_vm1, %v655_v58, 0.0  ;;  %v1051_v2 = vmul.f32 %v655_v58, %v655_v58  ;;  %886 = vst.msk [vmem:[%s2399_s3 + $0x198] sm:$0xff] %vm834_vm1, %v2039_v62 }
 0x146   :  { %v1132_v5 = vadd.f32 %v1131_v63, %v1130_v43  ;;  %v937_v6 = vadd.f32 %v936_v0, %v935_v61 }
 0x147   :  { %v1133_v7 = vsel %vm834_vm1, %v1051_v2, 0.0 }
 0x148   :  { %v1134_v8 = vadd.f32 %v1133_v7, %v1132_v5  ;;  %v659_v9 = vpop.f32.mrb[40].mxu0  ;;  %v787_v11 = vpop.f32.mrb[40].mxu1 }
 0x149   :  { %v660_v12 = vadd.f32 %v1751_v10, %v659_v9  ;;  %v661_v14 = vpop.f32.mrb[41].mxu0  ;;  %v2055_v16 = vadd.f32 %v1751_v10, %v787_v11  ;;  %v789_v18 = vpop.f32.mrb[41].mxu1 }
 0x14a   :  { %v662_v19 = vpop.f32.mrb[42].mxu0  ;;  %v790_v21 = vpop.f32.mrb[42].mxu1 }
 0x14b   :  { %855 = vst.msk [vmem:[%s2399_s3 + $0xa0] sm:$0xff] %vm834_vm1, %v660_v12  ;;  %v938_v22 = vsel %vm834_vm1, %v660_v12, 0.0  ;;  %v1052_v24 = vmul.f32 %v660_v12, %v660_v12  ;;  %v663_v25 = vadd.f32 %v1751_v10, %v662_v19  ;;  %v664_v26 = vpop.f32.mrb[43].mxu0  ;;  %887 = vst.msk [vmem:[%s2399_s3 + $0x1a0] sm:$0xff] %vm834_vm1, %v2055_v16  ;;  %v792_v27 = vpop.f32.mrb[43].mxu1  ;;  %v2069_v31 = vadd.f32 %v1751_v10, %v790_v21 }
 0x14c   :  { %v939_v30 = vadd.f32 %v938_v22, %v937_v6 }
 0x14d   :  { %v1135_v32 = vsel %vm834_vm1, %v1052_v24, 0.0  ;;  %856 = vst.msk [vmem:[%s2399_s3 + $0xa8] sm:$0xff] %vm834_vm1, %v663_v25  ;;  %v940_v34 = vsel %vm834_vm1, %v663_v25, 0.0  ;;  %v1053_v36 = vmul.f32 %v663_v25, %v663_v25  ;;  %888 = vst.msk [vmem:[%s2399_s3 + $0x1a8] sm:$0xff] %vm834_vm1, %v2069_v31 }
 0x14e   :  { %v1136_v37 = vadd.f32 %v1135_v32, %v1134_v8  ;;  %v941_v38 = vadd.f32 %v940_v34, %v939_v30 }
 0x14f   :  { %v1137_v39 = vsel %vm834_vm1, %v1053_v36, 0.0 }
 0x150   :  { %v1138_v42 = vadd.f32 %v1137_v39, %v1136_v37  ;;  %v667_v43 = vpop.f32.mrb[44].mxu0  ;;  %v795_v44 = vpop.f32.mrb[44].mxu1 }
 0x151   :  { %v668_v46 = vadd.f32 %v1751_v10, %v667_v43  ;;  %v669_v47 = vpop.f32.mrb[45].mxu0  ;;  %v2085_v48 = vadd.f32 %v1751_v10, %v795_v44  ;;  %v797_v50 = vpop.f32.mrb[45].mxu1 }
 0x152   :  { %v670_v51 = vpop.f32.mrb[46].mxu0  ;;  %v798_v53 = vpop.f32.mrb[46].mxu1 }
 0x153   :  { %857 = vst.msk [vmem:[%s2399_s3 + $0xb0] sm:$0xff] %vm834_vm1, %v668_v46  ;;  %v942_v54 = vsel %vm834_vm1, %v668_v46, 0.0  ;;  %v1054_v56 = vmul.f32 %v668_v46, %v668_v46  ;;  %v671_v58 = vadd.f32 %v1751_v10, %v670_v51  ;;  %v672_v59 = vpop.f32.mrb[47].mxu0  ;;  %889 = vst.msk [vmem:[%s2399_s3 + $0x1b0] sm:$0xff] %vm834_vm1, %v2085_v48  ;;  %v800_v60 = vpop.f32.mrb[47].mxu1  ;;  %v2099_v63 = vadd.f32 %v1751_v10, %v798_v53 }
 0x154   :  { %v943_v61 = vadd.f32 %v942_v54, %v941_v38 }
 0x155   :  { %v1139_v0 = vsel %vm834_vm1, %v1054_v56, 0.0  ;;  %858 = vst.msk [vmem:[%s2399_s3 + $0xb8] sm:$0xff] %vm834_vm1, %v671_v58  ;;  %v944_v2 = vsel %vm834_vm1, %v671_v58, 0.0  ;;  %v1055_v5 = vmul.f32 %v671_v58, %v671_v58  ;;  %890 = vst.msk [vmem:[%s2399_s3 + $0x1b8] sm:$0xff] %vm834_vm1, %v2099_v63 }
 0x156   :  { %v1140_v6 = vadd.f32 %v1139_v0, %v1138_v42  ;;  %v945_v7 = vadd.f32 %v944_v2, %v943_v61 }
 0x157   :  { %v1141_v8 = vsel %vm834_vm1, %v1055_v5, 0.0 }
 0x158   :  { %v1142_v9 = vadd.f32 %v1141_v8, %v1140_v6  ;;  %v675_v11 = vpop.f32.mrb[48].mxu0  ;;  %v803_v12 = vpop.f32.mrb[48].mxu1 }
 0x159   :  { %v676_v14 = vadd.f32 %v1751_v10, %v675_v11  ;;  %v677_v18 = vpop.f32.mrb[49].mxu0  ;;  %v2115_v19 = vadd.f32 %v1751_v10, %v803_v12  ;;  %v805_v21 = vpop.f32.mrb[49].mxu1 }
 0x15a   :  { %v678_v22 = vpop.f32.mrb[50].mxu0  ;;  %v806_v24 = vpop.f32.mrb[50].mxu1 }
 0x15b   :  { %859 = vst.msk [vmem:[%s2399_s3 + $0xc0] sm:$0xff] %vm834_vm1, %v676_v14  ;;  %v946_v25 = vsel %vm834_vm1, %v676_v14, 0.0  ;;  %v1056_v26 = vmul.f32 %v676_v14, %v676_v14  ;;  %v679_v27 = vadd.f32 %v1751_v10, %v678_v22  ;;  %v680_v30 = vpop.f32.mrb[51].mxu0  ;;  %891 = vst.msk [vmem:[%s2399_s3 + $0x1c0] sm:$0xff] %vm834_vm1, %v2115_v19  ;;  %v808_v32 = vpop.f32.mrb[51].mxu1  ;;  %v2129_v36 = vadd.f32 %v1751_v10, %v806_v24 }
 0x15c   :  { %v947_v34 = vadd.f32 %v946_v25, %v945_v7 }
 0x15d   :  { %v1143_v37 = vsel %vm834_vm1, %v1056_v26, 0.0  ;;  %860 = vst.msk [vmem:[%s2399_s3 + $0xc8] sm:$0xff] %vm834_vm1, %v679_v27  ;;  %v948_v38 = vsel %vm834_vm1, %v679_v27, 0.0  ;;  %v1057_v39 = vmul.f32 %v679_v27, %v679_v27  ;;  %892 = vst.msk [vmem:[%s2399_s3 + $0x1c8] sm:$0xff] %vm834_vm1, %v2129_v36 }
 0x15e   :  { %v1144_v42 = vadd.f32 %v1143_v37, %v1142_v9  ;;  %v949_v43 = vadd.f32 %v948_v38, %v947_v34 }
 0x15f   :  { %v1145_v44 = vsel %vm834_vm1, %v1057_v39, 0.0 }
 0x160   :  { %v1146_v46 = vadd.f32 %v1145_v44, %v1144_v42  ;;  %v683_v47 = vpop.f32.mrb[52].mxu0  ;;  %v811_v50 = vpop.f32.mrb[52].mxu1 }
 0x161   :  { %v684_v51 = vadd.f32 %v1751_v10, %v683_v47  ;;  %v685_v53 = vpop.f32.mrb[53].mxu0  ;;  %v2145_v54 = vadd.f32 %v1751_v10, %v811_v50  ;;  %v813_v56 = vpop.f32.mrb[53].mxu1 }
 0x162   :  { %v686_v58 = vpop.f32.mrb[54].mxu0  ;;  %v814_v59 = vpop.f32.mrb[54].mxu1 }
 0x163   :  { %861 = vst.msk [vmem:[%s2399_s3 + $0xd0] sm:$0xff] %vm834_vm1, %v684_v51  ;;  %v950_v60 = vsel %vm834_vm1, %v684_v51, 0.0  ;;  %v1058_v61 = vmul.f32 %v684_v51, %v684_v51  ;;  %v687_v0 = vadd.f32 %v1751_v10, %v686_v58  ;;  %v688_v2 = vpop.f32.mrb[55].mxu0  ;;  %893 = vst.msk [vmem:[%s2399_s3 + $0x1d0] sm:$0xff] %vm834_vm1, %v2145_v54  ;;  %v816_v5 = vpop.f32.mrb[55].mxu1  ;;  %v2159_v7 = vadd.f32 %v1751_v10, %v814_v59 }
 0x164   :  { %v951_v6 = vadd.f32 %v950_v60, %v949_v43 }
 0x165   :  { %v1147_v8 = vsel %vm834_vm1, %v1058_v61, 0.0  ;;  %862 = vst.msk [vmem:[%s2399_s3 + $0xd8] sm:$0xff] %vm834_vm1, %v687_v0  ;;  %v952_v9 = vsel %vm834_vm1, %v687_v0, 0.0  ;;  %v1059_v11 = vmul.f32 %v687_v0, %v687_v0  ;;  %894 = vst.msk [vmem:[%s2399_s3 + $0x1d8] sm:$0xff] %vm834_vm1, %v2159_v7 }
 0x166   :  { %v1148_v12 = vadd.f32 %v1147_v8, %v1146_v46  ;;  %v953_v14 = vadd.f32 %v952_v9, %v951_v6 }
 0x167   :  { %v1149_v18 = vsel %vm834_vm1, %v1059_v11, 0.0 }
 0x168   :  { %v1150_v21 = vadd.f32 %v1149_v18, %v1148_v12  ;;  %v691_v22 = vpop.f32.mrb[56].mxu0  ;;  %v819_v24 = vpop.f32.mrb[56].mxu1 }
 0x169   :  { %v692_v25 = vadd.f32 %v1751_v10, %v691_v22  ;;  %v693_v26 = vpop.f32.mrb[57].mxu0  ;;  %v2175_v27 = vadd.f32 %v1751_v10, %v819_v24  ;;  %v821_v30 = vpop.f32.mrb[57].mxu1 }
 0x16a   :  { %v694_v32 = vpop.f32.mrb[58].mxu0  ;;  %v822_v34 = vpop.f32.mrb[58].mxu1 }
 0x16b   :  { %863 = vst.msk [vmem:[%s2399_s3 + $0xe0] sm:$0xff] %vm834_vm1, %v692_v25  ;;  %v954_v37 = vsel %vm834_vm1, %v692_v25, 0.0  ;;  %v1060_v38 = vmul.f32 %v692_v25, %v692_v25  ;;  %v695_v39 = vadd.f32 %v1751_v10, %v694_v32  ;;  %v696_v42 = vpop.f32.mrb[59].mxu0  ;;  %895 = vst.msk [vmem:[%s2399_s3 + $0x1e0] sm:$0xff] %vm834_vm1, %v2175_v27  ;;  %v824_v43 = vpop.f32.mrb[59].mxu1  ;;  %v2189_v46 = vadd.f32 %v1751_v10, %v822_v34 }
 0x16c   :  { %v955_v44 = vadd.f32 %v954_v37, %v953_v14  ;;  %v1064_v25 = vmul.f32 %v1755_v15, %v1755_v15 }
 0x16d   :  { %v1151_v47 = vsel %vm834_vm1, %v1060_v38, 0.0  ;;  %864 = vst.msk [vmem:[%s2399_s3 + $0xe8] sm:$0xff] %vm834_vm1, %v695_v39  ;;  %v956_v50 = vsel %vm834_vm1, %v695_v39, 0.0  ;;  %v1061_v51 = vmul.f32 %v695_v39, %v695_v39  ;;  %896 = vst.msk [vmem:[%s2399_s3 + $0x1e8] sm:$0xff] %vm834_vm1, %v2189_v46  ;;  %v1065_v38 = vmul.f32 %v1768_v23, %v1768_v23 }
 0x16e   :  { %v1152_v53 = vadd.f32 %v1151_v47, %v1150_v21  ;;  %v957_v56 = vadd.f32 %v956_v50, %v955_v44  ;;  %v1159_v44 = vsel %vm834_vm1, %v1064_v25, 0.0  ;;  %v964_v47 = vsel %vm834_vm1, %v1768_v23, 0.0 }
 0x16f   :  { %v1153_v58 = vsel %vm834_vm1, %v1061_v51, 0.0  ;;  %v1066_v50 = vmul.f32 %v1785_v35, %v1785_v35  ;;  %v968_v23 = vsel %vm834_vm1, %v1799_v45, 0.0 }
 0x170   :  { %v1154_v59 = vadd.f32 %v1153_v58, %v1152_v53  ;;  %v699_v60 = vpop.f32.mrb[60].mxu0  ;;  %v827_v61 = vpop.f32.mrb[60].mxu1  ;;  %v1067_v58 = vmul.f32 %v1799_v45, %v1799_v45  ;;  %v972_v45 = vsel %vm834_vm1, %v1829_v3, 0.0 }
 0x171   :  { %v700_v0 = vadd.f32 %v1751_v10, %v699_v60  ;;  %v701_v2 = vpop.f32.mrb[61].mxu0  ;;  %v2205_v5 = vadd.f32 %v1751_v10, %v827_v61  ;;  %v829_v6 = vpop.f32.mrb[61].mxu1  ;;  %v1163_v61 = vsel %vm834_vm1, %v1066_v50, 0.0  ;;  %v1074_v50 = vmul.f32 %v1905_v1, %v1905_v1 }
 0x172   :  { %v702_v8 = vpop.f32.mrb[62].mxu0  ;;  %v830_v9 = vpop.f32.mrb[62].mxu1 }
 0x173   :  { %865 = vst.msk [vmem:[%s2399_s3 + $0xf0] sm:$0xff] %vm834_vm1, %v700_v0  ;;  %v958_v11 = vsel %vm834_vm1, %v700_v0, 0.0  ;;  %v1062_v12 = vmul.f32 %v700_v0, %v700_v0  ;;  %v703_v14 = vadd.f32 %v1751_v10, %v702_v8  ;;  %v704_v18 = vpop.f32.mrb[63].mxu0  ;;  %897 = vst.msk [vmem:[%s2399_s3 + $0x1f0] sm:$0xff] %vm834_vm1, %v2205_v5  ;;  %v832_v21 = vpop.f32.mrb[63].mxu1  ;;  %v2219_v24 = vadd.f32 %v1751_v10, %v830_v9 }
 0x174   :  { %v959_v22 = vadd.f32 %v958_v11, %v957_v56  ;;  %v962_v10 = vsel %vm834_vm1, %v1755_v15, 0.0  ;;  %v1161_v56 = vsel %vm834_vm1, %v1065_v38, 0.0  ;;  %v966_v15 = vsel %vm834_vm1, %v1785_v35, 0.0 }
 0x175   :  { %v1155_v26 = vsel %vm834_vm1, %v1062_v12, 0.0  ;;  %866 = vst.msk [vmem:[%s2399_s3 + $0xf8] sm:$0xff] %vm834_vm1, %v703_v14  ;;  %v960_v30 = vsel %vm834_vm1, %v703_v14, 0.0  ;;  %v1063_v32 = vmul.f32 %v703_v14, %v703_v14  ;;  %898 = vst.msk [vmem:[%s2399_s3 + $0x1f8] sm:$0xff] %vm834_vm1, %v2219_v24  ;;  %v1068_v0 = vmul.f32 %v1815_v57, %v1815_v57 }
 0x176   :  { %v1156_v34 = vadd.f32 %v1155_v26, %v1154_v59  ;;  %v961_v37 = vadd.f32 %v960_v30, %v959_v22  ;;  %v1165_v8 = vsel %vm834_vm1, %v1067_v58, 0.0  ;;  %v970_v35 = vsel %vm834_vm1, %v1815_v57, 0.0 }
 0x177   :  { %v1157_v39 = vsel %vm834_vm1, %v1063_v32, 0.0  ;;  %v1069_v9 = vmul.f32 %v1829_v3, %v1829_v3  ;;  %v1167_v14 = vsel %vm834_vm1, %v1068_v0, 0.0  ;;  %v1070_v18 = vmul.f32 %v1845_v17, %v1845_v17 }
 0x178   :  { %v963_v42 = vadd.f32 %v962_v10, %v961_v37  ;;  %v1158_v43 = vadd.f32 %v1157_v39, %v1156_v34  ;;  %v974_v57 = vsel %vm834_vm1, %v1845_v17, 0.0  ;;  %v1071_v26 = vmul.f32 %v1859_v28, %v1859_v28 }
 0x179   :  { %v1169_v25 = vsel %vm834_vm1, %v1069_v9, 0.0  ;;  %v1171_v34 = vsel %vm834_vm1, %v1070_v18, 0.0  ;;  %v976_v3 = vsel %vm834_vm1, %v1859_v28, 0.0  ;;  %v1072_v37 = vmul.f32 %v1875_v41, %v1875_v41 }
 0x17a   :  { %v965_v51 = vadd.f32 %v964_v47, %v963_v42  ;;  %v1160_v53 = vadd.f32 %v1159_v44, %v1158_v43  ;;  %v1173_v39 = vsel %vm834_vm1, %v1071_v26, 0.0  ;;  %v978_v17 = vsel %vm834_vm1, %v1875_v41, 0.0 }
 0x17b   :  { %v1073_v42 = vmul.f32 %v1889_v52, %v1889_v52  ;;  %v1175_v47 = vsel %vm834_vm1, %v1072_v37, 0.0  ;;  %v980_v28 = vsel %vm834_vm1, %v1889_v52, 0.0  ;;  %v982_v41 = vsel %vm834_vm1, %v1905_v1, 0.0 }
 0x17c   :  { %v967_v59 = vadd.f32 %v966_v15, %v965_v51  ;;  %v1162_v60 = vadd.f32 %v1161_v56, %v1160_v53  ;;  %v1075_v15 = vmul.f32 %v1919_v13, %v1919_v13  ;;  %v984_v52 = vsel %vm834_vm1, %v1919_v13, 0.0 }
 0x17d   :  { %v1177_v56 = vsel %vm834_vm1, %v1073_v42, 0.0  ;;  %v986_v1 = vsel %vm834_vm1, %v1935_v29, 0.0  ;;  %v988_v13 = vsel %vm834_vm1, %v1949_v40, 0.0  ;;  %v1079_v18 = vmul.f32 %v1979_v4, %v1979_v4 }
 0x17e   :  { %v969_v2 = vadd.f32 %v968_v23, %v967_v59  ;;  %v1164_v6 = vadd.f32 %v1163_v61, %v1162_v60  ;;  %v1179_v60 = vsel %vm834_vm1, %v1074_v50, 0.0  ;;  %v1076_v61 = vmul.f32 %v1935_v29, %v1935_v29 }
 0x17f   :  { %v990_v29 = vsel %vm834_vm1, %v1965_v55, 0.0  ;;  %v1084_v50 = vmul.f32 %v2055_v16, %v2055_v16 }
 0x180   :  { %v971_v11 = vadd.f32 %v970_v35, %v969_v2  ;;  %v1166_v12 = vadd.f32 %v1165_v8, %v1164_v6  ;;  %v1181_v2 = vsel %vm834_vm1, %v1075_v15, 0.0  ;;  %v1077_v6 = vmul.f32 %v1949_v40, %v1949_v40 }
 0x181   :  { %v1183_v9 = vsel %vm834_vm1, %v1076_v61, 0.0  ;;  %v992_v40 = vsel %vm834_vm1, %v1979_v4, 0.0  ;;  %v996_v4 = vsel %vm834_vm1, %v2009_v33, 0.0 }
 0x182   :  { %v973_v21 = vadd.f32 %v972_v45, %v971_v11  ;;  %v1168_v22 = vadd.f32 %v1167_v14, %v1166_v12  ;;  %v1078_v11 = vmul.f32 %v1965_v55, %v1965_v55  ;;  %v1185_v45 = vsel %vm834_vm1, %v1077_v6, 0.0 }
 0x183   :  { %v994_v55 = vsel %vm834_vm1, %v1995_v20, 0.0 }
 0x184   :  { %v975_v30 = vadd.f32 %v974_v57, %v973_v21  ;;  %v1170_v32 = vadd.f32 %v1169_v25, %v1168_v22  ;;  %v1187_v25 = vsel %vm834_vm1, %v1078_v11, 0.0  ;;  %v1080_v57 = vmul.f32 %v1995_v20, %v1995_v20 }
 0x185   :  { %v998_v20 = vsel %vm834_vm1, %v2025_v49, 0.0  ;;  %v1089_v11 = vmul.f32 %v2129_v36, %v2129_v36 }
 0x186   :  { %v977_v10 = vadd.f32 %v976_v3, %v975_v30  ;;  %v1172_v38 = vadd.f32 %v1171_v34, %v1170_v32  ;;  %v1189_v32 = vsel %vm834_vm1, %v1079_v18, 0.0  ;;  %v1081_v34 = vmul.f32 %v2009_v33, %v2009_v33 }
 0x187   :  { %v1000_v33 = vsel %vm834_vm1, %v2039_v62, 0.0 }
 0x188   :  { %v1174_v43 = vadd.f32 %v1173_v39, %v1172_v38  ;;  %v979_v44 = vadd.f32 %v978_v17, %v977_v10  ;;  %v1191_v10 = vsel %vm834_vm1, %v1080_v57, 0.0  ;;  %v1082_v38 = vmul.f32 %v2025_v49, %v2025_v49 }
 0x189   :  { %v1193_v42 = vsel %vm834_vm1, %v1081_v34, 0.0  ;;  %v1002_v49 = vsel %vm834_vm1, %v2055_v16, 0.0  ;;  %v1006_v16 = vsel %vm834_vm1, %v2085_v48, 0.0 }
 0x18a   :  { %v981_v51 = vadd.f32 %v980_v28, %v979_v44  ;;  %v1176_v53 = vadd.f32 %v1175_v47, %v1174_v43  ;;  %v1083_v43 = vmul.f32 %v2039_v62, %v2039_v62  ;;  %v1195_v28 = vsel %vm834_vm1, %v1082_v38, 0.0 }
 0x18b   :  { %v1004_v62 = vsel %vm834_vm1, %v2069_v31, 0.0  ;;  %v1020_v38 = vsel %vm834_vm1, %v2189_v46, 0.0 }
 0x18c   :  { %v983_v58 = vadd.f32 %v982_v41, %v981_v51  ;;  %v1178_v59 = vadd.f32 %v1177_v56, %v1176_v53  ;;  %v1197_v56 = vsel %vm834_vm1, %v1083_v43, 0.0  ;;  %v1085_v41 = vmul.f32 %v2069_v31, %v2069_v31 }
 0x18d   :  { %v1008_v31 = vsel %vm834_vm1, %v2099_v63, 0.0  ;;  %v1095_v43 = vmul.f32 %v2219_v24, %v2219_v24 }
 0x18e   :  { %v985_v23 = vadd.f32 %v984_v52, %v983_v58  ;;  %v1180_v0 = vadd.f32 %v1179_v60, %v1178_v59  ;;  %v1199_v59 = vsel %vm834_vm1, %v1084_v50, 0.0  ;;  %v1086_v60 = vmul.f32 %v2085_v48, %v2085_v48 }
 0x18f   :  { %v1010_v48 = vsel %vm834_vm1, %v2115_v19, 0.0 }
 0x190   :  { %v987_v8 = vadd.f32 %v986_v1, %v985_v23  ;;  %v1182_v35 = vadd.f32 %v1181_v2, %v1180_v0  ;;  %v1201_v23 = vsel %vm834_vm1, %v1085_v41, 0.0  ;;  %v1087_v0 = vmul.f32 %v2099_v63, %v2099_v63 }
 0x191   :  { %v1203_v6 = vsel %vm834_vm1, %v1086_v60, 0.0  ;;  %v1012_v63 = vsel %vm834_vm1, %v2129_v36, 0.0  ;;  %v1016_v36 = vsel %vm834_vm1, %v2159_v7, 0.0 }
 0x192   :  { %v989_v12 = vadd.f32 %v988_v13, %v987_v8  ;;  %v1184_v14 = vadd.f32 %v1183_v9, %v1182_v35  ;;  %v1088_v8 = vmul.f32 %v2115_v19, %v2115_v19  ;;  %v1205_v13 = vsel %vm834_vm1, %v1087_v0, 0.0 }
 0x193   :  { %v1014_v19 = vsel %vm834_vm1, %v2145_v54, 0.0 }
 0x194   :  { %v991_v21 = vadd.f32 %v990_v29, %v989_v12  ;;  %v1186_v22 = vadd.f32 %v1185_v45, %v1184_v14  ;;  %v1207_v45 = vsel %vm834_vm1, %v1088_v8, 0.0  ;;  %v1090_v29 = vmul.f32 %v2145_v54, %v2145_v54 }
 0x195   :  { %v1018_v54 = vsel %vm834_vm1, %v2175_v27, 0.0 }
 0x196   :  { %v993_v26 = vadd.f32 %v992_v40, %v991_v21  ;;  %v1188_v30 = vadd.f32 %v1187_v25, %v1186_v22  ;;  %v1209_v22 = vsel %vm834_vm1, %v1089_v11, 0.0  ;;  %v1091_v25 = vmul.f32 %v2159_v7, %v2159_v7 }
 0x198   :  { %v995_v3 = vadd.f32 %v994_v55, %v993_v26  ;;  %v1190_v37 = vadd.f32 %v1189_v32, %v1188_v30  ;;  %v1211_v26 = vsel %vm834_vm1, %v1090_v29, 0.0  ;;  %v1092_v30 = vmul.f32 %v2175_v27, %v2175_v27 }
 0x199   :  { %v1213_v34 = vsel %vm834_vm1, %v1091_v25, 0.0 }
 0x19a   :  { %v1192_v39 = vadd.f32 %v1191_v10, %v1190_v37  ;;  %v997_v17 = vadd.f32 %v996_v4, %v995_v3  ;;  %v1093_v3 = vmul.f32 %v2189_v46, %v2189_v46  ;;  %v1094_v37 = vmul.f32 %v2205_v5, %v2205_v5 }
 0x19b   :  { %v1215_v7 = vsel %vm834_vm1, %v1092_v30, 0.0  ;;  %v1221_v46 = vsel %vm834_vm1, %v1095_v43, 0.0 }
 0x19c   :  { %v1194_v44 = vadd.f32 %v1193_v42, %v1192_v39  ;;  %v999_v47 = vadd.f32 %v998_v20, %v997_v17  ;;  %v1022_v39 = vsel %vm834_vm1, %v2205_v5, 0.0  ;;  %v1217_v27 = vsel %vm834_vm1, %v1093_v3, 0.0 }
 0x19d   :  { %v1219_v20 = vsel %vm834_vm1, %v1094_v37, 0.0 }
 0x19e   :  { %v1196_v51 = vadd.f32 %v1195_v28, %v1194_v44  ;;  %v1001_v53 = vadd.f32 %v1000_v33, %v999_v47  ;;  %v1024_v28 = vsel %vm834_vm1, %v2219_v24, 0.0 }
 0x1a0   :  { %v1198_v15 = vadd.f32 %v1197_v56, %v1196_v51  ;;  %v1003_v58 = vadd.f32 %v1002_v49, %v1001_v53 }
 0x1a2   :  { %v1200_v52 = vadd.f32 %v1199_v59, %v1198_v15  ;;  %v1005_v61 = vadd.f32 %v1004_v62, %v1003_v58 }
 0x1a4   :  { %v1202_v2 = vadd.f32 %v1201_v23, %v1200_v52  ;;  %v1007_v1 = vadd.f32 %v1006_v16, %v1005_v61 }
 0x1a6   :  { %v1204_v35 = vadd.f32 %v1203_v6, %v1202_v2  ;;  %v1009_v9 = vadd.f32 %v1008_v31, %v1007_v1 }
 0x1a8   :  { %v1206_v12 = vadd.f32 %v1205_v13, %v1204_v35  ;;  %v1011_v14 = vadd.f32 %v1010_v48, %v1009_v9 }
 0x1aa   :  { %v1208_v18 = vadd.f32 %v1207_v45, %v1206_v12  ;;  %v1013_v21 = vadd.f32 %v1012_v63, %v1011_v14 }
 0x1ac   :  { %v1210_v40 = vadd.f32 %v1209_v22, %v1208_v18  ;;  %v1015_v57 = vadd.f32 %v1014_v19, %v1013_v21 }
 0x1ae   :  { %v1212_v32 = vadd.f32 %v1211_v26, %v1210_v40  ;;  %v1017_v55 = vadd.f32 %v1016_v36, %v1015_v57 }
 0x1b0   :  { %v1214_v10 = vadd.f32 %v1213_v34, %v1212_v32  ;;  %v1019_v4 = vadd.f32 %v1018_v54, %v1017_v55 }
 0x1b2   :  { %v1216_v17 = vadd.f32 %v1215_v7, %v1214_v10  ;;  %v1021_v42 = vadd.f32 %v1020_v38, %v1019_v4 }
 0x1b4   :  { %v1218_v44 = vadd.f32 %v1217_v27, %v1216_v17  ;;  %v1023_v47 = vadd.f32 %v1022_v39, %v1021_v42 }
 0x1b6   :  { %v1220_v33 = vadd.f32 %v1219_v20, %v1218_v44  ;;  %v1025_v50 = vadd.f32 %v1024_v28, %v1023_v47 }
 0x1b8   :  { %v1026_v51 = vrot.slane %v1025_v50, 4  ;;  %v1222_v5 = vadd.f32 %v1221_v46, %v1220_v33 }
 0x1ba   :  { %v1027_v53 = vadd.f32 %v1026_v51, %v1025_v50  ;;  %v1223_v56 = vrot.slane %v1222_v5, 4 }
 0x1bc   :  { %v1028_v49 = vrot.slane %v1027_v53, 2  ;;  %v1224_v41 = vadd.f32 %v1223_v56, %v1222_v5 }
 0x1be   :  { %v1029_v15 = vadd.f32 %v1028_v49, %v1027_v53  ;;  %v1225_v58 = vrot.slane %v1224_v41, 2 }
 0x1c0   :  { %v1030_v59 = vrot.slane %v1029_v15, 1  ;;  %v1226_v62 = vadd.f32 %v1225_v58, %v1224_v41 }
 0x1c2   :  { %v1227_v60 = vrot.slane %v1226_v62, 1  ;;  %v1031_v52 = vadd.f32 %v1030_v59, %v1029_v15 }
 0x1c4   :  { %v1228_v61 = vadd.f32 %v1227_v60, %v1226_v62 }
 0x1c6   :  { %v1230_v24 = vsel %vm1229_vm2, %v1031_v52, %v1228_v61 }
 0x1c7   :  { %1232 = vst.msk [vmem:[%s2400_s4] sm:$0x3] %vm1231_vm3, %v1230_v24 }

// kernel: generator_forward.14
= control target key start
LH: loop header
LB: loop body
LE: loop exit
PB: predicated region body
PF: predicated region fallthrough
CT: control target
= control target key end

     0   :  { %s242_s0 = inlined_call_operand.vmem [shape: f32[128,128], index: 0, kind: input, shape index: {}]   ;;  %s243_s1 = inlined_call_operand.vmem [shape: f32[2,128], index: 1, kind: input, shape index: {}]   ;;  %s244_s2 = inlined_call_operand.vmem [shape: f32[128,128], index: 2, kind: output, shape index: {}]  }
   0x1   :  { %v11_v0 = vld [vmem:[%s242_s0] sm:$0xff]  ;;  %v12_v4 = vld [vmem:[%s242_s0 + $0x8] sm:$0xff]  ;;  %v13_v5 = vld [vmem:[%s242_s0 + $0x10] sm:$0xff] }
   0x2   :  { %v105_v1 = vld [vmem:[%s243_s1] ss:$0 sm:$0xff]  ;;  %v131_v2 = vld [vmem:[%s243_s1 + $0x1] ss:$0 sm:$0xff]  ;;  %v14_v6 = vld [vmem:[%s242_s0 + $0x18] sm:$0xff] }
   0x3   :  { %v32_v3 = vmul.f32 %v105_v1, %v11_v0  ;;  %v33_v7 = vmul.f32 %v105_v1, %v12_v4  ;;  %v34_v8 = vmul.f32 %v105_v1, %v13_v5  ;;  %v35_v9 = vmul.f32 %v105_v1, %v14_v6  ;;  %v15_v10 = vld [vmem:[%s242_s0 + $0x20] sm:$0xff]  ;;  %v16_v11 = vld [vmem:[%s242_s0 + $0x28] sm:$0xff]  ;;  %v17_v12 = vld [vmem:[%s242_s0 + $0x30] sm:$0xff] }
   0x4   :  { %v36_v14 = vmul.f32 %v105_v1, %v15_v10  ;;  %v37_v15 = vmul.f32 %v105_v1, %v16_v11  ;;  %v38_v16 = vmul.f32 %v105_v1, %v17_v12  ;;  %v18_v17 = vld [vmem:[%s242_s0 + $0x38] sm:$0xff]  ;;  %v19_v22 = vld [vmem:[%s242_s0 + $0x40] sm:$0xff]  ;;  %v20_v27 = vld [vmem:[%s242_s0 + $0x48] sm:$0xff] }
   0x5   :  { %v53_v13 = vadd.f32 %v131_v2, %v32_v3  ;;  %v54_v18 = vadd.f32 %v131_v2, %v33_v7  ;;  %v55_v19 = vadd.f32 %v131_v2, %v34_v8  ;;  %v56_v20 = vadd.f32 %v131_v2, %v35_v9  ;;  %v21_v28 = vld [vmem:[%s242_s0 + $0x50] sm:$0xff]  ;;  %v22_v29 = vld [vmem:[%s242_s0 + $0x58] sm:$0xff]  ;;  %v23_v34 = vld [vmem:[%s242_s0 + $0x60] sm:$0xff] }
   0x6   :  { %v39_v21 = vmul.f32 %v105_v1, %v18_v17  ;;  %v57_v24 = vadd.f32 %v131_v2, %v36_v14  ;;  %v58_v25 = vadd.f32 %v131_v2, %v37_v15  ;;  %v59_v26 = vadd.f32 %v131_v2, %v38_v16  ;;  %v24_v35 = vld [vmem:[%s242_s0 + $0x68] sm:$0xff]  ;;  %v25_v36 = vld [vmem:[%s242_s0 + $0x70] sm:$0xff]  ;;  %v26_v41 = vld [vmem:[%s242_s0 + $0x78] sm:$0xff] }
   0x7   :  { %v69_v23 = vmax.f32 %v53_v13, 0.0  ;;  %v70_v30 = vmax.f32 %v54_v18, 0.0  ;;  %v71_v31 = vmax.f32 %v55_v19, 0.0  ;;  %v72_v32 = vmax.f32 %v56_v20, 0.0 }
   0x8   :  { %v60_v33 = vadd.f32 %v131_v2, %v39_v21  ;;  %v73_v37 = vmax.f32 %v57_v24, 0.0  ;;  %v74_v38 = vmax.f32 %v58_v25, 0.0  ;;  %v75_v39 = vmax.f32 %v59_v26, 0.0 }
   0x9   :  { %85 = vst [vmem:[%s244_s2] sm:$0xff] %v69_v23  ;;  %v40_v40 = vmul.f32 %v105_v1, %v19_v22  ;;  %86 = vst [vmem:[%s244_s2 + $0x8] sm:$0xff] %v70_v30  ;;  %v41_v43 = vmul.f32 %v105_v1, %v20_v27  ;;  %v42_v44 = vmul.f32 %v105_v1, %v21_v28 }
   0xa   :  { %87 = vst [vmem:[%s244_s2 + $0x10] sm:$0xff] %v71_v31  ;;  %88 = vst [vmem:[%s244_s2 + $0x18] sm:$0xff] %v72_v32  ;;  %v76_v42 = vmax.f32 %v60_v33, 0.0  ;;  %v43_v45 = vmul.f32 %v105_v1, %v22_v29  ;;  %v44_v47 = vmul.f32 %v105_v1, %v23_v34  ;;  %v45_v48 = vmul.f32 %v105_v1, %v24_v35 }
   0xb   :  { %89 = vst [vmem:[%s244_s2 + $0x20] sm:$0xff] %v73_v37  ;;  %90 = vst [vmem:[%s244_s2 + $0x28] sm:$0xff] %v74_v38  ;;  %v61_v46 = vadd.f32 %v131_v2, %v40_v40  ;;  %v46_v49 = vmul.f32 %v105_v1, %v25_v36  ;;  %v62_v50 = vadd.f32 %v131_v2, %v41_v43 }
   0xc   :  { %91 = vst [vmem:[%s244_s2 + $0x30] sm:$0xff] %v75_v39  ;;  %92 = vst [vmem:[%s244_s2 + $0x38] sm:$0xff] %v76_v42  ;;  %v63_v51 = vadd.f32 %v131_v2, %v42_v44  ;;  %v64_v52 = vadd.f32 %v131_v2, %v43_v45  ;;  %v47_v53 = vmul.f32 %v105_v1, %v26_v41 }
   0xd   :  { %v77_v54 = vmax.f32 %v61_v46, 0.0  ;;  %v65_v55 = vadd.f32 %v131_v2, %v44_v47  ;;  %v66_v56 = vadd.f32 %v131_v2, %v45_v48  ;;  %v67_v57 = vadd.f32 %v131_v2, %v46_v49 }
   0xe   :  { %v78_v58 = vmax.f32 %v62_v50, 0.0  ;;  %v79_v59 = vmax.f32 %v63_v51, 0.0  ;;  %v80_v60 = vmax.f32 %v64_v52, 0.0  ;;  %v68_v61 = vadd.f32 %v131_v2, %v47_v53 }
   0xf   :  { %93 = vst [vmem:[%s244_s2 + $0x40] sm:$0xff] %v77_v54  ;;  %v81_v62 = vmax.f32 %v65_v55, 0.0  ;;  %v82_v63 = vmax.f32 %v66_v56, 0.0  ;;  %v83_v0 = vmax.f32 %v67_v57, 0.0 }
  0x10   :  { %94 = vst [vmem:[%s244_s2 + $0x48] sm:$0xff] %v78_v58  ;;  %95 = vst [vmem:[%s244_s2 + $0x50] sm:$0xff] %v79_v59  ;;  %v84_v1 = vmax.f32 %v68_v61, 0.0 }
  0x11   :  { %96 = vst [vmem:[%s244_s2 + $0x58] sm:$0xff] %v80_v60  ;;  %97 = vst [vmem:[%s244_s2 + $0x60] sm:$0xff] %v81_v62 }
  0x12   :  { %98 = vst [vmem:[%s244_s2 + $0x68] sm:$0xff] %v82_v63  ;;  %99 = vst [vmem:[%s244_s2 + $0x70] sm:$0xff] %v83_v0 }
  0x13   :  { %100 = vst [vmem:[%s244_s2 + $0x78] sm:$0xff] %v84_v1 }

// kernel: generator_forward.15
= control target key start
LH: loop header
LB: loop body
LE: loop exit
PB: predicated region body
PF: predicated region fallthrough
CT: control target
= control target key end

     0   :  { %s1422_s12 = smov 0   ;;  %s1723_s0 = inlined_call_operand.vmem [shape: bf16[2048,72], index: 0, kind: input, shape index: {}]   ;;  %s1724_s1 = inlined_call_operand.vmem [shape: bf16[72,3], index: 1, kind: input, shape index: {}]   ;;  %s1725_s2 = inlined_call_operand.vmem [shape: f32[1,3], index: 2, kind: input, shape index: {}]   ;;  %s1726_s3 = inlined_call_operand.vmem [shape: f32[2048,3], index: 3, kind: output, shape index: {}]  }
   0x1 LB: > { %s1017_s13 = sadd.s32 4294967295, %s1400_s12   ;;  %p1021_p0 = scmp.ge.s32.totalorder %s1400_s12, 1  ;;  %s1400_s12 = sphi %s1422_s12, %s13_s12  }
   0x2   : > { %p138_p1 = scmp.lt.s32.totalorder %s1400_s12, 5 }
   0x4   : > { %p139_p2 = pnand %p1021_p0, %p138_p1 }
   0x5   : > { %v1229_v0 = vld [vmem:[%s1724_s1] sm:$0xff] (!%p139_p2)   ;;  %v1230_v1 = vld [vmem:[%s1724_s1 + $0x8] sm:$0xff] (!%p139_p2)   ;;  %s1022_s18 = sshll.u32 (!%p139_p2), %s1017_s13, 6  ;;  %v1231_v2 = vld [vmem:[%s1724_s1 + $0x10] sm:$0xff] (!%p139_p2)   ;;  %vm442_vm0 = vcmask (!%p139_p2), 588800   ;;  %vm539_vm1 = vcmask (!%p139_p2), 1043456  }
   0x6   : > { %142 = sbr.rel (%p139_p2) target bundleno = 318 (0x13e), region = 32  ;;  %1135 = vmatprep.subr.bf16.mxu0 (!%p139_p2), %v1229_v0  ;;  %1209 = vmatprep.subr.bf16.mxu1 (!%p139_p2), %v1229_v0  ;;  %p163_p3 = scmp.lt.s32.totalorder (!%p139_p2), %s1022_s18, 255  ;;  %v1232_v3 = vld [vmem:[%s1724_s1 + $0x18] sm:$0xff] (!%p139_p2)   ;;  %v1233_v6 = vld [vmem:[%s1724_s1 + $0x20] ss:$0 sps:$4 sm:$0xff] (!%p139_p2)   ;;  %vm896_vm2 = vcmask (!%p139_p2), 23552  }
   0x7   : > { %1136 = vmatpush3.bf16.msra.mxu0 (!%p139_p2), %v1229_v0  ;;  %1214 = vmatpush3.bf16.msra.mxu1 (!%p139_p2), %v1229_v0  ;;  %v541_v7 = vsel (!%p139_p2), %vm539_vm1, %v1233_v6, 0  ;;  %v1520_v38 = vld [vmem:[%s1725_s2] ss:$0 sm:$0xff] (!%p139_p2) }
   0x8   : > { %1137 = vmatprep.subr.bf16.mxu0 (!%p139_p2), %v1230_v1  ;;  %1210 = vmatprep.subr.bf16.mxu1 (!%p139_p2), %v1230_v1 }
   0xb   : > { %1138 = vmatpush3.bf16.msra.mxu0 (!%p139_p2), %v1230_v1  ;;  %1215 = vmatpush3.bf16.msra.mxu1 (!%p139_p2), %v1230_v1 }
   0xc   : > { %1139 = vmatprep.subr.bf16.mxu0 (!%p139_p2), %v1231_v2  ;;  %1211 = vmatprep.subr.bf16.mxu1 (!%p139_p2), %v1231_v2 }
   0xd   : > { %s1728_s18 = smov (!%p163_p3, %s1022_s18), 255 }
   0xe   : > { %s1023_s21 = sshll.u32 %s1728_s18, 2  ;;  %s1025_s4 = sshll.u32 %s1728_s18, 3 }
   0xf   : > { %s1448_s26 = scalar_lea.vmem %s1723_s0, %s1023_s21  ;;  %1140 = vmatpush3.bf16.msra.mxu0 %v1231_v2  ;;  %1216 = vmatpush3.bf16.msra.mxu1 %v1231_v2  ;;  %s1538_s7 = scalar_lea.vmem %s1726_s3, %s1025_s4 }
  0x10   : > { %v1234_v4 = vld [vmem:[%s1448_s26] sm:$0xff]   ;;  %1141 = vmatprep.subr.bf16.mxu0 %v1232_v3  ;;  %1212 = vmatprep.subr.bf16.mxu1 %v1232_v3  ;;  %v1236_v8 = vld [vmem:[%s1448_s26 + $0x8] sm:$0xff]   ;;  %v1238_v10 = vld [vmem:[%s1448_s26 + $0x10] sm:$0xff]  }
  0x11   : > { %v1235_v5 = vld [vmem:[%s1448_s26 + $0x80] sm:$0xff]   ;;  %1145 = vmatprep.mubr.msk.bf16.mxu0 %vm442_vm0, %v1234_v4  ;;  %v1237_v9 = vld [vmem:[%s1448_s26 + $0x88] sm:$0xff]   ;;  %v1239_v11 = vld [vmem:[%s1448_s26 + $0x90] sm:$0xff]  }
  0x12   : > { %1177 = vmatprep.mubr.msk.bf16.mxu1 %vm442_vm0, %v1235_v5  ;;  %v1240_v12 = vld [vmem:[%s1448_s26 + $0x18] sm:$0xff]   ;;  %v1242_v14 = vld [vmem:[%s1448_s26 + $0x20] sm:$0xff]   ;;  %v1244_v16 = vld [vmem:[%s1448_s26 + $0x28] sm:$0xff]  }
  0x13   : > { %1142 = vmatpush3.bf16.msra.mxu0 %v1232_v3  ;;  %1217 = vmatpush3.bf16.msra.mxu1 %v1232_v3  ;;  %v1241_v13 = vld [vmem:[%s1448_s26 + $0x98] sm:$0xff]   ;;  %v1243_v15 = vld [vmem:[%s1448_s26 + $0xa0] sm:$0xff]   ;;  %v1245_v17 = vld [vmem:[%s1448_s26 + $0xa8] sm:$0xff]  }
  0x14   : > { %1219 = vmatprep.subr.msk.bf16.mxu0 %vm539_vm1, %v1233_v6  ;;  %1220 = vmatprep.subr.msk.bf16.mxu1 %vm539_vm1, %v1233_v6  ;;  %v1246_v18 = vld [vmem:[%s1448_s26 + $0x30] sm:$0xff]   ;;  %v1248_v20 = vld [vmem:[%s1448_s26 + $0x38] sm:$0xff]   ;;  %v1250_v22 = vld [vmem:[%s1448_s26 + $0x40] sm:$0xff]  }
  0x15   : > { %v1247_v19 = vld [vmem:[%s1448_s26 + $0xb0] sm:$0xff]   ;;  %v1249_v21 = vld [vmem:[%s1448_s26 + $0xb8] sm:$0xff]   ;;  %v1251_v23 = vld [vmem:[%s1448_s26 + $0xc0] sm:$0xff]  }
  0x16   : > { %v1252_v24 = vld [vmem:[%s1448_s26 + $0x48] sm:$0xff]   ;;  %v1254_v26 = vld [vmem:[%s1448_s26 + $0x50] sm:$0xff]   ;;  %v1256_v28 = vld [vmem:[%s1448_s26 + $0x58] sm:$0xff]  }
  0x17   : > { %1144 = vmatpush3.bf16.msra.mxu0 %v541_v7  ;;  %1218 = vmatpush3.bf16.msra.mxu1 %v541_v7  ;;  %v1253_v25 = vld [vmem:[%s1448_s26 + $0xc8] sm:$0xff]   ;;  %v1255_v27 = vld [vmem:[%s1448_s26 + $0xd0] sm:$0xff]   ;;  %v1257_v29 = vld [vmem:[%s1448_s26 + $0xd8] sm:$0xff]  }
  0x18   : > { %v1258_v30 = vld [vmem:[%s1448_s26 + $0x60] sm:$0xff]   ;;  %v1260_v32 = vld [vmem:[%s1448_s26 + $0x68] sm:$0xff]   ;;  %v1262_v34 = vld [vmem:[%s1448_s26 + $0x70] sm:$0xff]  }
  0x19   : > { %v1259_v31 = vld [vmem:[%s1448_s26 + $0xe0] sm:$0xff]   ;;  %v1261_v33 = vld [vmem:[%s1448_s26 + $0xe8] sm:$0xff]   ;;  %v1263_v35 = vld [vmem:[%s1448_s26 + $0xf0] sm:$0xff]  }
  0x1a   : > { %1146 = vmatmul.mubr.msk.bf16.vlgmr.msra.gmra.mrb[0].mxu0 %vm442_vm0, %v1236_v8  ;;  %1178 = vmatmul.mubr.msk.bf16.vlgmr.msra.gmra.mrb[0].mxu1 %vm442_vm0, %v1237_v9  ;;  %v1264_v36 = vld [vmem:[%s1448_s26 + $0x78] sm:$0xff]  }
  0x1b   : > { %1149 = vmatprep.mubr.msk.bf16.mxu0 %vm442_vm0, %v1238_v10  ;;  %1181 = vmatprep.mubr.msk.bf16.mxu1 %vm442_vm0, %v1239_v11  ;;  %v1265_v37 = vld [vmem:[%s1448_s26 + $0xf8] sm:$0xff]  }
  0x22   : > { %1150 = vmatmul.mubr.msk.bf16.gmra.mrb[4].mxu0 %vm442_vm0, %v1240_v12  ;;  %1182 = vmatmul.mubr.msk.bf16.gmra.mrb[4].mxu1 %vm442_vm0, %v1241_v13 }
  0x23   : > { %1153 = vmatprep.mubr.msk.bf16.mxu0 %vm442_vm0, %v1242_v14  ;;  %1185 = vmatprep.mubr.msk.bf16.mxu1 %vm442_vm0, %v1243_v15 }
  0x2a   : > { %1154 = vmatmul.mubr.msk.bf16.gmra.mrb[8].mxu0 %vm442_vm0, %v1244_v16  ;;  %1186 = vmatmul.mubr.msk.bf16.gmra.mrb[8].mxu1 %vm442_vm0, %v1245_v17 }
  0x2b   : > { %1157 = vmatprep.mubr.msk.bf16.mxu0 %vm442_vm0, %v1246_v18  ;;  %1189 = vmatprep.mubr.msk.bf16.mxu1 %vm442_vm0, %v1247_v19 }
  0x32   : > { %1158 = vmatmul.mubr.msk.bf16.gmra.mrb[12].mxu0 %vm442_vm0, %v1248_v20  ;;  %1190 = vmatmul.mubr.msk.bf16.gmra.mrb[12].mxu1 %vm442_vm0, %v1249_v21 }
  0x33   : > { %1161 = vmatprep.mubr.msk.bf16.mxu0 %vm442_vm0, %v1250_v22  ;;  %1193 = vmatprep.mubr.msk.bf16.mxu1 %vm442_vm0, %v1251_v23 }
  0x3a   : > { %1162 = vmatmul.mubr.msk.bf16.gmra.mrb[16].mxu0 %vm442_vm0, %v1252_v24  ;;  %1194 = vmatmul.mubr.msk.bf16.gmra.mrb[16].mxu1 %vm442_vm0, %v1253_v25 }
  0x3b   : > { %1165 = vmatprep.mubr.msk.bf16.mxu0 %vm442_vm0, %v1254_v26  ;;  %1197 = vmatprep.mubr.msk.bf16.mxu1 %vm442_vm0, %v1255_v27 }
  0x42   : > { %1166 = vmatmul.mubr.msk.bf16.gmra.mrb[20].mxu0 %vm442_vm0, %v1256_v28  ;;  %1198 = vmatmul.mubr.msk.bf16.gmra.mrb[20].mxu1 %vm442_vm0, %v1257_v29 }
  0x43   : > { %1169 = vmatprep.mubr.msk.bf16.mxu0 %vm442_vm0, %v1258_v30  ;;  %1201 = vmatprep.mubr.msk.bf16.mxu1 %vm442_vm0, %v1259_v31 }
  0x4a   : > { %1170 = vmatmul.mubr.msk.bf16.gmra.mrb[24].mxu0 %vm442_vm0, %v1260_v32  ;;  %1202 = vmatmul.mubr.msk.bf16.gmra.mrb[24].mxu1 %vm442_vm0, %v1261_v33 }
  0x4b   : > { %1173 = vmatprep.mubr.msk.bf16.mxu0 %vm442_vm0, %v1262_v34  ;;  %1205 = vmatprep.mubr.msk.bf16.mxu1 %vm442_vm0, %v1263_v35 }
  0x52   : > { %1174 = vmatmul.mubr.msk.bf16.gmra.mrb[28].mxu0 %vm442_vm0, %v1264_v36  ;;  %1206 = vmatmul.mubr.msk.bf16.gmra.mrb[28].mxu1 %vm442_vm0, %v1265_v37 }
  0xed   : > { %v1147_v39 = vpop.f32.mrb[0].mxu0  ;;  %v1179_v40 = vpop.f32.mrb[0].mxu1 }
  0xee   : > { %v586_v41 = vadd.f32 %v1147_v39, %v1520_v38  ;;  %v714_v42 = vadd.f32 %v1179_v40, %v1520_v38  ;;  %v577_v43 = vpop.f32.mrb[1].mxu0  ;;  %v705_v44 = vpop.f32.mrb[1].mxu1 }
  0xef   : > { %v578_v45 = vadd.f32 %v1520_v38, %v577_v43  ;;  %v706_v46 = vadd.f32 %v1520_v38, %v705_v44  ;;  %v1148_v47 = vpop.f32.mrb[2].mxu0  ;;  %v1180_v48 = vpop.f32.mrb[2].mxu1 }
  0xf0   : > { %1266 = vtanh.f32 %v586_v41  ;;  %v589_v49 = vadd.f32 %v1148_v47, %v1520_v38  ;;  %v580_v50 = vpop.f32.mrb[3].mxu0  ;;  %v708_v51 = vpop.f32.mrb[3].mxu1  ;;  %v717_v52 = vadd.f32 %v1180_v48, %v1520_v38 }
  0xf1   : > { %1268 = vtanh.f32 %v714_v42  ;;  %v581_v53 = vadd.f32 %v1520_v38, %v580_v50  ;;  %v709_v54 = vadd.f32 %v1520_v38, %v708_v51 }
  0xf2   : > { %1270 = vtanh.f32 %v578_v45 }
  0xf3   : > { %1272 = vtanh.f32 %v706_v46 }
  0xf4   : > { %1274 = vtanh.f32 %v589_v49 }
  0xf5   : > { %1276 = vtanh.f32 %v717_v52  ;;  %v1151_v55 = vpop.f32.mrb[4].mxu0  ;;  %v1183_v56 = vpop.f32.mrb[4].mxu1 }
  0xf6   : > { %1278 = vtanh.f32 %v581_v53  ;;  %v602_v57 = vadd.f32 %v1151_v55, %v1520_v38  ;;  %v730_v58 = vadd.f32 %v1183_v56, %v1520_v38  ;;  %v593_v59 = vpop.f32.mrb[5].mxu0  ;;  %v721_v60 = vpop.f32.mrb[5].mxu1 }
  0xf7   : > { %1280 = vtanh.f32 %v709_v54  ;;  %v594_v61 = vadd.f32 %v1520_v38, %v593_v59  ;;  %v722_v62 = vadd.f32 %v1520_v38, %v721_v60  ;;  %v1152_v63 = vpop.f32.mrb[6].mxu0  ;;  %v1184_v0 = vpop.f32.mrb[6].mxu1 }
  0xf8   : > { %1282 = vtanh.f32 %v602_v57  ;;  %v605_v1 = vadd.f32 %v1152_v63, %v1520_v38  ;;  %v596_v2 = vpop.f32.mrb[7].mxu0  ;;  %v724_v3 = vpop.f32.mrb[7].mxu1  ;;  %v733_v4 = vadd.f32 %v1184_v0, %v1520_v38 }
  0xf9   : > { %1284 = vtanh.f32 %v730_v58  ;;  %v597_v6 = vadd.f32 %v1520_v38, %v596_v2  ;;  %v725_v8 = vadd.f32 %v1520_v38, %v724_v3 }
  0xfa   : > { %v1267_v5 = vpop.eup %1266  ;;  %1286 = vtanh.f32 %v594_v61 }
  0xfb   : > { %v1269_v7 = vpop.eup %1268  ;;  %899 = vst.msk [vmem:[%s1538_s7 + $0x10] sm:$0xff] %vm896_vm2, %v1267_v5  ;;  %1288 = vtanh.f32 %v722_v62 }
  0xfc   : > { %v1271_v9 = vpop.eup %1270  ;;  %931 = vst.msk [vmem:[%s1538_s7 + $0x110] sm:$0xff] %vm896_vm2, %v1269_v7  ;;  %1290 = vtanh.f32 %v605_v1 }
  0xfd   : > { %v1273_v10 = vpop.eup %1272  ;;  %897 = vst.msk [vmem:[%s1538_s7] sm:$0xff] %vm896_vm2, %v1271_v9  ;;  %1292 = vtanh.f32 %v733_v4  ;;  %v1155_v11 = vpop.f32.mrb[8].mxu0 }
  0xfe   : > { %v1187_v12 = vpop.f32.mrb[8].mxu1  ;;  %v1275_v13 = vpop.eup %1274  ;;  %929 = vst.msk [vmem:[%s1538_s7 + $0x100] sm:$0xff] %vm896_vm2, %v1273_v10  ;;  %1294 = vtanh.f32 %v597_v6  ;;  %v618_v14 = vadd.f32 %v1155_v11, %v1520_v38 }
  0xff   : > { %v746_v15 = vadd.f32 %v1187_v12, %v1520_v38  ;;  %v609_v16 = vpop.f32.mrb[9].mxu0  ;;  %v737_v17 = vpop.f32.mrb[9].mxu1  ;;  %900 = vst.msk [vmem:[%s1538_s7 + $0x18] sm:$0xff] %vm896_vm2, %v1275_v13  ;;  %1296 = vtanh.f32 %v725_v8 }
 0x100   : > { %v1277_v18 = vpop.eup %1276  ;;  %v610_v19 = vadd.f32 %v1520_v38, %v609_v16  ;;  %v738_v20 = vadd.f32 %v1520_v38, %v737_v17  ;;  %v1156_v21 = vpop.f32.mrb[10].mxu0  ;;  %1298 = vtanh.f32 %v618_v14 }
 0x101   : > { %v1188_v22 = vpop.f32.mrb[10].mxu1  ;;  %v1279_v23 = vpop.eup %1278  ;;  %932 = vst.msk [vmem:[%s1538_s7 + $0x118] sm:$0xff] %vm896_vm2, %v1277_v18  ;;  %v621_v24 = vadd.f32 %v1156_v21, %v1520_v38  ;;  %1300 = vtanh.f32 %v746_v15 }
 0x102   : > { %v612_v25 = vpop.f32.mrb[11].mxu0  ;;  %v740_v26 = vpop.f32.mrb[11].mxu1  ;;  %898 = vst.msk [vmem:[%s1538_s7 + $0x8] sm:$0xff] %vm896_vm2, %v1279_v23  ;;  %v749_v28 = vadd.f32 %v1188_v22, %v1520_v38  ;;  %1302 = vtanh.f32 %v610_v19 }
 0x103   : > { %v1281_v27 = vpop.eup %1280  ;;  %v613_v30 = vadd.f32 %v1520_v38, %v612_v25  ;;  %1304 = vtanh.f32 %v738_v20  ;;  %v741_v32 = vadd.f32 %v1520_v38, %v740_v26 }
 0x104   : > { %v1283_v29 = vpop.eup %1282  ;;  %930 = vst.msk [vmem:[%s1538_s7 + $0x108] sm:$0xff] %vm896_vm2, %v1281_v27  ;;  %1306 = vtanh.f32 %v621_v24 }
 0x105   : > { %v1285_v31 = vpop.eup %1284  ;;  %903 = vst.msk [vmem:[%s1538_s7 + $0x30] sm:$0xff] %vm896_vm2, %v1283_v29  ;;  %1308 = vtanh.f32 %v749_v28  ;;  %v1159_v35 = vpop.f32.mrb[12].mxu0 }
 0x106   : > { %v1287_v33 = vpop.eup %1286  ;;  %935 = vst.msk [vmem:[%s1538_s7 + $0x130] sm:$0xff] %vm896_vm2, %v1285_v31  ;;  %v1191_v36 = vpop.f32.mrb[12].mxu1  ;;  %1310 = vtanh.f32 %v613_v30  ;;  %v634_v39 = vadd.f32 %v1159_v35, %v1520_v38 }
 0x107   : > { %v1289_v34 = vpop.eup %1288  ;;  %901 = vst.msk [vmem:[%s1538_s7 + $0x20] sm:$0xff] %vm896_vm2, %v1287_v33  ;;  %v762_v40 = vadd.f32 %v1191_v36, %v1520_v38  ;;  %v625_v41 = vpop.f32.mrb[13].mxu0  ;;  %1312 = vtanh.f32 %v741_v32 }
 0x108   : > { %v1291_v37 = vpop.eup %1290  ;;  %933 = vst.msk [vmem:[%s1538_s7 + $0x120] sm:$0xff] %vm896_vm2, %v1289_v34  ;;  %v753_v42 = vpop.f32.mrb[13].mxu1  ;;  %v626_v44 = vadd.f32 %v1520_v38, %v625_v41  ;;  %1314 = vtanh.f32 %v634_v39 }
 0x109   : > { %v1293_v43 = vpop.eup %1292  ;;  %904 = vst.msk [vmem:[%s1538_s7 + $0x38] sm:$0xff] %vm896_vm2, %v1291_v37  ;;  %v754_v45 = vadd.f32 %v1520_v38, %v753_v42  ;;  %v1160_v46 = vpop.f32.mrb[14].mxu0  ;;  %1316 = vtanh.f32 %v762_v40 }
 0x10a   : > { %v1192_v47 = vpop.f32.mrb[14].mxu1  ;;  %v1295_v48 = vpop.eup %1294  ;;  %936 = vst.msk [vmem:[%s1538_s7 + $0x138] sm:$0xff] %vm896_vm2, %v1293_v43  ;;  %v637_v49 = vadd.f32 %v1160_v46, %v1520_v38  ;;  %1318 = vtanh.f32 %v626_v44 }
 0x10b   : > { %v628_v50 = vpop.f32.mrb[15].mxu0  ;;  %v756_v51 = vpop.f32.mrb[15].mxu1  ;;  %902 = vst.msk [vmem:[%s1538_s7 + $0x28] sm:$0xff] %vm896_vm2, %v1295_v48  ;;  %v765_v53 = vadd.f32 %v1192_v47, %v1520_v38  ;;  %1320 = vtanh.f32 %v754_v45 }
 0x10c   : > { %v1297_v52 = vpop.eup %1296  ;;  %v629_v55 = vadd.f32 %v1520_v38, %v628_v50  ;;  %v757_v57 = vadd.f32 %v1520_v38, %v756_v51  ;;  %1322 = vtanh.f32 %v637_v49 }
 0x10d   : > { %v1299_v54 = vpop.eup %1298  ;;  %934 = vst.msk [vmem:[%s1538_s7 + $0x128] sm:$0xff] %vm896_vm2, %v1297_v52  ;;  %1324 = vtanh.f32 %v765_v53  ;;  %v1163_v60 = vpop.f32.mrb[16].mxu0 }
 0x10e   : > { %v1301_v56 = vpop.eup %1300  ;;  %907 = vst.msk [vmem:[%s1538_s7 + $0x50] sm:$0xff] %vm896_vm2, %v1299_v54  ;;  %v1195_v61 = vpop.f32.mrb[16].mxu1  ;;  %1326 = vtanh.f32 %v629_v55  ;;  %v650_v63 = vadd.f32 %v1163_v60, %v1520_v38 }
 0x10f   : > { %v1303_v58 = vpop.eup %1302  ;;  %939 = vst.msk [vmem:[%s1538_s7 + $0x150] sm:$0xff] %vm896_vm2, %v1301_v56  ;;  %v778_v0 = vadd.f32 %v1195_v61, %v1520_v38  ;;  %v641_v1 = vpop.f32.mrb[17].mxu0  ;;  %1328 = vtanh.f32 %v757_v57 }
 0x110   : > { %v1305_v59 = vpop.eup %1304  ;;  %905 = vst.msk [vmem:[%s1538_s7 + $0x40] sm:$0xff] %vm896_vm2, %v1303_v58  ;;  %v769_v2 = vpop.f32.mrb[17].mxu1  ;;  %v642_v4 = vadd.f32 %v1520_v38, %v641_v1  ;;  %1330 = vtanh.f32 %v650_v63 }
 0x111   : > { %v1307_v62 = vpop.eup %1306  ;;  %937 = vst.msk [vmem:[%s1538_s7 + $0x140] sm:$0xff] %vm896_vm2, %v1305_v59  ;;  %v770_v5 = vadd.f32 %v1520_v38, %v769_v2  ;;  %v1164_v6 = vpop.f32.mrb[18].mxu0  ;;  %1332 = vtanh.f32 %v778_v0 }
 0x112   : > { %v1309_v3 = vpop.eup %1308  ;;  %908 = vst.msk [vmem:[%s1538_s7 + $0x58] sm:$0xff] %vm896_vm2, %v1307_v62  ;;  %v1196_v7 = vpop.f32.mrb[18].mxu1  ;;  %v653_v9 = vadd.f32 %v1164_v6, %v1520_v38  ;;  %1334 = vtanh.f32 %v642_v4 }
 0x113   : > { %v1311_v8 = vpop.eup %1310  ;;  %940 = vst.msk [vmem:[%s1538_s7 + $0x158] sm:$0xff] %vm896_vm2, %v1309_v3  ;;  %v644_v10 = vpop.f32.mrb[19].mxu0  ;;  %v781_v13 = vadd.f32 %v1196_v7, %v1520_v38  ;;  %1336 = vtanh.f32 %v770_v5 }
 0x114   : > { %v772_v11 = vpop.f32.mrb[19].mxu1  ;;  %v1313_v12 = vpop.eup %1312  ;;  %906 = vst.msk [vmem:[%s1538_s7 + $0x48] sm:$0xff] %vm896_vm2, %v1311_v8  ;;  %v645_v15 = vadd.f32 %v1520_v38, %v644_v10  ;;  %1338 = vtanh.f32 %v653_v9 }
 0x115   : > { %v1315_v14 = vpop.eup %1314  ;;  %938 = vst.msk [vmem:[%s1538_s7 + $0x148] sm:$0xff] %vm896_vm2, %v1313_v12  ;;  %v773_v17 = vadd.f32 %v1520_v38, %v772_v11  ;;  %1340 = vtanh.f32 %v781_v13  ;;  %v1167_v20 = vpop.f32.mrb[20].mxu0 }
 0x116   : > { %v1317_v16 = vpop.eup %1316  ;;  %911 = vst.msk [vmem:[%s1538_s7 + $0x70] sm:$0xff] %vm896_vm2, %v1315_v14  ;;  %v1199_v21 = vpop.f32.mrb[20].mxu1  ;;  %1342 = vtanh.f32 %v645_v15  ;;  %v666_v23 = vadd.f32 %v1167_v20, %v1520_v38 }
 0x117   : > { %v1319_v18 = vpop.eup %1318  ;;  %943 = vst.msk [vmem:[%s1538_s7 + $0x170] sm:$0xff] %vm896_vm2, %v1317_v16  ;;  %v794_v24 = vadd.f32 %v1199_v21, %v1520_v38  ;;  %v657_v25 = vpop.f32.mrb[21].mxu0  ;;  %1344 = vtanh.f32 %v773_v17 }
 0x118   : > { %v1321_v19 = vpop.eup %1320  ;;  %909 = vst.msk [vmem:[%s1538_s7 + $0x60] sm:$0xff] %vm896_vm2, %v1319_v18  ;;  %v785_v26 = vpop.f32.mrb[21].mxu1  ;;  %v658_v28 = vadd.f32 %v1520_v38, %v657_v25  ;;  %1346 = vtanh.f32 %v666_v23 }
 0x119   : > { %v1323_v22 = vpop.eup %1322  ;;  %941 = vst.msk [vmem:[%s1538_s7 + $0x160] sm:$0xff] %vm896_vm2, %v1321_v19  ;;  %v786_v29 = vadd.f32 %v1520_v38, %v785_v26  ;;  %v1168_v30 = vpop.f32.mrb[22].mxu0  ;;  %1348 = vtanh.f32 %v794_v24 }
 0x11a   : > { %v1325_v27 = vpop.eup %1324  ;;  %912 = vst.msk [vmem:[%s1538_s7 + $0x78] sm:$0xff] %vm896_vm2, %v1323_v22  ;;  %v1200_v31 = vpop.f32.mrb[22].mxu1  ;;  %v669_v33 = vadd.f32 %v1168_v30, %v1520_v38  ;;  %1350 = vtanh.f32 %v658_v28 }
 0x11b   : > { %v1327_v32 = vpop.eup %1326  ;;  %944 = vst.msk [vmem:[%s1538_s7 + $0x178] sm:$0xff] %vm896_vm2, %v1325_v27  ;;  %v660_v34 = vpop.f32.mrb[23].mxu0  ;;  %v797_v37 = vadd.f32 %v1200_v31, %v1520_v38  ;;  %1352 = vtanh.f32 %v786_v29 }
 0x11c   : > { %v788_v35 = vpop.f32.mrb[23].mxu1  ;;  %v1329_v36 = vpop.eup %1328  ;;  %910 = vst.msk [vmem:[%s1538_s7 + $0x68] sm:$0xff] %vm896_vm2, %v1327_v32  ;;  %v661_v40 = vadd.f32 %v1520_v38, %v660_v34  ;;  %1354 = vtanh.f32 %v669_v33 }
 0x11d   : > { %v1331_v39 = vpop.eup %1330  ;;  %942 = vst.msk [vmem:[%s1538_s7 + $0x168] sm:$0xff] %vm896_vm2, %v1329_v36  ;;  %v789_v42 = vadd.f32 %v1520_v38, %v788_v35  ;;  %1356 = vtanh.f32 %v797_v37  ;;  %v1171_v45 = vpop.f32.mrb[24].mxu0 }
 0x11e   : > { %v1333_v41 = vpop.eup %1332  ;;  %915 = vst.msk [vmem:[%s1538_s7 + $0x90] sm:$0xff] %vm896_vm2, %v1331_v39  ;;  %v1203_v46 = vpop.f32.mrb[24].mxu1  ;;  %1358 = vtanh.f32 %v661_v40  ;;  %v682_v48 = vadd.f32 %v1171_v45, %v1520_v38 }
 0x11f   : > { %v1335_v43 = vpop.eup %1334  ;;  %947 = vst.msk [vmem:[%s1538_s7 + $0x190] sm:$0xff] %vm896_vm2, %v1333_v41  ;;  %v810_v49 = vadd.f32 %v1203_v46, %v1520_v38  ;;  %v673_v50 = vpop.f32.mrb[25].mxu0  ;;  %1360 = vtanh.f32 %v789_v42 }
 0x120   : > { %v1337_v44 = vpop.eup %1336  ;;  %913 = vst.msk [vmem:[%s1538_s7 + $0x80] sm:$0xff] %vm896_vm2, %v1335_v43  ;;  %v801_v51 = vpop.f32.mrb[25].mxu1  ;;  %v674_v53 = vadd.f32 %v1520_v38, %v673_v50  ;;  %1362 = vtanh.f32 %v682_v48 }
 0x121   : > { %v1339_v47 = vpop.eup %1338  ;;  %945 = vst.msk [vmem:[%s1538_s7 + $0x180] sm:$0xff] %vm896_vm2, %v1337_v44  ;;  %v802_v54 = vadd.f32 %v1520_v38, %v801_v51  ;;  %v1172_v55 = vpop.f32.mrb[26].mxu0  ;;  %1364 = vtanh.f32 %v810_v49 }
 0x122   : > { %v1341_v52 = vpop.eup %1340  ;;  %916 = vst.msk [vmem:[%s1538_s7 + $0x98] sm:$0xff] %vm896_vm2, %v1339_v47  ;;  %v1204_v56 = vpop.f32.mrb[26].mxu1  ;;  %v685_v58 = vadd.f32 %v1172_v55, %v1520_v38  ;;  %1366 = vtanh.f32 %v674_v53 }
 0x123   : > { %v1343_v57 = vpop.eup %1342  ;;  %948 = vst.msk [vmem:[%s1538_s7 + $0x198] sm:$0xff] %vm896_vm2, %v1341_v52  ;;  %v676_v59 = vpop.f32.mrb[27].mxu0  ;;  %v813_v62 = vadd.f32 %v1204_v56, %v1520_v38  ;;  %1368 = vtanh.f32 %v802_v54 }
 0x124   : > { %v804_v60 = vpop.f32.mrb[27].mxu1  ;;  %v1345_v61 = vpop.eup %1344  ;;  %914 = vst.msk [vmem:[%s1538_s7 + $0x88] sm:$0xff] %vm896_vm2, %v1343_v57  ;;  %v677_v0 = vadd.f32 %v1520_v38, %v676_v59  ;;  %1370 = vtanh.f32 %v685_v58 }
 0x125   : > { %v1347_v63 = vpop.eup %1346  ;;  %946 = vst.msk [vmem:[%s1538_s7 + $0x188] sm:$0xff] %vm896_vm2, %v1345_v61  ;;  %v805_v2 = vadd.f32 %v1520_v38, %v804_v60  ;;  %1372 = vtanh.f32 %v813_v62  ;;  %v1175_v5 = vpop.f32.mrb[28].mxu0 }
 0x126   : > { %v1349_v1 = vpop.eup %1348  ;;  %919 = vst.msk [vmem:[%s1538_s7 + $0xb0] sm:$0xff] %vm896_vm2, %v1347_v63  ;;  %v1207_v6 = vpop.f32.mrb[28].mxu1  ;;  %1374 = vtanh.f32 %v677_v0  ;;  %v698_v8 = vadd.f32 %v1175_v5, %v1520_v38 }
 0x127   : > { %v1351_v3 = vpop.eup %1350  ;;  %951 = vst.msk [vmem:[%s1538_s7 + $0x1b0] sm:$0xff] %vm896_vm2, %v1349_v1  ;;  %v826_v9 = vadd.f32 %v1207_v6, %v1520_v38  ;;  %v689_v10 = vpop.f32.mrb[29].mxu0  ;;  %1376 = vtanh.f32 %v805_v2 }
 0x128   : > { %v1353_v4 = vpop.eup %1352  ;;  %917 = vst.msk [vmem:[%s1538_s7 + $0xa0] sm:$0xff] %vm896_vm2, %v1351_v3  ;;  %v817_v11 = vpop.f32.mrb[29].mxu1  ;;  %v690_v13 = vadd.f32 %v1520_v38, %v689_v10  ;;  %1378 = vtanh.f32 %v698_v8 }
 0x129   : > { %v1355_v7 = vpop.eup %1354  ;;  %949 = vst.msk [vmem:[%s1538_s7 + $0x1a0] sm:$0xff] %vm896_vm2, %v1353_v4  ;;  %v818_v14 = vadd.f32 %v1520_v38, %v817_v11  ;;  %v1176_v15 = vpop.f32.mrb[30].mxu0  ;;  %1380 = vtanh.f32 %v826_v9 }
 0x12a   : > { %v1357_v12 = vpop.eup %1356  ;;  %920 = vst.msk [vmem:[%s1538_s7 + $0xb8] sm:$0xff] %vm896_vm2, %v1355_v7  ;;  %v1208_v16 = vpop.f32.mrb[30].mxu1  ;;  %v701_v18 = vadd.f32 %v1176_v15, %v1520_v38  ;;  %1382 = vtanh.f32 %v690_v13 }
 0x12b   : > { %v1359_v17 = vpop.eup %1358  ;;  %952 = vst.msk [vmem:[%s1538_s7 + $0x1b8] sm:$0xff] %vm896_vm2, %v1357_v12  ;;  %v692_v19 = vpop.f32.mrb[31].mxu0  ;;  %v829_v22 = vadd.f32 %v1208_v16, %v1520_v38  ;;  %1384 = vtanh.f32 %v818_v14 }
 0x12c   : > { %v820_v20 = vpop.f32.mrb[31].mxu1  ;;  %v1361_v21 = vpop.eup %1360  ;;  %918 = vst.msk [vmem:[%s1538_s7 + $0xa8] sm:$0xff] %vm896_vm2, %v1359_v17  ;;  %v693_v24 = vadd.f32 %v1520_v38, %v692_v19  ;;  %1386 = vtanh.f32 %v701_v18 }
 0x12d   : > { %v1363_v23 = vpop.eup %1362  ;;  %950 = vst.msk [vmem:[%s1538_s7 + $0x1a8] sm:$0xff] %vm896_vm2, %v1361_v21  ;;  %v821_v26 = vadd.f32 %v1520_v38, %v820_v20  ;;  %1388 = vtanh.f32 %v829_v22 }
 0x12e   : > { %v1365_v25 = vpop.eup %1364  ;;  %923 = vst.msk [vmem:[%s1538_s7 + $0xd0] sm:$0xff] %vm896_vm2, %v1363_v23  ;;  %1390 = vtanh.f32 %v693_v24 }
 0x12f   : > { %v1367_v27 = vpop.eup %1366  ;;  %955 = vst.msk [vmem:[%s1538_s7 + $0x1d0] sm:$0xff] %vm896_vm2, %v1365_v25  ;;  %1392 = vtanh.f32 %v821_v26 }
 0x130   : > { %v1369_v28 = vpop.eup %1368  ;;  %921 = vst.msk [vmem:[%s1538_s7 + $0xc0] sm:$0xff] %vm896_vm2, %v1367_v27 }
 0x131   : > { %v1371_v29 = vpop.eup %1370  ;;  %953 = vst.msk [vmem:[%s1538_s7 + $0x1c0] sm:$0xff] %vm896_vm2, %v1369_v28 }
 0x132   : > { %v1373_v30 = vpop.eup %1372  ;;  %924 = vst.msk [vmem:[%s1538_s7 + $0xd8] sm:$0xff] %vm896_vm2, %v1371_v29 }
 0x133   : > { %v1375_v38 = vpop.eup %1374  ;;  %956 = vst.msk [vmem:[%s1538_s7 + $0x1d8] sm:$0xff] %vm896_vm2, %v1373_v30 }
 0x134   : > { %v1377_v31 = vpop.eup %1376  ;;  %922 = vst.msk [vmem:[%s1538_s7 + $0xc8] sm:$0xff] %vm896_vm2, %v1375_v38 }
 0x135   : > { %v1379_v32 = vpop.eup %1378  ;;  %954 = vst.msk [vmem:[%s1538_s7 + $0x1c8] sm:$0xff] %vm896_vm2, %v1377_v31 }
 0x136   : > { %v1381_v33 = vpop.eup %1380  ;;  %927 = vst.msk [vmem:[%s1538_s7 + $0xf0] sm:$0xff] %vm896_vm2, %v1379_v32 }
 0x137   : > { %v1383_v34 = vpop.eup %1382  ;;  %959 = vst.msk [vmem:[%s1538_s7 + $0x1f0] sm:$0xff] %vm896_vm2, %v1381_v33 }
 0x138   : > { %v1385_v35 = vpop.eup %1384  ;;  %925 = vst.msk [vmem:[%s1538_s7 + $0xe0] sm:$0xff] %vm896_vm2, %v1383_v34 }
 0x139   : > { %v1387_v36 = vpop.eup %1386  ;;  %957 = vst.msk [vmem:[%s1538_s7 + $0x1e0] sm:$0xff] %vm896_vm2, %v1385_v35 }
 0x13a   : > { %v1389_v37 = vpop.eup %1388  ;;  %928 = vst.msk [vmem:[%s1538_s7 + $0xf8] sm:$0xff] %vm896_vm2, %v1387_v36 }
 0x13b   : > { %v1391_v39 = vpop.eup %1390  ;;  %960 = vst.msk [vmem:[%s1538_s7 + $0x1f8] sm:$0xff] %vm896_vm2, %v1389_v37 }
 0x13c   : > { %v1393_v40 = vpop.eup %1392  ;;  %926 = vst.msk [vmem:[%s1538_s7 + $0xe8] sm:$0xff] %vm896_vm2, %v1391_v39 }
 0x13d   : > { %958 = vst.msk [vmem:[%s1538_s7 + $0x1e8] sm:$0xff] %vm896_vm2, %v1393_v40 }
 0x13e PF: > { %s13_s12 = sadd.s32 1, %s1400_s12  }
 0x13f   : > { %p10_p4 = scmp.ge.s32.totalorder %s13_s12, 6  }
 0x141   :  { %12 = sbr.rel (!%p10_p4) target bundleno = 1 (0x1), region = 62 }

</bundles_post_ra>
